<compile_context>
chip_gen: v7x
topology: tpu7x:2x2x1
jax: 0.10.0
libtpu: 0.0.40
codegen_flags: <defaults>
</compile_context>

<pallas_src>
import functools

import jax
import jax.numpy as jnp
from jax.experimental import pallas as pl
from jax.experimental.pallas import tpu as pltpu


def _round_up(x, m):
    return ((x + m - 1) // m) * m


# ----------------------------------------------------------------------------
# Fused Pallas kernel: whole CNN.forward for Bblk images per grid step.
# Activations are channel-major (C, L), L = Bblk * P, where P is the flattened
# zero-padded (H+2)x(W+2) canvas rounded up to a multiple of 128 (lane-dense).
# ----------------------------------------------------------------------------
def _cnn_fused_kernel(
    x_ref, mask_ref, wt_ref, o_ref,
    *, canvas_w, light_num, light_num_use, layers,
):
    L = mask_ref.shape[-1]
    mask = mask_ref[...]                    # (1, L): 1 at real pixels, 0 at pads
    lnu = light_num_use

    # Channel slicing of the network input (matches x[:, :3], x[:, 3:3+lnu]/255,
    # x[:, 3+ln : 3+ln+3*lnu] of the PyTorch forward).
    x_vertex = x_ref[0, 0:3, :]                                        # (3, L)
    x_img = x_ref[0, 3:3 + lnu, :] * jnp.float32(1.0 / 255.0)          # (lnu, L)
    lo = 3 + light_num
    x_light = x_ref[0, lo:lo + 3 * lnu, :]                             # (3*lnu, L)

    # Flattened-canvas lane shifts for the 9 taps of a 3x3 / stride-1 / pad-1
    # conv (jnp.roll convention: out[i] = x[i + off]).
    shifts = []
    for t in range(9):
        dh, dw = t // 3 - 1, t % 3 - 1
        off = dh * canvas_w + dw
        shifts.append((-off) % L)

    def conv3x3(x_in, layer, relu, apply_mask):
        # x_in: (Ci, L) with zeros at every pad position of every canvas slot.
        # One stacked-tap matmul per layer: (Cout, 9*Ci) @ (9*Ci, L).
        row, cout, k = layer
        taps = [x_in if s == 0 else pltpu.roll(x_in, s, axis=1) for s in shifts]
        stacked = jnp.concatenate(taps, axis=0)            # (9*Ci, L)
        assert stacked.shape[0] == k, (stacked.shape, k)
        w = wt_ref[row:row + cout, 0:k]                    # (Cout, 9*Ci)
        b = wt_ref[row:row + cout, k:k + 1]                # (Cout, 1)
        acc = jnp.dot(w, stacked, preferred_element_type=jnp.float32) + b
        if relu:
            acc = jnp.maximum(acc, 0.0)
        if apply_mask:
            # Restore exact zeros at pad positions so the NEXT 3x3 conv sees
            # proper zero padding (also kills any cross-slot roll leakage).
            acc = acc * mask
        return acc

    # x_normal_out = self.normal_net(x_vertex)             (GCNN approximation)
    h = conv3x3(x_vertex, layers["n1"], relu=True, apply_mask=True)
    h = conv3x3(h, layers["n2"], relu=True, apply_mask=True)
    x_normal_out = conv3x3(h, layers["n3"], relu=False, apply_mask=True)

    # x_normal_delta = self.g_net(x_normal_out, x_light, x_img)   (GNet approx.)
    # Channel concat done once along sublanes; full g_w1 matrix used directly.
    g_in = jnp.concatenate([x_normal_out, x_light, x_img], axis=0)     # (11, L)
    g = conv3x3(g_in, layers["g1"], relu=True, apply_mask=True)
    g = conv3x3(g, layers["g2"], relu=True, apply_mask=True)
    # Output only feeds the residual add + 1x1 conv -> no mask needed.
    x_normal_delta = conv3x3(g, layers["g3"], relu=False, apply_mask=False)

    # x_normal_out_rectified = self.last_conv(x_normal_out + x_normal_delta)
    s = x_normal_out + x_normal_delta                                  # (3, L)
    row, cout, k = layers["last"]
    lw = wt_ref[row:row + cout, 0:k]                                   # (3, 3)
    lb = wt_ref[row:row + cout, k:k + 1]                               # (3, 1)
    out = jnp.dot(lw, s, preferred_element_type=jnp.float32) + lb
    o_ref[0] = out.astype(o_ref.dtype)                                 # lane-dense store


# ----------------------------------------------------------------------------
# Weight packing: one flat lane-dense f32 slab; per-layer static row offsets.
# ----------------------------------------------------------------------------
def _mat9(w):
    """(3, 3, Ci, Cout) HWIO -> (Cout, 9*Ci), column index = tap*Ci + ci."""
    kh, kw, ci, co = w.shape
    return jnp.transpose(w.reshape(kh * kw, ci, co), (2, 0, 1)).reshape(co, kh * kw * ci)


def _pack_weights(p):
    defs = [
        ("n1", _mat9(p["n_w1"]), p["n_b1"]),
        ("n2", _mat9(p["n_w2"]), p["n_b2"]),
        ("n3", _mat9(p["n_w3"]), p["n_b3"]),
        ("g1", _mat9(p["g_w1"]), p["g_b1"]),
        ("g2", _mat9(p["g_w2"]), p["g_b2"]),
        ("g3", _mat9(p["g_w3"]), p["g_b3"]),
        ("last", p["last_w"].T, p["last_b"]),   # (Cout, Cin) for channel-major dot
    ]
    max_k = max(int(w.shape[1]) for _, w, _ in defs)
    wcols = _round_up(max_k + 1, 128)           # +1 column for the bias
    rows, layers, r = [], {}, 0
    for name, w, b in defs:
        co, k = int(w.shape[0]), int(w.shape[1])
        blk = jnp.zeros((co, wcols), jnp.float32)
        blk = blk.at[:, :k].set(w.astype(jnp.float32))
        blk = blk.at[:, k].set(b.astype(jnp.float32))
        rows.append(blk)
        layers[name] = (r, co, k)
        r += co
    wpack = jnp.concatenate(rows, axis=0)
    rpad = _round_up(r, 8) - r                  # clean sublane tile
    if rpad:
        wpack = jnp.pad(wpack, ((0, rpad), (0, 0)))
    return wpack, layers


# ----------------------------------------------------------------------------
# Wrapper
# ----------------------------------------------------------------------------
def cnn_forward(params, x_nchw, *, light_num, light_num_use):
    B, C_in, H, W = x_nchw.shape
    hp, wpad = H + 2, W + 2
    p0 = hp * wpad
    P = _round_up(p0, 128)

    # Roll-wraparound safety (3x3 / stride 1 / pad 1 only): interior outputs
    # must never read outside their own image's canvas slot.
    assert (H + 1) * wpad + W + 1 < p0 and (wpad + 1) - (wpad + 1) >= 0

    # Fold batch into lanes: G grid steps x Bblk images per step.
    G = 2 if B % 2 == 0 else 1
    Bblk = B // G
    L = Bblk * P

    # Flattened zero-padded canvas, channel-major, images side by side in lanes.
    x = x_nchw.astype(jnp.float32)
    xc = jnp.pad(x, ((0, 0), (0, 0), (1, 1), (1, 1))).reshape(B, C_in, p0)
    xc = jnp.pad(xc, ((0, 0), (0, 0), (0, P - p0)))                     # (B, C, P)
    xc = xc.reshape(G, Bblk, C_in, P).transpose(0, 2, 1, 3).reshape(G, C_in, L)

    # Interior mask, replicated once per canvas slot.
    mask1 = jnp.pad(jnp.ones((H, W), jnp.float32), ((1, 1), (1, 1))).reshape(1, p0)
    mask1 = jnp.pad(mask1, ((0, 0), (0, P - p0)))                       # (1, P)
    mask = jnp.tile(mask1, (1, Bblk))                                   # (1, L)

    wpack, layers = _pack_weights(params)

    kernel = functools.partial(
        _cnn_fused_kernel,
        canvas_w=wpad, light_num=light_num, light_num_use=light_num_use,
        layers=layers,
    )

    out_c = pl.pallas_call(
        kernel,
        out_shape=jax.ShapeDtypeStruct((G, 3, L), jnp.float32),
        grid_spec=pltpu.PrefetchScalarGridSpec(
            num_scalar_prefetch=0,
            grid=(G,),                          # 2 parallel steps -> 2 v7x TCs
            in_specs=[
                pl.BlockSpec((1, C_in, L), lambda g: (g, 0, 0)),
                pl.BlockSpec((1, L), lambda g: (0, 0)),
                pl.BlockSpec(wpack.shape, lambda g: (0, 0)),
            ],
            out_specs=pl.BlockSpec((1, 3, L), lambda g: (g, 0, 0)),
        ),
        compiler_params=pltpu.CompilerParams(
            dimension_semantics=("parallel",),
        ),
    )(xc, mask, wpack)

    # (G, 3, Bblk*P) -> NCHW interior crop (output is already channel-major).
    out = out_c.reshape(G, 3, Bblk, P).transpose(0, 2, 1, 3).reshape(B, 3, P)
    return out[:, :, :p0].reshape(B, 3, hp, wpad)[:, :, 1:H + 1, 1:W + 1]


# ----------------------------------------------------------------------------
# Parameter init (deterministic, synthetic — no checkpoint loading)
# ----------------------------------------------------------------------------
def _conv_init(key, kh, kw, cin, cout):
    kw_, kb_ = jax.random.split(key)
    fan_in = kh * kw * cin
    scale = 1.0 / jnp.sqrt(jnp.float32(fan_in))
    w = jax.random.uniform(kw_, (kh, kw, cin, cout), jnp.float32, -scale, scale)
    b = jax.random.uniform(kb_, (cout,), jnp.float32, -scale, scale)
    return w, b


def init_params(key, channel_num, light_num_use):
    keys = jax.random.split(key, 7)
    p = {}
    # normal_net = GCNN(3, 3, channel_num) — approximated: 3x3 conv stack
    p["n_w1"], p["n_b1"] = _conv_init(keys[0], 3, 3, 3, channel_num)
    p["n_w2"], p["n_b2"] = _conv_init(keys[1], 3, 3, channel_num, channel_num)
    p["n_w3"], p["n_b3"] = _conv_init(keys[2], 3, 3, channel_num, 3)
    # g_net = GNet(3, 3, channel_num) — approximated: conv stack over
    # concat(normal 3ch, light 3*lnu ch, img lnu ch)
    g_in = 3 + 3 * light_num_use + light_num_use
    p["g_w1"], p["g_b1"] = _conv_init(keys[3], 3, 3, g_in, channel_num)
    p["g_w2"], p["g_b2"] = _conv_init(keys[4], 3, 3, channel_num, channel_num)
    p["g_w3"], p["g_b3"] = _conv_init(keys[5], 3, 3, channel_num, 3)
    # last_conv = nn.Conv2d(3, 3, (1,1))
    lw, lb = _conv_init(keys[6], 1, 1, 3, 3)
    p["last_w"] = lw.reshape(3, 3)   # (Cin, Cout)
    p["last_b"] = lb
    return p


if __name__ == "__main__":
    channel_num = 8
    light_num = 4
    light_num_use = 2
    B, H, W = 4, 16, 16
    C_in = 3 + light_num + 3 * light_num_use  # 13 channels used by the slicing

    key = jax.random.PRNGKey(0)
    k_param, k_x = jax.random.split(key)
    params = init_params(k_param, channel_num, light_num_use)
    x = jax.random.uniform(k_x, (B, C_in, H, W), jnp.float32, 0.0, 255.0)

    fwd = jax.jit(
        functools.partial(
            cnn_forward, light_num=light_num, light_num_use=light_num_use
        )
    )
    y = fwd(params, x)
    jax.block_until_ready(y)
    assert y.shape == (B, 3, H, W), y.shape
    print("KERNEL_OK")
</pallas_src>

<mosaic_0001>
module attributes {stable_mosaic.version = 11 : i64} {
  func.func @_cnn_fused_kernel(%arg0: i32, %arg1: memref<1x13x768xf32, #tpu.memory_space<vmem>>, %arg2: memref<1x768xf32, #tpu.memory_space<vmem>>, %arg3: memref<48x128xf32, #tpu.memory_space<vmem>>, %arg4: memref<1x3x768xf32, #tpu.memory_space<vmem>>) attributes {dimension_semantics = [#tpu.dimension_semantics<parallel>], iteration_bounds = array<i64: 2>, scalar_prefetch = 0 : i64, scratch_operands = 0 : i64, tpu.core_type = #tpu.core_type<tc>, window_params = [{transform_indices = @transform_0, window_bounds = array<i64: 1, 13, 768>}, {pipeline_mode = #tpu.pipeline_mode<synchronous>, transform_indices = @transform_1, window_bounds = array<i64: 1, 768>}, {pipeline_mode = #tpu.pipeline_mode<synchronous>, transform_indices = @transform_2, window_bounds = array<i64: 48, 128>}, {transform_indices = @transform_3, window_bounds = array<i64: 1, 3, 768>}]} {
    %c0 = arith.constant 0 : index
    %c0_0 = arith.constant 0 : index
    %0 = vector.load %arg2[%c0, %c0_0] : memref<1x768xf32, #tpu.memory_space<vmem>>, vector<1x768xf32>
    %c0_1 = arith.constant 0 : index
    %c0_2 = arith.constant 0 : index
    %c0_3 = arith.constant 0 : index
    %1 = vector.load %arg1[%c0_1, %c0_2, %c0_3] : memref<1x13x768xf32, #tpu.memory_space<vmem>>, vector<1x3x768xf32>
    %2 = vector.shape_cast %1 : vector<1x3x768xf32> to vector<3x768xf32>
    %c0_4 = arith.constant 0 : index
    %c3 = arith.constant 3 : index
    %c0_5 = arith.constant 0 : index
    %3 = vector.load %arg1[%c0_4, %c3, %c0_5] : memref<1x13x768xf32, #tpu.memory_space<vmem>>, vector<1x2x768xf32>
    %4 = vector.shape_cast %3 : vector<1x2x768xf32> to vector<2x768xf32>
    %cst = arith.constant 0.00392156886 : f32
    %5 = vector.broadcast %cst : f32 to vector<2x768xf32>
    %6 = arith.mulf %4, %5 : vector<2x768xf32>
    %c0_6 = arith.constant 0 : index
    %c7 = arith.constant 7 : index
    %c0_7 = arith.constant 0 : index
    %7 = vector.load %arg1[%c0_6, %c7, %c0_7] : memref<1x13x768xf32, #tpu.memory_space<vmem>>, vector<1x6x768xf32>
    %8 = vector.shape_cast %7 : vector<1x6x768xf32> to vector<6x768xf32>
    %c19_i32 = arith.constant 19 : i32
    %9 = tpu.dynamic_rotate %2 by %c19_i32 dim 1 : vector<3x768xf32>, i32 -> vector<3x768xf32>
    %c18_i32 = arith.constant 18 : i32
    %10 = tpu.dynamic_rotate %2 by %c18_i32 dim 1 : vector<3x768xf32>, i32 -> vector<3x768xf32>
    %c17_i32 = arith.constant 17 : i32
    %11 = tpu.dynamic_rotate %2 by %c17_i32 dim 1 : vector<3x768xf32>, i32 -> vector<3x768xf32>
    %c1_i32 = arith.constant 1 : i32
    %12 = tpu.dynamic_rotate %2 by %c1_i32 dim 1 : vector<3x768xf32>, i32 -> vector<3x768xf32>
    %c767_i32 = arith.constant 767 : i32
    %13 = tpu.dynamic_rotate %2 by %c767_i32 dim 1 : vector<3x768xf32>, i32 -> vector<3x768xf32>
    %c751_i32 = arith.constant 751 : i32
    %14 = tpu.dynamic_rotate %2 by %c751_i32 dim 1 : vector<3x768xf32>, i32 -> vector<3x768xf32>
    %c750_i32 = arith.constant 750 : i32
    %15 = tpu.dynamic_rotate %2 by %c750_i32 dim 1 : vector<3x768xf32>, i32 -> vector<3x768xf32>
    %c749_i32 = arith.constant 749 : i32
    %16 = tpu.dynamic_rotate %2 by %c749_i32 dim 1 : vector<3x768xf32>, i32 -> vector<3x768xf32>
    %17 = tpu.concatenate %9, %10, %11, %12, %2, %13, %14, %15, %16 in 0 : vector<3x768xf32>, vector<3x768xf32>, vector<3x768xf32>, vector<3x768xf32>, vector<3x768xf32>, vector<3x768xf32>, vector<3x768xf32>, vector<3x768xf32>, vector<3x768xf32> -> vector<27x768xf32>
    %c0_8 = arith.constant 0 : index
    %c0_9 = arith.constant 0 : index
    %18 = vector.load %arg3[%c0_8, %c0_9] : memref<48x128xf32, #tpu.memory_space<vmem>>, vector<8x27xf32>
    %c0_10 = arith.constant 0 : index
    %c27 = arith.constant 27 : index
    %19 = vector.load %arg3[%c0_10, %c27] : memref<48x128xf32, #tpu.memory_space<vmem>>, vector<8x1xf32>
    %cst_11 = arith.constant dense<0.000000e+00> : vector<8x768xf32>
    %20 = tpu.matmul %18, %17, %cst_11 {dimension_numbers = #tpu.dot_dimension_numbers<[1], [0], [0], [1], [0, 0, 1, 1], [], []>} : vector<8x27xf32>, vector<27x768xf32>, vector<8x768xf32> -> vector<8x768xf32>
    %21 = vector.broadcast %19 : vector<8x1xf32> to vector<8x768xf32>
    %22 = arith.addf %20, %21 : vector<8x768xf32>
    %cst_12 = arith.constant 0.000000e+00 : f32
    %23 = vector.broadcast %cst_12 : f32 to vector<8x768xf32>
    %24 = arith.maximumf %22, %23 : vector<8x768xf32>
    %25 = vector.broadcast %0 : vector<1x768xf32> to vector<8x768xf32>
    %26 = arith.mulf %24, %25 : vector<8x768xf32>
    %c19_i32_13 = arith.constant 19 : i32
    %27 = tpu.dynamic_rotate %26 by %c19_i32_13 dim 1 : vector<8x768xf32>, i32 -> vector<8x768xf32>
    %c18_i32_14 = arith.constant 18 : i32
    %28 = tpu.dynamic_rotate %26 by %c18_i32_14 dim 1 : vector<8x768xf32>, i32 -> vector<8x768xf32>
    %c17_i32_15 = arith.constant 17 : i32
    %29 = tpu.dynamic_rotate %26 by %c17_i32_15 dim 1 : vector<8x768xf32>, i32 -> vector<8x768xf32>
    %c1_i32_16 = arith.constant 1 : i32
    %30 = tpu.dynamic_rotate %26 by %c1_i32_16 dim 1 : vector<8x768xf32>, i32 -> vector<8x768xf32>
    %c767_i32_17 = arith.constant 767 : i32
    %31 = tpu.dynamic_rotate %26 by %c767_i32_17 dim 1 : vector<8x768xf32>, i32 -> vector<8x768xf32>
    %c751_i32_18 = arith.constant 751 : i32
    %32 = tpu.dynamic_rotate %26 by %c751_i32_18 dim 1 : vector<8x768xf32>, i32 -> vector<8x768xf32>
    %c750_i32_19 = arith.constant 750 : i32
    %33 = tpu.dynamic_rotate %26 by %c750_i32_19 dim 1 : vector<8x768xf32>, i32 -> vector<8x768xf32>
    %c749_i32_20 = arith.constant 749 : i32
    %34 = tpu.dynamic_rotate %26 by %c749_i32_20 dim 1 : vector<8x768xf32>, i32 -> vector<8x768xf32>
    %35 = tpu.concatenate %27, %28, %29, %30, %26, %31, %32, %33, %34 in 0 : vector<8x768xf32>, vector<8x768xf32>, vector<8x768xf32>, vector<8x768xf32>, vector<8x768xf32>, vector<8x768xf32>, vector<8x768xf32>, vector<8x768xf32>, vector<8x768xf32> -> vector<72x768xf32>
    %c8 = arith.constant 8 : index
    %c0_21 = arith.constant 0 : index
    %36 = vector.load %arg3[%c8, %c0_21] : memref<48x128xf32, #tpu.memory_space<vmem>>, vector<8x72xf32>
    %c8_22 = arith.constant 8 : index
    %c72 = arith.constant 72 : index
    %37 = vector.load %arg3[%c8_22, %c72] : memref<48x128xf32, #tpu.memory_space<vmem>>, vector<8x1xf32>
    %cst_23 = arith.constant dense<0.000000e+00> : vector<8x768xf32>
    %38 = tpu.matmul %36, %35, %cst_23 {dimension_numbers = #tpu.dot_dimension_numbers<[1], [0], [0], [1], [0, 0, 1, 1], [], []>} : vector<8x72xf32>, vector<72x768xf32>, vector<8x768xf32> -> vector<8x768xf32>
    %39 = vector.broadcast %37 : vector<8x1xf32> to vector<8x768xf32>
    %40 = arith.addf %38, %39 : vector<8x768xf32>
    %cst_24 = arith.constant 0.000000e+00 : f32
    %41 = vector.broadcast %cst_24 : f32 to vector<8x768xf32>
    %42 = arith.maximumf %40, %41 : vector<8x768xf32>
    %43 = vector.broadcast %0 : vector<1x768xf32> to vector<8x768xf32>
    %44 = arith.mulf %42, %43 : vector<8x768xf32>
    %c19_i32_25 = arith.constant 19 : i32
    %45 = tpu.dynamic_rotate %44 by %c19_i32_25 dim 1 : vector<8x768xf32>, i32 -> vector<8x768xf32>
    %c18_i32_26 = arith.constant 18 : i32
    %46 = tpu.dynamic_rotate %44 by %c18_i32_26 dim 1 : vector<8x768xf32>, i32 -> vector<8x768xf32>
    %c17_i32_27 = arith.constant 17 : i32
    %47 = tpu.dynamic_rotate %44 by %c17_i32_27 dim 1 : vector<8x768xf32>, i32 -> vector<8x768xf32>
    %c1_i32_28 = arith.constant 1 : i32
    %48 = tpu.dynamic_rotate %44 by %c1_i32_28 dim 1 : vector<8x768xf32>, i32 -> vector<8x768xf32>
    %c767_i32_29 = arith.constant 767 : i32
    %49 = tpu.dynamic_rotate %44 by %c767_i32_29 dim 1 : vector<8x768xf32>, i32 -> vector<8x768xf32>
    %c751_i32_30 = arith.constant 751 : i32
    %50 = tpu.dynamic_rotate %44 by %c751_i32_30 dim 1 : vector<8x768xf32>, i32 -> vector<8x768xf32>
    %c750_i32_31 = arith.constant 750 : i32
    %51 = tpu.dynamic_rotate %44 by %c750_i32_31 dim 1 : vector<8x768xf32>, i32 -> vector<8x768xf32>
    %c749_i32_32 = arith.constant 749 : i32
    %52 = tpu.dynamic_rotate %44 by %c749_i32_32 dim 1 : vector<8x768xf32>, i32 -> vector<8x768xf32>
    %53 = tpu.concatenate %45, %46, %47, %48, %44, %49, %50, %51, %52 in 0 : vector<8x768xf32>, vector<8x768xf32>, vector<8x768xf32>, vector<8x768xf32>, vector<8x768xf32>, vector<8x768xf32>, vector<8x768xf32>, vector<8x768xf32>, vector<8x768xf32> -> vector<72x768xf32>
    %c16 = arith.constant 16 : index
    %c0_33 = arith.constant 0 : index
    %54 = vector.load %arg3[%c16, %c0_33] : memref<48x128xf32, #tpu.memory_space<vmem>>, vector<3x72xf32>
    %c16_34 = arith.constant 16 : index
    %c72_35 = arith.constant 72 : index
    %55 = vector.load %arg3[%c16_34, %c72_35] : memref<48x128xf32, #tpu.memory_space<vmem>>, vector<3x1xf32>
    %cst_36 = arith.constant dense<0.000000e+00> : vector<3x768xf32>
    %56 = tpu.matmul %54, %53, %cst_36 {dimension_numbers = #tpu.dot_dimension_numbers<[1], [0], [0], [1], [0, 0, 1, 1], [], []>} : vector<3x72xf32>, vector<72x768xf32>, vector<3x768xf32> -> vector<3x768xf32>
    %57 = vector.broadcast %55 : vector<3x1xf32> to vector<3x768xf32>
    %58 = arith.addf %56, %57 : vector<3x768xf32>
    %59 = vector.broadcast %0 : vector<1x768xf32> to vector<3x768xf32>
    %60 = arith.mulf %58, %59 : vector<3x768xf32>
    %61 = tpu.concatenate %60, %8, %6 in 0 : vector<3x768xf32>, vector<6x768xf32>, vector<2x768xf32> -> vector<11x768xf32>
    %c19_i32_37 = arith.constant 19 : i32
    %62 = tpu.dynamic_rotate %61 by %c19_i32_37 dim 1 : vector<11x768xf32>, i32 -> vector<11x768xf32>
    %c18_i32_38 = arith.constant 18 : i32
    %63 = tpu.dynamic_rotate %61 by %c18_i32_38 dim 1 : vector<11x768xf32>, i32 -> vector<11x768xf32>
    %c17_i32_39 = arith.constant 17 : i32
    %64 = tpu.dynamic_rotate %61 by %c17_i32_39 dim 1 : vector<11x768xf32>, i32 -> vector<11x768xf32>
    %c1_i32_40 = arith.constant 1 : i32
    %65 = tpu.dynamic_rotate %61 by %c1_i32_40 dim 1 : vector<11x768xf32>, i32 -> vector<11x768xf32>
    %c767_i32_41 = arith.constant 767 : i32
    %66 = tpu.dynamic_rotate %61 by %c767_i32_41 dim 1 : vector<11x768xf32>, i32 -> vector<11x768xf32>
    %c751_i32_42 = arith.constant 751 : i32
    %67 = tpu.dynamic_rotate %61 by %c751_i32_42 dim 1 : vector<11x768xf32>, i32 -> vector<11x768xf32>
    %c750_i32_43 = arith.constant 750 : i32
    %68 = tpu.dynamic_rotate %61 by %c750_i32_43 dim 1 : vector<11x768xf32>, i32 -> vector<11x768xf32>
    %c749_i32_44 = arith.constant 749 : i32
    %69 = tpu.dynamic_rotate %61 by %c749_i32_44 dim 1 : vector<11x768xf32>, i32 -> vector<11x768xf32>
    %70 = tpu.concatenate %62, %63, %64, %65, %61, %66, %67, %68, %69 in 0 : vector<11x768xf32>, vector<11x768xf32>, vector<11x768xf32>, vector<11x768xf32>, vector<11x768xf32>, vector<11x768xf32>, vector<11x768xf32>, vector<11x768xf32>, vector<11x768xf32> -> vector<99x768xf32>
    %c19 = arith.constant 19 : index
    %c0_45 = arith.constant 0 : index
    %71 = vector.load %arg3[%c19, %c0_45] : memref<48x128xf32, #tpu.memory_space<vmem>>, vector<8x99xf32>
    %c19_46 = arith.constant 19 : index
    %c99 = arith.constant 99 : index
    %72 = vector.load %arg3[%c19_46, %c99] : memref<48x128xf32, #tpu.memory_space<vmem>>, vector<8x1xf32>
    %cst_47 = arith.constant dense<0.000000e+00> : vector<8x768xf32>
    %73 = tpu.matmul %71, %70, %cst_47 {dimension_numbers = #tpu.dot_dimension_numbers<[1], [0], [0], [1], [0, 0, 1, 1], [], []>} : vector<8x99xf32>, vector<99x768xf32>, vector<8x768xf32> -> vector<8x768xf32>
    %74 = vector.broadcast %72 : vector<8x1xf32> to vector<8x768xf32>
    %75 = arith.addf %73, %74 : vector<8x768xf32>
    %cst_48 = arith.constant 0.000000e+00 : f32
    %76 = vector.broadcast %cst_48 : f32 to vector<8x768xf32>
    %77 = arith.maximumf %75, %76 : vector<8x768xf32>
    %78 = vector.broadcast %0 : vector<1x768xf32> to vector<8x768xf32>
    %79 = arith.mulf %77, %78 : vector<8x768xf32>
    %c19_i32_49 = arith.constant 19 : i32
    %80 = tpu.dynamic_rotate %79 by %c19_i32_49 dim 1 : vector<8x768xf32>, i32 -> vector<8x768xf32>
    %c18_i32_50 = arith.constant 18 : i32
    %81 = tpu.dynamic_rotate %79 by %c18_i32_50 dim 1 : vector<8x768xf32>, i32 -> vector<8x768xf32>
    %c17_i32_51 = arith.constant 17 : i32
    %82 = tpu.dynamic_rotate %79 by %c17_i32_51 dim 1 : vector<8x768xf32>, i32 -> vector<8x768xf32>
    %c1_i32_52 = arith.constant 1 : i32
    %83 = tpu.dynamic_rotate %79 by %c1_i32_52 dim 1 : vector<8x768xf32>, i32 -> vector<8x768xf32>
    %c767_i32_53 = arith.constant 767 : i32
    %84 = tpu.dynamic_rotate %79 by %c767_i32_53 dim 1 : vector<8x768xf32>, i32 -> vector<8x768xf32>
    %c751_i32_54 = arith.constant 751 : i32
    %85 = tpu.dynamic_rotate %79 by %c751_i32_54 dim 1 : vector<8x768xf32>, i32 -> vector<8x768xf32>
    %c750_i32_55 = arith.constant 750 : i32
    %86 = tpu.dynamic_rotate %79 by %c750_i32_55 dim 1 : vector<8x768xf32>, i32 -> vector<8x768xf32>
    %c749_i32_56 = arith.constant 749 : i32
    %87 = tpu.dynamic_rotate %79 by %c749_i32_56 dim 1 : vector<8x768xf32>, i32 -> vector<8x768xf32>
    %88 = tpu.concatenate %80, %81, %82, %83, %79, %84, %85, %86, %87 in 0 : vector<8x768xf32>, vector<8x768xf32>, vector<8x768xf32>, vector<8x768xf32>, vector<8x768xf32>, vector<8x768xf32>, vector<8x768xf32>, vector<8x768xf32>, vector<8x768xf32> -> vector<72x768xf32>
    %c27_57 = arith.constant 27 : index
    %c0_58 = arith.constant 0 : index
    %89 = vector.load %arg3[%c27_57, %c0_58] : memref<48x128xf32, #tpu.memory_space<vmem>>, vector<8x72xf32>
    %c27_59 = arith.constant 27 : index
    %c72_60 = arith.constant 72 : index
    %90 = vector.load %arg3[%c27_59, %c72_60] : memref<48x128xf32, #tpu.memory_space<vmem>>, vector<8x1xf32>
    %cst_61 = arith.constant dense<0.000000e+00> : vector<8x768xf32>
    %91 = tpu.matmul %89, %88, %cst_61 {dimension_numbers = #tpu.dot_dimension_numbers<[1], [0], [0], [1], [0, 0, 1, 1], [], []>} : vector<8x72xf32>, vector<72x768xf32>, vector<8x768xf32> -> vector<8x768xf32>
    %92 = vector.broadcast %90 : vector<8x1xf32> to vector<8x768xf32>
    %93 = arith.addf %91, %92 : vector<8x768xf32>
    %cst_62 = arith.constant 0.000000e+00 : f32
    %94 = vector.broadcast %cst_62 : f32 to vector<8x768xf32>
    %95 = arith.maximumf %93, %94 : vector<8x768xf32>
    %96 = vector.broadcast %0 : vector<1x768xf32> to vector<8x768xf32>
    %97 = arith.mulf %95, %96 : vector<8x768xf32>
    %c19_i32_63 = arith.constant 19 : i32
    %98 = tpu.dynamic_rotate %97 by %c19_i32_63 dim 1 : vector<8x768xf32>, i32 -> vector<8x768xf32>
    %c18_i32_64 = arith.constant 18 : i32
    %99 = tpu.dynamic_rotate %97 by %c18_i32_64 dim 1 : vector<8x768xf32>, i32 -> vector<8x768xf32>
    %c17_i32_65 = arith.constant 17 : i32
    %100 = tpu.dynamic_rotate %97 by %c17_i32_65 dim 1 : vector<8x768xf32>, i32 -> vector<8x768xf32>
    %c1_i32_66 = arith.constant 1 : i32
    %101 = tpu.dynamic_rotate %97 by %c1_i32_66 dim 1 : vector<8x768xf32>, i32 -> vector<8x768xf32>
    %c767_i32_67 = arith.constant 767 : i32
    %102 = tpu.dynamic_rotate %97 by %c767_i32_67 dim 1 : vector<8x768xf32>, i32 -> vector<8x768xf32>
    %c751_i32_68 = arith.constant 751 : i32
    %103 = tpu.dynamic_rotate %97 by %c751_i32_68 dim 1 : vector<8x768xf32>, i32 -> vector<8x768xf32>
    %c750_i32_69 = arith.constant 750 : i32
    %104 = tpu.dynamic_rotate %97 by %c750_i32_69 dim 1 : vector<8x768xf32>, i32 -> vector<8x768xf32>
    %c749_i32_70 = arith.constant 749 : i32
    %105 = tpu.dynamic_rotate %97 by %c749_i32_70 dim 1 : vector<8x768xf32>, i32 -> vector<8x768xf32>
    %106 = tpu.concatenate %98, %99, %100, %101, %97, %102, %103, %104, %105 in 0 : vector<8x768xf32>, vector<8x768xf32>, vector<8x768xf32>, vector<8x768xf32>, vector<8x768xf32>, vector<8x768xf32>, vector<8x768xf32>, vector<8x768xf32>, vector<8x768xf32> -> vector<72x768xf32>
    %c35 = arith.constant 35 : index
    %c0_71 = arith.constant 0 : index
    %107 = vector.load %arg3[%c35, %c0_71] : memref<48x128xf32, #tpu.memory_space<vmem>>, vector<3x72xf32>
    %c35_72 = arith.constant 35 : index
    %c72_73 = arith.constant 72 : index
    %108 = vector.load %arg3[%c35_72, %c72_73] : memref<48x128xf32, #tpu.memory_space<vmem>>, vector<3x1xf32>
    %cst_74 = arith.constant dense<0.000000e+00> : vector<3x768xf32>
    %109 = tpu.matmul %107, %106, %cst_74 {dimension_numbers = #tpu.dot_dimension_numbers<[1], [0], [0], [1], [0, 0, 1, 1], [], []>} : vector<3x72xf32>, vector<72x768xf32>, vector<3x768xf32> -> vector<3x768xf32>
    %110 = vector.broadcast %108 : vector<3x1xf32> to vector<3x768xf32>
    %111 = arith.addf %109, %110 : vector<3x768xf32>
    %112 = arith.addf %60, %111 : vector<3x768xf32>
    %c38 = arith.constant 38 : index
    %c0_75 = arith.constant 0 : index
    %113 = vector.load %arg3[%c38, %c0_75] : memref<48x128xf32, #tpu.memory_space<vmem>>, vector<3x3xf32>
    %c38_76 = arith.constant 38 : index
    %c3_77 = arith.constant 3 : index
    %114 = vector.load %arg3[%c38_76, %c3_77] : memref<48x128xf32, #tpu.memory_space<vmem>>, vector<3x1xf32>
    %cst_78 = arith.constant dense<0.000000e+00> : vector<3x768xf32>
    %115 = tpu.matmul %113, %112, %cst_78 {dimension_numbers = #tpu.dot_dimension_numbers<[1], [0], [0], [1], [0, 0, 1, 1], [], []>} : vector<3x3xf32>, vector<3x768xf32>, vector<3x768xf32> -> vector<3x768xf32>
    %116 = vector.broadcast %114 : vector<3x1xf32> to vector<3x768xf32>
    %117 = arith.addf %115, %116 : vector<3x768xf32>
    %c0_79 = arith.constant 0 : index
    %c0_80 = arith.constant 0 : index
    %c0_81 = arith.constant 0 : index
    %118 = vector.load %arg4[%c0_79, %c0_80, %c0_81] : memref<1x3x768xf32, #tpu.memory_space<vmem>>, vector<1x3x768xf32>
    %119 = vector.shape_cast %118 : vector<1x3x768xf32> to vector<3x768xf32>
    %120 = vector.shape_cast %117 : vector<3x768xf32> to vector<1x3x768xf32>
    tpu.vector_store %arg4[%c0_79, %c0_80, %c0_81], %120 {strides = array<i32>} : memref<1x3x768xf32, #tpu.memory_space<vmem>>, vector<1x3x768xf32>,
    return
  }
  func.func @transform_0(%arg0: i32) -> (i32, i32, i32) {
    %c0_i32 = arith.constant 0 : i32
    %c0_i32_0 = arith.constant 0 : i32
    %c0_i32_1 = arith.constant 0 : i32
    return %arg0, %c0_i32, %c0_i32_0 : i32, i32, i32
  }
  func.func @transform_1(%arg0: i32) -> (i32, i32) {
    %c0_i32 = arith.constant 0 : i32
    %c0_i32_0 = arith.constant 0 : i32
    %c0_i32_1 = arith.constant 0 : i32
    return %c0_i32, %c0_i32_0 : i32, i32
  }
  func.func @transform_2(%arg0: i32) -> (i32, i32) {
    %c0_i32 = arith.constant 0 : i32
    %c0_i32_0 = arith.constant 0 : i32
    %c0_i32_1 = arith.constant 0 : i32
    return %c0_i32, %c0_i32_0 : i32, i32
  }
  func.func @transform_3(%arg0: i32) -> (i32, i32, i32) {
    %c0_i32 = arith.constant 0 : i32
    %c0_i32_0 = arith.constant 0 : i32
    %c0_i32_1 = arith.constant 0 : i32
    return %arg0, %c0_i32, %c0_i32_0 : i32, i32, i32
  }
}

</mosaic_0001>

<bundles_post_ra>
// kernel: cnn_forward.1
= control target key start
LH: loop header
LB: loop body
LE: loop exit
PB: predicated region body
PF: predicated region fallthrough
CT: control target
= control target key end

     0   :  { %s4659_s12 = smov 0   ;;  %s7404_s0 = inlined_call_operand.vmem [shape: f32[2,13,768], index: 0, kind: input, shape index: {}]   ;;  %s7405_s1 = inlined_call_operand.vmem [shape: f32[1,768], index: 1, kind: input, shape index: {}]   ;;  %s7406_s2 = inlined_call_operand.vmem [shape: f32[48,128], index: 2, kind: input, shape index: {}]   ;;  %s7407_s3 = inlined_call_operand.vmem [shape: f32[2,3,768], index: 3, kind: output, shape index: {}]  }
   0x1 LB: > { %s3581_s13 = sadd.s32 4294967295, %s4623_s12   ;;  %p3585_p0 = scmp.ge.s32.totalorder %s4623_s12, 1  ;;  %s4623_s12 = sphi %s4659_s12, %s13_s12  }
   0x2   : > { %p137_p1 = scmp.lt.s32.totalorder %s4623_s12, 3 }
   0x4   : > { %p138_p2 = pnand %p3585_p0, %p137_p1 }
   0x6   : > { %141 = sbr.rel (%p138_p2) target bundleno = 2673 (0xa71), region = 32 }
   0xd   : > { %p161_p3 = scmp.lt.s32.totalorder %s3581_s13, 1  ;;  %s4625_s18 = smov 18   ;;  %v7411_v11 = vmov 0.0   ;;  %v4634_v12 = vmov 27   ;;  %v4745_v13 = vld [vmem:[%s7406_s2] sm:$0xff]  ;;  %v214_v14 = vlaneseq  ;;  %vm7410_vm3 = vcmask 1040384  }
   0xe   : > { %s4626_s19 = smov 17   ;;  %s4627_s20 = smov 1   ;;  %622 = vmatprep.mubr.f32.mxu0 %v7411_v11  ;;  %693 = vmatprep.mubr.f32.mxu1 %v7411_v11  ;;  %vm482_vm6 = vcmask 1042432   ;;  %vm7408_vm7 = vcmask 1045504   ;;  %vm503_vm8 = vcmask 1043456   ;;  %vm510_vm9 = vcmask 1046528  }
   0xf   : > { %s7695_s13 = smov (!%p161_p3, %s3581_s13), 1  ;;  %s4628_s21 = smov 19   ;;  %4042 = vset.pattern.permute.xlu1 %v4634_v12  ;;  %v4755_v17 = vand.u32 127, %v214_v14  ;;  %vm517_vm12 = vcmask 1041408   ;;  %vm524_vm13 = vcmask 1044480   ;;  %vm4635_vm15 = vmmov 1  }
  0x10   : > { %s3923_s14 = smul.u32 96, %s7695_s13  ;;  %s4629_s22 = smov 127  }
  0x11   : > { %s4630_s23 = smov 111   ;;  %s4631_s24 = smov 110   ;;  %vm7409_vm0 = vcmp.lt.s32.totalorder %v4755_v17, 1  ;;  %vm254_vm1 = vcmp.lt.s32.totalorder %v4755_v17, 17  ;;  %vm235_vm2 = vcmp.lt.s32.totalorder %v4755_v17, 18  ;;  %vm216_vm4 = vcmp.lt.s32.totalorder %v4755_v17, 19 }
  0x12   : > { %s4673_s17 = scalar_lea.vmem %s7404_s0, %s3923_s14  ;;  %s4633_s25 = smov 109   ;;  %vm292_vm5 = vcmp.lt.s32.totalorder %v4755_v17, 127  ;;  %vm311_vm10 = vcmp.lt.s32.totalorder %v4755_v17, 111  ;;  %vm330_vm11 = vcmp.lt.s32.totalorder %v4755_v17, 110  ;;  %vm7473_vm14 = vcmp.lt.s32.totalorder %v4755_v17, 109 }
  0x13   : > { %v4676_v0 = vld [vmem:[%s4673_s17] sm:$0x7]  ;;  %v4679_v1 = vld [vmem:[%s4673_s17 + $0x8] sm:$0x7]  ;;  %v4696_v6 = vld [vmem:[%s4673_s17 + $0x10] sm:$0x7] }
  0x14   : > { %v4682_v2 = vld [vmem:[%s4673_s17 + $0x20] sm:$0x7]  ;;  %v3957_v3 = vpack.i.bf16 %v4679_v1, %v4676_v0  ;;  %v4687_v4 = vld [vmem:[%s4673_s17 + $0x28] sm:$0x7]  ;;  %v3977_v7 = vpack.i.bf16 %v4696_v6, %v4679_v1  ;;  %v4711_v9 = vld [vmem:[%s4673_s17 + $0x18] sm:$0x7] }
  0x15   : > { %v3962_v5 = vpack.i.bf16 %v4682_v2, %v4687_v4  ;;  %v3987_v8 = vpack.i.bf16 %v4687_v4, %v4676_v0  ;;  %v4022_v10 = vpack.i.bf16 %v4696_v6, %v4711_v9  ;;  %v417_v33 = vrot.slane %v4679_v1, 4 }
  0x16   : > { %3958 = vrot.lane.b32.xlu1 %v3957_v3, %s4625_s18  ;;  %3948 = vrot.lane.b32.xlu0 %v3957_v3, %s4626_s19  ;;  %v416_v47 = vrot.slane %v4676_v0, 4 }
  0x1a   : > { %3963 = vrot.lane.b32.xlu1 %v3962_v5, %s4626_s19  ;;  %3953 = vrot.lane.b32.xlu0 %v3957_v3, %s4627_s20 }
  0x1e   : > { %3973 = vrot.lane.b32.xlu1 %v3962_v5, %s4625_s18  ;;  %3968 = vrot.lane.b32.xlu0 %v3962_v5, %s4627_s20 }
  0x22   : > { %3983 = vrot.lane.b32.xlu1 %v3957_v3, %s4628_s21  ;;  %3978 = vrot.lane.b32.xlu0 %v3977_v7, %s4629_s22 }
  0x26   : > { %3993 = vrot.lane.b32.xlu1 %v3962_v5, %s4628_s21  ;;  %3988 = vrot.lane.b32.xlu0 %v3987_v8, %s4629_s22 }
  0x2a   : > { %4003 = vrot.lane.b32.xlu1 %v3987_v8, %s4630_s23  ;;  %3998 = vrot.lane.b32.xlu0 %v3977_v7, %s4630_s23 }
  0x2e   : > { %4013 = vrot.lane.b32.xlu1 %v3987_v8, %s4631_s24  ;;  %4008 = vrot.lane.b32.xlu0 %v3977_v7, %s4631_s24 }
  0x32   : > { %4023 = vrot.lane.b32.xlu1 %v4022_v10, %s4627_s20  ;;  %4018 = vrot.lane.b32.xlu0 %v4022_v10, %s4626_s19 }
  0x36   : > { %4033 = vrot.lane.b32.xlu1 %v4022_v10, %s4625_s18  ;;  %4028 = vrot.lane.b32.xlu0 %v3977_v7, %s4633_s25 }
  0x3a   : > { %288 = vrot.lane.b32.xlu1 %v4682_v2, %s4629_s22  ;;  %337 = vrot.lane.b32.xlu0 %v4676_v0, %s4633_s25 }
  0x3e   : > { %307 = vrot.lane.b32.xlu1 %v4682_v2, %s4630_s23  ;;  %208 = vrot.lane.b32.xlu0 %v4711_v9, %s4628_s21 }
  0x42   : > { %4038 = vrot.lane.b32.xlu1 %v3962_v5, %s4633_s25  ;;  %326 = vrot.lane.b32.xlu0 %v4682_v2, %s4631_s24 }
  0x46   : > { %206 = vrot.lane.b32.xlu1 %v4696_v6, %s4628_s21  ;;  %286 = vrot.lane.b32.xlu0 %v4711_v9, %s4629_s22 }
  0x4a   : > { %324 = vrot.lane.b32.xlu1 %v4711_v9, %s4631_s24  ;;  %305 = vrot.lane.b32.xlu0 %v4711_v9, %s4630_s23 }
  0x4e   : > { %343 = vrot.lane.b32.xlu0 %v4711_v9, %s4633_s25  ;;  %534 = vperm.xlu1 %4042, %v4745_v13  }
  0x88   : > { %v4750_v15 = vpop.permute.xlu1 %3958  ;;  %v4752_v16 = vpop.permute.xlu0 %3948 }
  0x89   : > { %v3951_v20 = vunpack.i.h.bf16 %v4752_v16  ;;  %v3950_v21 = vunpack.i.l.bf16 %v4752_v16  ;;  %v3961_v24 = vunpack.i.h.bf16 %v4750_v15  ;;  %v3960_v25 = vunpack.i.l.bf16 %v4750_v15 }
  0x8b   : > { %v259_v31 = vsel %vm254_vm1, %v3950_v21, %v3951_v20  ;;  %v240_v35 = vsel %vm235_vm2, %v3960_v25, %v3961_v24 }
  0x8c   : > { %v4757_v18 = vpop.permute.xlu1 %3963  ;;  %v4760_v19 = vpop.permute.xlu0 %3953  ;;  %v381_v39 = vrot.slane %v259_v31, 2  ;;  %v363_v45 = vrot.slane %v240_v35, 5 }
  0x8d   : > { %v3956_v22 = vunpack.i.h.bf16 %v4760_v19  ;;  %v3955_v23 = vunpack.i.l.bf16 %v4760_v19  ;;  %v3965_v27 = vunpack.i.l.bf16 %v4757_v18  ;;  %v3966_v52 = vunpack.i.h.bf16 %v4757_v18 }
  0x8f   : > { %v278_v26 = vsel %vm7409_vm0, %v3955_v23, %v3956_v22  ;;  %v260_v40 = vsel %vm254_vm1, %v3965_v27, %v3950_v21  ;;  %v255_v31 = vsel %vm254_vm1, %v3966_v52, %v3965_v27 }
  0x90   : > { %v4775_v28 = vpop.permute.xlu1 %3973  ;;  %v4777_v29 = vpop.permute.xlu0 %3968  ;;  %v399_v32 = vrot.slane %v278_v26, 7  ;;  %v380_v57 = vrot.slane %v260_v40, 2  ;;  %v421_v26 = vrot.slane %v4687_v4, 4 }
  0x91   : > { %v3970_v30 = vunpack.i.l.bf16 %v4777_v29  ;;  %v3975_v34 = vunpack.i.l.bf16 %v4775_v28  ;;  %v3971_v58 = vunpack.i.h.bf16 %v4777_v29  ;;  %v3976_v62 = vunpack.i.h.bf16 %v4775_v28 }
  0x92   : > { %v498_v46 = vsel %vm7410_vm3, %v381_v39, %v399_v32 }
  0x93   : > { %v279_v36 = vsel %vm7409_vm0, %v3970_v30, %v3955_v23  ;;  %v241_v48 = vsel %vm235_vm2, %v3975_v34, %v3960_v25  ;;  %v505_v61 = vsel %vm503_vm8, %v498_v46, %v417_v33  ;;  %v274_v23 = vsel %vm7409_vm0, %v3971_v58, %v3970_v30 }
  0x94   : > { %v4794_v37 = vpop.permute.xlu1 %3983  ;;  %v4796_v38 = vpop.permute.xlu0 %3978  ;;  %v398_v49 = vrot.slane %v279_v36, 7  ;;  %v362_v63 = vrot.slane %v241_v48, 5  ;;  %v236_v32 = vsel %vm235_vm2, %v3976_v62, %v3975_v34  ;;  %v403_v40 = vrot.slane %v274_v23, 7 }
  0x95   : > { %v3986_v41 = vunpack.i.h.bf16 %v4794_v37  ;;  %v3985_v42 = vunpack.i.l.bf16 %v4794_v37  ;;  %v3981_v43 = vunpack.i.h.bf16 %v4796_v38  ;;  %v3980_v44 = vunpack.i.l.bf16 %v4796_v38 }
  0x96   : > { %v497_v7 = vsel %vm7410_vm3, %v380_v57, %v398_v49  ;;  %v385_v48 = vrot.slane %v255_v31, 2  ;;  %v367_v49 = vrot.slane %v236_v32, 5 }
  0x97   : > { %v221_v50 = vsel %vm216_vm4, %v3985_v42, %v3986_v41  ;;  %v4816_v51 = vsel %vm292_vm5, %v3980_v44, %v3981_v43  ;;  %v504_v35 = vsel %vm503_vm8, %v497_v7, %v416_v47 }
  0x98   : > { %v4819_v53 = vpop.permute.xlu1 %3993  ;;  %v4821_v54 = vpop.permute.xlu0 %3988  ;;  %v435_v55 = vrot.slane %v4816_v51, 1  ;;  %v484_v56 = vsel %vm482_vm6, %v221_v50, %v363_v45 }
  0x99   : > { %v3995_v59 = vunpack.i.l.bf16 %v4819_v53  ;;  %v3990_v60 = vunpack.i.l.bf16 %v4821_v54  ;;  %v491_v0 = vsel %vm7408_vm7, %v484_v56, %v381_v39  ;;  %v3996_v25 = vunpack.i.h.bf16 %v4819_v53 }
  0x9a   : > { %v512_v1 = vsel %vm510_vm9, %v505_v61, %v435_v55  ;;  %v3991_v30 = vunpack.i.h.bf16 %v4821_v54 }
  0x9b   : > { %v3629_v3 = vpack.c.bf16 %v512_v1, %v491_v0  ;;  %v222_v5 = vsel %vm216_vm4, %v3995_v59, %v3985_v42  ;;  %v4843_v12 = vsel %vm292_vm5, %v3990_v60, %v3980_v44  ;;  %v217_v44 = vsel %vm216_vm4, %v3996_v25, %v3995_v59 }
  0x9c   : > { %v4837_v8 = vpop.permute.xlu1 %4003  ;;  %v4839_v10 = vpop.permute.xlu0 %3998  ;;  %v483_v21 = vsel %vm482_vm6, %v222_v5, %v362_v63  ;;  %v434_v33 = vrot.slane %v4843_v12, 1  ;;  %v502_v1 = vsel %vm7410_vm3, %v385_v48, %v403_v40 }
  0x9d   : > { %3630 = vmatprep.subr.bf16.mxu0 %v3629_v3  ;;  %v4001_v36 = vunpack.i.h.bf16 %v4839_v10  ;;  %v4000_v4 = vunpack.i.l.bf16 %v4839_v10  ;;  %v490_v39 = vsel %vm7408_vm7, %v483_v21, %v380_v57  ;;  %v4005_v45 = vunpack.i.l.bf16 %v4837_v8 }
  0x9e   : > { %v511_v42 = vsel %vm510_vm9, %v504_v35, %v434_v33  ;;  %v4887_v57 = vsel %vm292_vm5, %v3991_v30, %v3990_v60  ;;  %v488_v60 = vsel %vm482_vm6, %v217_v44, %v367_v49  ;;  %v420_v21 = vrot.slane %v4682_v2, 4 }
  0x9f   : > { %v3631_v56 = vpack.c.bf16 %v511_v42, %v490_v39  ;;  %v315_v59 = vsel %vm311_vm10, %v4000_v4, %v4001_v36  ;;  %v316_v3 = vsel %vm311_vm10, %v4005_v45, %v4000_v4  ;;  %v439_v23 = vrot.slane %v4887_v57, 1 }
  0xa0   : > { %v4868_v27 = vpop.permute.xlu1 %4013  ;;  %v4870_v34 = vpop.permute.xlu0 %4008  ;;  %v4006_v31 = vunpack.i.h.bf16 %v4837_v8  ;;  %v453_v32 = vrot.slane %v315_v59, 6  ;;  %v495_v42 = vsel %vm7408_vm7, %v488_v60, %v385_v48  ;;  %v509_v40 = vsel %vm503_vm8, %v502_v1, %v421_v26  ;;  %vm4939_vm7 = vmpackc.low %vm482_vm6, %vm4635_vm15 }
  0xa1   : > { %v4011_v46 = vunpack.i.h.bf16 %v4870_v34  ;;  %v4010_v47 = vunpack.i.l.bf16 %v4870_v34  ;;  %v4015_v50 = vunpack.i.l.bf16 %v4868_v27  ;;  %3632 = vmatpush1.bf16.msra.mxu0 %v3631_v56  ;;  %v452_v44 = vrot.slane %v316_v3, 6 }
  0xa2   : > { %v4016_v4 = vunpack.i.h.bf16 %v4868_v27  ;;  %v317_v29 = vsel %vm311_vm10, %v4006_v31, %v4005_v45  ;;  %vm537_vm15 = vcmask 220160  }
  0xa3   : > { %v334_v61 = vsel %vm330_vm11, %v4010_v47, %v4011_v46  ;;  %v335_v35 = vsel %vm330_vm11, %v4015_v50, %v4010_v47 }
  0xa4   : > { %v4024_v63 = vpop.permute.xlu1 %4023  ;;  %v4897_v0 = vpop.permute.xlu0 %4018  ;;  %v471_v39 = vrot.slane %v334_v61, 3  ;;  %v470_v56 = vrot.slane %v335_v35, 3  ;;  %v518_v35 = vsel %vm517_vm12, %v434_v33, %v452_v44 }
  0xa5   : > { %v4025_v5 = vunpack.i.l.bf16 %v4024_v63  ;;  %v4020_v7 = vunpack.i.l.bf16 %v4897_v0  ;;  %v4026_v18 = vunpack.i.h.bf16 %v4024_v63  ;;  %v4021_v45 = vunpack.i.h.bf16 %v4897_v0 }
  0xa7   : > { %v275_v2 = vsel %vm7409_vm0, %v4025_v5, %v3971_v58  ;;  %v256_v8 = vsel %vm254_vm1, %v4020_v7, %v3966_v52  ;;  %v519_v58 = vsel %vm517_vm12, %v435_v55, %v453_v32  ;;  %v516_v52 = vsel %vm510_vm9, %v509_v40, %v439_v23 }
  0xa8   : > { %v4034_v49 = vpop.permute.xlu1 %4033  ;;  %v4921_v47 = vpop.permute.xlu0 %4028  ;;  %v402_v61 = vrot.slane %v275_v2, 7  ;;  %v384_v60 = vrot.slane %v256_v8, 2  ;;  %v526_v3 = vsel %vm524_vm13, %v519_v58, %v471_v39  ;;  %v336_v55 = vsel %vm330_vm11, %v4016_v4, %v4015_v50 }
  0xa9   : > { %v4035_v48 = vunpack.i.l.bf16 %v4034_v49  ;;  %v4031_v26 = vunpack.i.h.bf16 %v4921_v47  ;;  %v4030_v59 = vunpack.i.l.bf16 %v4921_v47  ;;  %v525_v2 = vsel %vm524_vm13, %v518_v35, %v470_v56 }
  0xaa   : > { %v276_v12 = vsel %vm7409_vm0, %v4026_v18, %v4025_v5  ;;  %v3649_v28 = vpack.c.bf16 %v516_v52, %v495_v42  ;;  %v277_v54 = vsel %vm7409_vm0, %v3956_v22, %v4026_v18  ;;  %v501_v8 = vsel %vm7410_vm3, %v384_v60, %v402_v61 }
  0xab   : > { %v353_v1 = vsel %vm7473_vm14, %v4030_v59, %v4031_v26  ;;  %v237_v40 = vsel %vm235_vm2, %v4035_v48, %v3976_v62  ;;  %v419_v62 = vrot.slane %v4711_v9, 4  ;;  %v457_v56 = vrot.slane %v317_v29, 6 }
  0xac   : > { %v4948_v63 = vpop.permute.xlu1 %288  ;;  %v338_v32 = vpop.permute.xlu0 %337  ;;  %v3633_v39 = vpack.c.bf16 %v353_v1, %v526_v3  ;;  %v366_v58 = vrot.slane %v237_v40, 5  ;;  %v257_v42 = vsel %vm254_vm1, %v4021_v45, %v4020_v7  ;;  %v400_v29 = vrot.slane %v277_v54, 7 }
  0xad   : > { %v293_v50 = vsel %vm292_vm5, %v4948_v63, %v3991_v30  ;;  %v354_v0 = vsel %vm7473_vm14, %v338_v32, %v4030_v59  ;;  %v4036_v30 = vunpack.i.h.bf16 %v4034_v49  ;;  %v475_v59 = vrot.slane %v336_v55, 3 }
  0xae   : > { %v3636_v33 = vpack.c.bf16 %v354_v0, %v525_v2  ;;  %3635 = vmatprep.subr.msk.bf16.mxu0 %vm4939_vm7, %v3633_v39  ;;  %v438_v44 = vrot.slane %v293_v50, 1  ;;  %v258_v49 = vsel %vm254_vm1, %v3951_v20, %v4021_v45  ;;  %v401_v18 = vrot.slane %v276_v12, 7 }
  0xaf   : > { %v508_v52 = vsel %vm503_vm8, %v501_v8, %v420_v21  ;;  %v239_v53 = vsel %vm235_vm2, %v3961_v24, %v4036_v30  ;;  %vm7476_vm0 = vcmask 1045504   ;;  %v238_v15 = vsel %vm235_vm2, %v4036_v30, %v4035_v48 }
  0xb0   : > { %v4975_v5 = vpop.permute.xlu1 %307  ;;  %v209_v1 = vpop.permute.xlu0 %208  ;;  %3638 = vmatpush1.bf16.msk.msra.mxu0 %vm4939_vm7, %v3636_v33  ;;  %v383_v21 = vrot.slane %v257_v42, 2  ;;  %v382_v55 = vrot.slane %v258_v49, 2  ;;  %v523_v35 = vsel %vm517_vm12, %v439_v23, %v457_v56  ;;  %v364_v39 = vrot.slane %v239_v53, 5 }
  0xb1   : > { %v312_v19 = vsel %vm311_vm10, %v4975_v5, %v4006_v31  ;;  %v218_v22 = vsel %vm216_vm4, %v209_v1, %v3996_v25  ;;  %3650 = vmatprep.subr.bf16.mxu0 %v3649_v28  ;;  %v515_v25 = vsel %vm510_vm9, %v508_v52, %v438_v44  ;;  %v530_v48 = vsel %vm524_vm13, %v523_v35, %v475_v59 }
  0xb2   : > { %v487_v31 = vsel %vm482_vm6, %v218_v22, %v366_v58  ;;  %v456_v61 = vrot.slane %v312_v19, 6  ;;  %v418_v50 = vrot.slane %v4696_v6, 4  ;;  %v500_v28 = vsel %vm7410_vm3, %v383_v21, %v401_v18 }
  0xb3   : > { %v494_v7 = vsel %vm7476_vm0, %v487_v31, %v384_v60  ;;  %3590 = vmatmul.mubr.msk.f32.vlgmr.msra.gmra.mrb[0].mxu0 %vm537_vm15, %v4745_v13  ;;  %v499_v54 = vsel %vm7410_vm3, %v382_v55, %v400_v29  ;;  %vm7477_vm3 = vmmov %vm7476_vm0  ;;  %v779_v47 = vshrl.u32 %v214_v14, 7 }
  0xb4   : > { %v5002_v16 = vpop.permute.xlu1 %4038  ;;  %v327_v20 = vpop.permute.xlu0 %326  ;;  %v3651_v3 = vpack.c.bf16 %v515_v25, %v494_v7  ;;  %764 = vmatprep.mubr.f32.mxu0 %v7411_v11  ;;  %v522_v0 = vsel %vm517_vm12, %v438_v44, %v456_v61  ;;  %v506_v22 = vsel %vm503_vm8, %v499_v54, %v418_v50 }
  0xb5   : > { %v4041_v24 = vunpack.i.h.bf16 %v5002_v16  ;;  %v4040_v45 = vunpack.i.l.bf16 %v5002_v16  ;;  %v331_v60 = vsel %vm330_vm11, %v327_v20, %v4016_v4  ;;  %v365_v4 = vrot.slane %v238_v15, 5 }
  0xb6   : > { %v474_v40 = vrot.slane %v331_v60, 3  ;;  %3652 = vmatpush1.bf16.msra.mxu0 %v3651_v3  ;;  %v780_v15 = vsub.s32 0, %v779_v47  ;;  %v796_v50 = vsub.s32 4, %v779_v47 }
  0xb7   : > { %v350_v2 = vsel %vm7473_vm14, %v4041_v24, %v4040_v45  ;;  %v355_v27 = vsel %vm7473_vm14, %v4040_v45, %v338_v32 }
  0xb8   : > { %v529_v57 = vsel %vm524_vm13, %v522_v0, %v474_v40  ;;  %v207_v12 = vpop.permute.xlu1 %206  ;;  %v287_v23 = vpop.permute.xlu0 %286  ;;  %v3653_v33 = vpack.c.bf16 %v355_v27, %v530_v48 }
  0xb9   : > { %v3656_v30 = vpack.c.bf16 %v350_v2, %v529_v57  ;;  %v219_v6 = vsel %vm216_vm4, %v207_v12, %v209_v1  ;;  %v220_v44 = vsel %vm216_vm4, %v3986_v41, %v207_v12  ;;  %v294_v32 = vsel %vm292_vm5, %v287_v23, %v4948_v63 }
  0xba   : > { %v295_v8 = vsel %vm292_vm5, %v3981_v43, %v287_v23  ;;  %v437_v56 = vrot.slane %v294_v32, 1  ;;  %3655 = vmatprep.subr.msk.bf16.mxu0 %vm4939_vm7, %v3653_v33  ;;  %v486_v59 = vsel %vm482_vm6, %v219_v6, %v365_v4  ;;  %v485_v37 = vsel %vm482_vm6, %v220_v44, %v364_v39 }
  0xbb   : > { %v436_v58 = vrot.slane %v295_v8, 1  ;;  %3658 = vmatpush1.bf16.msk.msra.mxu0 %vm4939_vm7, %v3656_v30  ;;  %v507_v41 = vsel %vm503_vm8, %v500_v28, %v419_v62  ;;  %v493_v43 = vsel %vm7476_vm0, %v486_v59, %v383_v21  ;;  %v492_v19 = vsel %vm7477_vm3, %v485_v37, %v382_v55  ;;  %v171_v21 = vld [vmem:[%s7405_s1] sm:$0x3f] }
  0xbc   : > { %v325_v38 = vpop.permute.xlu1 %324  ;;  %v306_v63 = vpop.permute.xlu0 %305  ;;  %v514_v1 = vsel %vm510_vm9, %v507_v41, %v437_v56  ;;  %v784_v55 = vsub.s32 1, %v779_v47  ;;  %v5090_v60 = vrot.slane %v171_v21, %v780_v15  ;;  %v800_v2 = vsub.s32 5, %v779_v47 }
  0xbd   : > { %v332_v42 = vsel %vm330_vm11, %v325_v38, %v327_v20  ;;  %v333_v9 = vsel %vm330_vm11, %v4011_v46, %v325_v38  ;;  %v313_v62 = vsel %vm311_vm10, %v306_v63, %v4975_v5  ;;  %v314_v49 = vsel %vm311_vm10, %v4001_v36, %v306_v63 }
  0xbe   : > { %v472_v29 = vrot.slane %v333_v9, 3  ;;  %v473_v18 = vrot.slane %v332_v42, 3  ;;  %v454_v52 = vrot.slane %v314_v49, 6  ;;  %v455_v31 = vrot.slane %v313_v62, 6  ;;  %3596 = vmatmul.mubr.msk.f32.vlgmr.msra.gmra.mrb[2].mxu0 %vm537_vm15, %v4745_v13  ;;  %7478 = vst [vmem:[#allocation2_spill] sm:$0xff] %v5090_v60  ;;  %v5174_v62 = vld [vmem:[%s7406_s2 + $0x8] sm:$0xff] }
  0xbf   : > { %v3639_v34 = vpack.c.bf16 %v514_v1, %v493_v43  ;;  %v513_v53 = vsel %vm510_vm9, %v506_v22, %v436_v58  ;;  %1102 = vmatprep.mubr.f32.mxu0 %v7411_v11  ;;  %v5092_v39 = vrot.slane %v171_v21, %v784_v55  ;;  %v5106_v57 = vrot.slane %v171_v21, %v796_v50 }
  0xc0   : > { %v521_v46 = vsel %vm517_vm12, %v437_v56, %v455_v31  ;;  %v344_v5 = vpop.permute.xlu0 %343  ;;  %v520_v10 = vsel %vm517_vm12, %v436_v58, %v454_v52  ;;  %v3641_v25 = vpack.c.bf16 %v513_v53, %v492_v19  ;;  %v5108_v33 = vrot.slane %v171_v21, %v800_v2 }
  0xc1   : > { %3640 = vmatprep.subr.bf16.mxu1 %v3639_v34  ;;  %v528_v36 = vsel %vm524_vm13, %v521_v46, %v473_v18  ;;  %v351_v61 = vsel %vm7473_vm14, %v344_v5, %v4041_v24  ;;  %v352_v7 = vsel %vm7473_vm14, %v4031_v26, %v344_v5  ;;  %v527_v16 = vsel %vm524_vm13, %v520_v10, %v472_v29 }
  0xc2   : > { %v3643_v20 = vpack.c.bf16 %v351_v61, %v528_v36  ;;  %v3646_v3 = vpack.c.bf16 %v352_v7, %v527_v16  ;;  %3642 = vmatpush1.bf16.msra.mxu1 %v3641_v25  ;;  %7479 = vst [vmem:[#allocation3_spill] sm:$0xff] %v5092_v39  ;;  %7480 = vst [vmem:[#allocation4_spill] sm:$0xff] %v5106_v57  ;;  %v788_v44 = vsub.s32 2, %v779_v47  ;;  %v792_v63 = vsub.s32 3, %v779_v47 }
  0xc3   : > { %7481 = vst [vmem:[#allocation5_spill] sm:$0xff] %v5108_v33  ;;  %v4636_v9 = vmov 72   ;;  %vm7484_vm3 = vcmp.lt.s32.totalorder %v4755_v17, 1 }
  0xc4   : > { %3645 = vmatprep.subr.msk.bf16.mxu1 %vm4939_vm7, %v3643_v20  ;;  %v5121_v59 = vrot.slane %v171_v21, %v788_v44  ;;  %v5131_v19 = vrot.slane %v171_v21, %v792_v63  ;;  %4133 = vset.pattern.permute.xlu0 %v4636_v9  ;;  %vm7486_vm0 = vmmov %vm7484_vm3 }
  0xc6   : > { %3648 = vmatpush1.bf16.msk.msra.mxu1 %vm4939_vm7, %v3646_v3  ;;  %7482 = vst [vmem:[#allocation6_spill] sm:$0xff] %v5121_v59  ;;  %7483 = vst [vmem:[#allocation7_spill] sm:$0xff] %v5131_v19 }
  0xc7   : > { %vm7485_vm7 = vmmov %vm7484_vm3 }
  0xc9   : > { %3593 = vmatmul.mubr.msk.f32.vlgmr.msra.gmra.mrb[0].mxu1 %vm537_vm15, %v4745_v13  ;;  %vm7472_vm15 = vcmask 588800  }
  0xca   : > { %1031 = vmatprep.mubr.f32.mxu1 %v7411_v11 }
  0xcd   : > { %v535_v26 = vpop.permute.xlu1 %534 }
 0x186   : > { %v624_v24 = vpop.f32.mrb[0].mxu0 }
 0x187   : > { %v625_v45 = vadd.f32 %v624_v24, %v535_v26  ;;  %v626_v51 = vpop.f32.mrb[1].mxu0 }
 0x188   : > { %v627_v35 = vadd.f32 %v626_v51, %v535_v26 }
 0x189   : > { %v771_v13 = vmax.f32 %v625_v45, 0.0 }
 0x18a   : > { %v772_v40 = vmax.f32 %v627_v35, 0.0 }
 0x18b   : > { %v5095_v48 = vmul.f32 %v5090_v60, %v771_v13 }
 0x18c   : > { %v5098_v14 = vmul.f32 %v5092_v39, %v772_v40 }
 0x18d   : > { %886 = vrot.lane.b32.xlu1 %v5095_v48, %s4629_s22 }
 0x18e   : > { %v4048_v0 = vpack.i.bf16 %v5098_v14, %v5095_v48 }
 0x190   : > { %4044 = vrot.lane.b32.xlu0 %v4048_v0, %s4628_s21 }
 0x191   : > { %v766_v27 = vpop.f32.mrb[2].mxu0  ;;  %4049 = vrot.lane.b32.xlu1 %v4048_v0, %s4625_s18 }
 0x192   : > { %v767_v4 = vadd.f32 %v766_v27, %v535_v26  ;;  %v768_v12 = vpop.f32.mrb[3].mxu0 }
 0x193   : > { %v769_v23 = vadd.f32 %v768_v12, %v535_v26 }
 0x194   : > { %v775_v28 = vmax.f32 %v767_v4, 0.0  ;;  %4054 = vrot.lane.b32.xlu0 %v4048_v0, %s4626_s19 }
 0x195   : > { %v776_v54 = vmax.f32 %v769_v23, 0.0  ;;  %4059 = vrot.lane.b32.xlu1 %v4048_v0, %s4627_s20 }
 0x196   : > { %v5113_v30 = vmul.f32 %v5106_v57, %v775_v28 }
 0x197   : > { %v5116_v6 = vmul.f32 %v5108_v33, %v776_v54 }
 0x199   : > { %v4078_v32 = vpack.i.bf16 %v5113_v30, %v5116_v6 }
 0x19b   : > { %4079 = vrot.lane.b32.xlu1 %v4078_v32, %s4625_s18 }
 0x19c   : > { %v695_v8 = vpop.f32.mrb[0].mxu1 }
 0x19d   : > { %v696_v56 = vadd.f32 %v695_v8, %v535_v26  ;;  %v697_v37 = vpop.f32.mrb[1].mxu1 }
 0x19e   : > { %v698_v38 = vadd.f32 %v697_v37, %v535_v26 }
 0x19f   : > { %v773_v58 = vmax.f32 %v696_v56, 0.0  ;;  %4089 = vrot.lane.b32.xlu1 %v4078_v32, %s4627_s20 }
 0x1a0   : > { %v774_v1 = vmax.f32 %v698_v38, 0.0 }
 0x1a1   : > { %v5125_v41 = vmul.f32 %v5121_v59, %v773_v58 }
 0x1a2   : > { %v5137_v22 = vmul.f32 %v5131_v19, %v774_v1 }
 0x1a3   : > { %v4063_v43 = vpack.i.bf16 %v5125_v41, %v5098_v14 }
 0x1a4   : > { %v4103_v42 = vpack.i.bf16 %v5125_v41, %v5137_v22 }
 0x1a5   : > { %4064 = vrot.lane.b32.xlu0 %v4063_v43, %s4629_s22  ;;  %4094 = vrot.lane.b32.xlu1 %v4063_v43, %s4631_s24 }
 0x1a9   : > { %4069 = vrot.lane.b32.xlu0 %v4063_v43, %s4630_s23  ;;  %922 = vrot.lane.b32.xlu1 %v5095_v48, %s4631_s24 }
 0x1ad   : > { %4074 = vrot.lane.b32.xlu0 %v4078_v32, %s4628_s21  ;;  %944 = vrot.lane.b32.xlu1 %v5125_v41, %s4633_s25 }
 0x1b1   : > { %4084 = vrot.lane.b32.xlu0 %v4078_v32, %s4626_s19  ;;  %4104 = vrot.lane.b32.xlu1 %v4103_v42, %s4625_s18 }
 0x1b5   : > { %904 = vrot.lane.b32.xlu0 %v5095_v48, %s4630_s23  ;;  %4109 = vrot.lane.b32.xlu1 %v4103_v42, %s4626_s19 }
 0x1b9   : > { %942 = vrot.lane.b32.xlu0 %v5098_v14, %s4633_s25  ;;  %4119 = vrot.lane.b32.xlu1 %v4078_v32, %s4629_s22 }
 0x1bd   : > { %4099 = vrot.lane.b32.xlu0 %v4103_v42, %s4628_s21  ;;  %4129 = vrot.lane.b32.xlu1 %v4078_v32, %s4631_s24 }
 0x1c1   : > { %940 = vrot.lane.b32.xlu0 %v5095_v48, %s4633_s25  ;;  %950 = vrot.lane.b32.xlu1 %v5116_v6, %s4633_s25 }
 0x1c5   : > { %4114 = vrot.lane.b32.xlu0 %v4103_v42, %s4627_s20  ;;  %910 = vrot.lane.b32.xlu1 %v5137_v22, %s4630_s23 }
 0x1c9   : > { %892 = vrot.lane.b32.xlu0 %v5137_v22, %s4629_s22  ;;  %946 = vrot.lane.b32.xlu1 %v5137_v22, %s4633_s25 }
 0x1cd   : > { %4124 = vrot.lane.b32.xlu0 %v4078_v32, %s4630_s23 }
 0x1d1   : > { %948 = vrot.lane.b32.xlu0 %v5113_v30, %s4633_s25 }
 0x1d5   : > { %928 = vrot.lane.b32.xlu0 %v5137_v22, %s4631_s24 }
 0x1d9   : > { %961 = vperm.xlu0 %4133, %v5174_v62  }
 0x1ff   : > { %v5177_v49 = vpop.permute.xlu1 %886 }
 0x202   : > { %v5179_v29 = vpop.permute.xlu0 %4044 }
 0x203   : > { %v5181_v18 = vpop.permute.xlu1 %4049  ;;  %v4047_v52 = vunpack.i.h.bf16 %v5179_v29  ;;  %v4046_v31 = vunpack.i.l.bf16 %v5179_v29 }
 0x204   : > { %v4052_v34 = vunpack.i.h.bf16 %v5181_v18  ;;  %v4051_v53 = vunpack.i.l.bf16 %v5181_v18 }
 0x205   : > { %v830_v46 = vsel %vm216_vm4, %v4046_v31, %v4047_v52 }
 0x206   : > { %v848_v5 = vsel %vm235_vm2, %v4051_v53, %v4052_v34  ;;  %v5201_v7 = vpop.permute.xlu0 %4054 }
 0x207   : > { %v5195_v10 = vpop.permute.xlu1 %4059  ;;  %v3659_v25 = vpack.c.bf16 %v848_v5, %v830_v46  ;;  %v4057_v21 = vunpack.i.h.bf16 %v5201_v7  ;;  %v4056_v55 = vunpack.i.l.bf16 %v5201_v7 }
 0x208   : > { %v4062_v15 = vunpack.i.h.bf16 %v5195_v10  ;;  %v4061_v26 = vunpack.i.l.bf16 %v5195_v10 }
 0x209   : > { %3660 = vmatprep.subr.bf16.mxu1 %v3659_v25  ;;  %v866_v50 = vsel %vm254_vm1, %v4056_v55, %v4057_v21 }
 0x20a   : > { %v884_v0 = vsel %vm7484_vm3, %v4061_v26, %v4062_v15  ;;  %vm7487_vm3 = vmmov %vm7486_vm0 }
 0x20b   : > { %v3663_v54 = vpack.c.bf16 %v884_v0, %v866_v50 }
 0x20d   : > { %v5197_v36 = vpop.permute.xlu1 %4079 }
 0x20e   : > { %v4081_v24 = vunpack.i.l.bf16 %v5197_v36 }
 0x210   : > { %v849_v2 = vsel %vm235_vm2, %v4081_v24, %v4051_v53 }
 0x211   : > { %v5199_v61 = vpop.permute.xlu1 %4089 }
 0x212   : > { %v4091_v27 = vunpack.i.l.bf16 %v5199_v61 }
 0x214   : > { %v885_v56 = vsel %vm7485_vm7, %v4091_v27, %v4061_v26  ;;  %vm7488_vm7 = vmmov %vm7486_vm0 }
 0x217   : > { %v5203_v16 = vpop.permute.xlu0 %4064  ;;  %v5205_v20 = vpop.permute.xlu1 %4094 }
 0x218   : > { %v4067_v13 = vunpack.i.h.bf16 %v5203_v16  ;;  %v4066_v40 = vunpack.i.l.bf16 %v5203_v16  ;;  %v4097_v38 = vunpack.i.h.bf16 %v5205_v20  ;;  %v4096_v63 = vunpack.i.l.bf16 %v5205_v20 }
 0x21a   : > { %v901_v8 = vsel %vm292_vm5, %v4066_v40, %v4067_v13  ;;  %v902_v42 = vsel %vm292_vm5, %v5177_v49, %v4066_v40  ;;  %v937_v25 = vsel %vm330_vm11, %v4096_v63, %v4097_v38 }
 0x21b   : > { %v5207_v3 = vpop.permute.xlu0 %4069  ;;  %v5209_v47 = vpop.permute.xlu1 %922  ;;  %v3669_v5 = vpack.c.bf16 %v902_v42, %v5095_v48  ;;  %v4082_v48 = vunpack.i.h.bf16 %v5197_v36 }
 0x21c   : > { %v4072_v44 = vunpack.i.h.bf16 %v5207_v3  ;;  %v4071_v32 = vunpack.i.l.bf16 %v5207_v3  ;;  %v938_v50 = vsel %vm330_vm11, %v5209_v47, %v4096_v63 }
 0x21d   : > { %v844_v29 = vsel %vm235_vm2, %v4082_v48, %v4081_v24 }
 0x21e   : > { %v919_v53 = vsel %vm311_vm10, %v4071_v32, %v4072_v44 }
 0x21f   : > { %v4075_v45 = vpop.permute.xlu0 %4074  ;;  %v5216_v35 = vpop.permute.xlu1 %944 }
 0x220   : > { %v4076_v51 = vunpack.i.l.bf16 %v4075_v45  ;;  %v4077_v40 = vunpack.i.h.bf16 %v4075_v45 }
 0x222   : > { %v831_v4 = vsel %vm216_vm4, %v4076_v51, %v4046_v31  ;;  %v3667_v31 = vpack.c.bf16 %v901_v8, %v5098_v14 }
 0x223   : > { %v5235_v12 = vpop.permute.xlu0 %4084  ;;  %v3661_v23 = vpack.c.bf16 %v849_v2, %v831_v4  ;;  %v4105_v58 = vpop.permute.xlu1 %4104 }
 0x224   : > { %v4086_v28 = vunpack.i.l.bf16 %v5235_v12  ;;  %v4107_v0 = vunpack.i.h.bf16 %v4105_v58  ;;  %v4106_v2 = vunpack.i.l.bf16 %v4105_v58 }
 0x225   : > { %3662 = vmatpush1.bf16.msra.mxu1 %v3661_v23 }
 0x226   : > { %v867_v37 = vsel %vm254_vm1, %v4086_v28, %v4056_v55  ;;  %3664 = vmatprep.subr.bf16.mxu1 %v3663_v54  ;;  %v3671_v55 = vpack.c.bf16 %v937_v25, %v919_v53  ;;  %v4087_v54 = vunpack.i.h.bf16 %v5235_v12  ;;  %v847_v58 = vsel %vm235_vm2, %v4052_v34, %v4107_v0 }
 0x227   : > { %v5252_v43 = vpop.permute.xlu0 %904  ;;  %v3665_v1 = vpack.c.bf16 %v885_v56, %v867_v37  ;;  %v4110_v14 = vpop.permute.xlu1 %4109  ;;  %v826_v37 = vsel %vm216_vm4, %v4077_v40, %v4076_v51  ;;  %v846_v42 = vsel %vm235_vm2, %v4107_v0, %v4106_v2  ;;  %v845_v25 = vsel %vm235_vm2, %v4106_v2, %v4082_v48 }
 0x228   : > { %v920_v26 = vsel %vm311_vm10, %v5252_v43, %v4071_v32  ;;  %v4092_v32 = vunpack.i.h.bf16 %v5199_v61  ;;  %v3691_v53 = vpack.c.bf16 %v844_v29, %v826_v37 }
 0x229   : > { %3666 = vmatpush1.bf16.msra.mxu1 %v3665_v1  ;;  %v3673_v4 = vpack.c.bf16 %v938_v50, %v920_v26  ;;  %v4112_v26 = vunpack.i.h.bf16 %v4110_v14 }
 0x22a   : > { %3668 = vmatprep.subr.bf16.mxu1 %v3667_v31  ;;  %v880_v24 = vsel %vm7486_vm0, %v4092_v32, %v4091_v27 }
 0x22b   : > { %v943_v46 = vpop.permute.xlu0 %942  ;;  %v4120_v63 = vpop.permute.xlu1 %4119 }
 0x22c   : > { %v955_v45 = vsel %vm7473_vm14, %v943_v46, %v5216_v35  ;;  %v4122_v50 = vunpack.i.h.bf16 %v4120_v63 }
 0x22d   : > { %3670 = vmatpush1.bf16.msra.mxu1 %v3669_v5  ;;  %v862_v5 = vsel %vm254_vm1, %v4087_v54, %v4086_v28 }
 0x22e   : > { %3672 = vmatprep.subr.bf16.mxu1 %v3671_v55  ;;  %v4111_v55 = vunpack.i.l.bf16 %v4110_v14  ;;  %v3695_v28 = vpack.c.bf16 %v880_v24, %v862_v5  ;;  %v865_v14 = vsel %vm254_vm1, %v4057_v21, %v4112_v26 }
 0x22f   : > { %v4100_v23 = vpop.permute.xlu0 %4099  ;;  %v4130_v27 = vpop.permute.xlu1 %4129 }
 0x230   : > { %v4102_v8 = vunpack.i.h.bf16 %v4100_v23  ;;  %v4101_v56 = vunpack.i.l.bf16 %v4100_v23  ;;  %v863_v61 = vsel %vm254_vm1, %v4111_v55, %v4087_v54  ;;  %v864_v21 = vsel %vm254_vm1, %v4112_v26, %v4111_v55 }
 0x231   : > { %3674 = vmatpush1.bf16.msra.mxu1 %v3673_v4 }
 0x232   : > { %v829_v12 = vsel %vm216_vm4, %v4047_v52, %v4102_v8  ;;  %983 = vmatprep.subr.mxu1 %v955_v45  ;;  %v828_v1 = vsel %vm216_vm4, %v4102_v8, %v4101_v56  ;;  %v827_v51 = vsel %vm216_vm4, %v4101_v56, %v4077_v40  ;;  %v4121_v40 = vunpack.i.l.bf16 %v4120_v63 }
 0x233   : > { %v5295_v18 = vpop.permute.xlu0 %940  ;;  %v3675_v31 = vpack.c.bf16 %v846_v42, %v828_v1  ;;  %v3677_v34 = vpack.c.bf16 %v847_v58, %v829_v12  ;;  %v3693_v36 = vpack.c.bf16 %v845_v25, %v827_v51  ;;  %v4132_v58 = vunpack.i.h.bf16 %v4130_v27  ;;  %v951_v12 = vpop.permute.xlu1 %950 }
 0x234   : > { %v956_v52 = vsel %vm7473_vm14, %v5295_v18, %v943_v46  ;;  %v903_v48 = vsel %vm292_vm5, %v4121_v40, %v5177_v49  ;;  %v898_v49 = vsel %vm292_vm5, %v4122_v50, %v4121_v40  ;;  %v4131_v63 = vunpack.i.l.bf16 %v4130_v27 }
 0x235   : > { %984 = vmatpush1.msra.mxu1 %v956_v52  ;;  %3676 = vmatprep.subr.bf16.mxu0 %v3675_v31  ;;  %v3699_v10 = vpack.c.bf16 %v903_v48, %v5116_v6  ;;  %v3701_v42 = vpack.c.bf16 %v898_v49, %v5113_v30 }
 0x236   : > { %3678 = vmatpush1.bf16.msra.mxu0 %v3677_v34  ;;  %3692 = vmatprep.subr.bf16.mxu1 %v3691_v53  ;;  %v939_v30 = vsel %vm330_vm11, %v4131_v63, %v5209_v47  ;;  %v957_v53 = vsel %vm7473_vm14, %v951_v12, %v5295_v18 }
 0x237   : > { %v4115_v46 = vpop.permute.xlu0 %4114  ;;  %3597 = vmatmul.mubr.msk.f32.vlgmr.msra.gmra.mrb[2].mxu1 %vm7472_vm15, %v5174_v62  ;;  %v911_v52 = vpop.permute.xlu1 %910 }
 0x238   : > { %v4117_v0 = vunpack.i.h.bf16 %v4115_v46  ;;  %v4116_v2 = vunpack.i.l.bf16 %v4115_v46  ;;  %3694 = vmatpush1.bf16.msra.mxu1 %v3693_v36  ;;  %1173 = vmatprep.mubr.f32.mxu1 %v7411_v11 }
 0x239   : > { %3696 = vmatprep.subr.bf16.mxu1 %v3695_v28 }
 0x23a   : > { %v881_v4 = vsel %vm7487_vm3, %v4116_v2, %v4092_v32  ;;  %v883_v7 = vsel %vm7488_vm7, %v4062_v15, %v4117_v0  ;;  %v882_v23 = vsel %vm7486_vm0, %v4117_v0, %v4116_v2  ;;  %vm7489_vm3 = vmmov %vm7486_vm0 }
 0x23b   : > { %v893_v54 = vpop.permute.xlu0 %892  ;;  %v3679_v8 = vpack.c.bf16 %v882_v23, %v864_v21  ;;  %v3697_v56 = vpack.c.bf16 %v881_v4, %v863_v61  ;;  %v3681_v45 = vpack.c.bf16 %v883_v7, %v865_v14  ;;  %v947_v3 = vpop.permute.xlu1 %946  ;;  %vm7490_vm7 = vmmov %vm7486_vm0 }
 0x23c   : > { %v899_v32 = vsel %vm292_vm5, %v893_v54, %v4122_v50  ;;  %v900_v15 = vsel %vm292_vm5, %v4067_v13, %v893_v54  ;;  %v934_v13 = vsel %vm330_vm11, %v4132_v58, %v4131_v63 }
 0x23d   : > { %3680 = vmatprep.subr.bf16.mxu0 %v3679_v8  ;;  %3698 = vmatpush1.bf16.msra.mxu1 %v3697_v56  ;;  %v3683_v37 = vpack.c.bf16 %v899_v32, %v5137_v22  ;;  %v3685_v6 = vpack.c.bf16 %v900_v15, %v5125_v41 }
 0x23e   : > { %3682 = vmatpush1.bf16.msra.mxu0 %v3681_v45  ;;  %3700 = vmatprep.subr.bf16.mxu1 %v3699_v10 }
 0x23f   : > { %v4125_v1 = vpop.permute.xlu0 %4124  ;;  %3684 = vmatprep.subr.bf16.mxu0 %v3683_v37 }
 0x240   : > { %v4127_v51 = vunpack.i.h.bf16 %v4125_v1  ;;  %v4126_v16 = vunpack.i.l.bf16 %v4125_v1  ;;  %v5463_v1 = vld [vmem:[%s7406_s2 + $0x10] sm:$0x7] }
 0x241   : > { %3702 = vmatpush1.bf16.msra.mxu1 %v3701_v42 }
 0x242   : > { %v916_v22 = vsel %vm311_vm10, %v4127_v51, %v4126_v16  ;;  %3686 = vmatpush1.bf16.msra.mxu0 %v3685_v6  ;;  %v921_v31 = vsel %vm311_vm10, %v4126_v16, %v5252_v43  ;;  %v918_v43 = vsel %vm311_vm10, %v4072_v44, %v911_v52  ;;  %v917_v26 = vsel %vm311_vm10, %v911_v52, %v4127_v51 }
 0x243   : > { %v949_v34 = vpop.permute.xlu0 %948  ;;  %v3703_v41 = vpack.c.bf16 %v939_v30, %v921_v31  ;;  %v3705_v29 = vpack.c.bf16 %v934_v13, %v916_v22  ;;  %v954_v44 = vsel %vm7473_vm14, %v5216_v35, %v947_v3 }
 0x244   : > { %v952_v18 = vsel %vm7473_vm14, %v949_v34, %v951_v12  ;;  %v953_v20 = vsel %vm7473_vm14, %v947_v3, %v949_v34 }
 0x245   : > { %3704 = vmatprep.subr.bf16.mxu1 %v3703_v41 }
 0x246   : > { %3706 = vmatpush1.bf16.msra.mxu1 %v3705_v29 }
 0x247   : > { %v929_v5 = vpop.permute.xlu0 %928  ;;  %1125 = vmatprep.subr.mxu1 %v957_v53 }
 0x248   : > { %v935_v47 = vsel %vm330_vm11, %v929_v5, %v4132_v58  ;;  %v936_v25 = vsel %vm330_vm11, %v4097_v38, %v929_v5 }
 0x249   : > { %v3689_v55 = vpack.c.bf16 %v936_v25, %v918_v43  ;;  %v3687_v40 = vpack.c.bf16 %v935_v47, %v917_v26 }
 0x24a   : > { %1126 = vmatpush1.msra.mxu1 %v952_v18 }
 0x24b   : > { %3688 = vmatprep.subr.bf16.mxu0 %v3687_v40  ;;  %3599 = vmatmul.mubr.msk.f32.vlgmr.msra.gmra.mrb[4].mxu1 %vm7472_vm15, %v5174_v62 }
 0x24c   : > { %3690 = vmatpush1.bf16.msra.mxu0 %v3689_v55  ;;  %1479 = vmatprep.mubr.f32.mxu1 %v7411_v11 }
 0x24d   : > { %1054 = vmatprep.subr.mxu0 %v953_v20 }
 0x250   : > { %1055 = vmatpush1.msra.mxu0 %v954_v44 }
 0x251   : > { %3598 = vmatmul.mubr.msk.f32.vlgmr.msra.gmra.mrb[4].mxu0 %vm7472_vm15, %v5174_v62 }
 0x252   : > { %1408 = vmatprep.mubr.f32.mxu0 %v7411_v11 }
 0x258   : > { %v962_v38 = vpop.permute.xlu0 %961 }
 0x30a   : > { %v1033_v36 = vpop.f32.mrb[2].mxu1 }
 0x30b   : > { %v1034_v24 = vadd.f32 %v1033_v36, %v962_v38  ;;  %v1035_v46 = vpop.f32.mrb[3].mxu1 }
 0x30c   : > { %v1036_v28 = vadd.f32 %v1035_v46, %v962_v38 }
 0x30d   : > { %v1180_v50 = vmax.f32 %v1034_v24, 0.0 }
 0x30e   : > { %v1181_v0 = vmax.f32 %v1036_v28, 0.0 }
 0x30f   : > { %v5385_v2 = vmul.f32 %v1180_v50, %v5090_v60 }
 0x310   : > { %v5388_v14 = vmul.f32 %v1181_v0, %v5092_v39 }
 0x311   : > { %1264 = vrot.lane.b32.xlu1 %v5385_v2, %s4629_s22 }
 0x312   : > { %v4134_v62 = vpack.i.bf16 %v5388_v14, %v5385_v2 }
 0x314   : > { %4145 = vrot.lane.b32.xlu0 %v4134_v62, %s4626_s19 }
 0x315   : > { %4135 = vrot.lane.b32.xlu1 %v4134_v62, %s4628_s21 }
 0x319   : > { %4140 = vrot.lane.b32.xlu1 %v4134_v62, %s4625_s18 }
 0x31d   : > { %4150 = vrot.lane.b32.xlu1 %v4134_v62, %s4627_s20 }
 0x31e   : > { %v1175_v35 = vpop.f32.mrb[4].mxu1 }
 0x31f   : > { %v1177_v61 = vpop.f32.mrb[5].mxu1  ;;  %v1176_v27 = vadd.f32 %v1175_v35, %v962_v38 }
 0x320   : > { %v1178_v48 = vadd.f32 %v1177_v61, %v962_v38 }
 0x321   : > { %v1184_v23 = vmax.f32 %v1176_v27, 0.0 }
 0x322   : > { %v1185_v54 = vmax.f32 %v1178_v48, 0.0 }
 0x323   : > { %v5402_v45 = vmul.f32 %v1184_v23, %v5106_v57 }
 0x324   : > { %v1104_v4 = vpop.f32.mrb[4].mxu0  ;;  %v5405_v49 = vmul.f32 %v1185_v54, %v5108_v33 }
 0x325   : > { %v1105_v7 = vadd.f32 %v1104_v4, %v962_v38  ;;  %v1106_v21 = vpop.f32.mrb[5].mxu0 }
 0x326   : > { %v4174_v10 = vpack.i.bf16 %v5402_v45, %v5405_v49  ;;  %v1107_v15 = vadd.f32 %v1106_v21, %v962_v38 }
 0x327   : > { %v1182_v8 = vmax.f32 %v1105_v7, 0.0 }
 0x328   : > { %v1183_v37 = vmax.f32 %v1107_v15, 0.0 }
 0x329   : > { %v5399_v56 = vmul.f32 %v1182_v8, %v5121_v59 }
 0x32a   : > { %v5422_v58 = vmul.f32 %v1183_v37, %v5131_v19 }
 0x32b   : > { %v4154_v32 = vpack.i.bf16 %v5399_v56, %v5388_v14 }
 0x32c   : > { %v4189_v63 = vpack.i.bf16 %v5399_v56, %v5422_v58  ;;  %v4194_v12 = vpack.i.bf16 %v5422_v58, %v5402_v45 }
 0x32d   : > { %4155 = vrot.lane.b32.xlu0 %v4154_v32, %s4629_s22  ;;  %4165 = vrot.lane.b32.xlu1 %v4154_v32, %s4631_s24 }
 0x331   : > { %4160 = vrot.lane.b32.xlu0 %v4154_v32, %s4630_s23  ;;  %4175 = vrot.lane.b32.xlu1 %v4174_v10, %s4625_s18 }
 0x335   : > { %4170 = vrot.lane.b32.xlu0 %v4174_v10, %s4628_s21  ;;  %1256 = vrot.lane.b32.xlu1 %v5405_v49, %s4627_s20 }
 0x339   : > { %4180 = vrot.lane.b32.xlu0 %v4174_v10, %s4626_s19  ;;  %1300 = vrot.lane.b32.xlu1 %v5385_v2, %s4631_s24 }
 0x33d   : > { %1282 = vrot.lane.b32.xlu0 %v5385_v2, %s4630_s23  ;;  %1322 = vrot.lane.b32.xlu1 %v5399_v56, %s4633_s25 }
 0x341   : > { %1320 = vrot.lane.b32.xlu0 %v5388_v14, %s4633_s25  ;;  %4190 = vrot.lane.b32.xlu1 %v4189_v63, %s4625_s18 }
 0x345   : > { %4185 = vrot.lane.b32.xlu0 %v4189_v63, %s4628_s21  ;;  %4195 = vrot.lane.b32.xlu1 %v4194_v12, %s4627_s20 }
 0x349   : > { %1318 = vrot.lane.b32.xlu0 %v5385_v2, %s4633_s25  ;;  %4200 = vrot.lane.b32.xlu1 %v4174_v10, %s4629_s22 }
 0x34d   : > { %1234 = vrot.lane.b32.xlu0 %v5422_v58, %s4626_s19  ;;  %4210 = vrot.lane.b32.xlu1 %v4174_v10, %s4631_s24 }
 0x351   : > { %1232 = vrot.lane.b32.xlu0 %v5399_v56, %s4626_s19  ;;  %1250 = vrot.lane.b32.xlu1 %v5399_v56, %s4627_s20 }
 0x355   : > { %4205 = vrot.lane.b32.xlu0 %v4174_v10, %s4630_s23  ;;  %1326 = vrot.lane.b32.xlu1 %v5402_v45, %s4633_s25 }
 0x359   : > { %1328 = vrot.lane.b32.xlu0 %v5405_v49, %s4633_s25  ;;  %1288 = vrot.lane.b32.xlu1 %v5422_v58, %s4630_s23 }
 0x35d   : > { %1270 = vrot.lane.b32.xlu0 %v5422_v58, %s4629_s22  ;;  %1324 = vrot.lane.b32.xlu1 %v5422_v58, %s4633_s25 }
 0x361   : > { %1306 = vrot.lane.b32.xlu0 %v5422_v58, %s4631_s24 }
 0x365   : > { %1339 = vperm.xlu0 %4133, %v5463_v1  }
 0x383   : > { %v5466_v42 = vpop.permute.xlu1 %1264 }
 0x386   : > { %v5484_v29 = vpop.permute.xlu0 %4145 }
 0x387   : > { %v5468_v6 = vpop.permute.xlu1 %4135  ;;  %v4148_v25 = vunpack.i.h.bf16 %v5484_v29  ;;  %v4147_v26 = vunpack.i.l.bf16 %v5484_v29 }
 0x388   : > { %v4138_v51 = vunpack.i.h.bf16 %v5468_v6  ;;  %v4137_v16 = vunpack.i.l.bf16 %v5468_v6 }
 0x389   : > { %v1244_v24 = vsel %vm254_vm1, %v4147_v26, %v4148_v25 }
 0x38a   : > { %v1208_v30 = vsel %vm216_vm4, %v4137_v16, %v4138_v51 }
 0x38b   : > { %v5472_v13 = vpop.permute.xlu1 %4140 }
 0x38c   : > { %v4143_v22 = vunpack.i.h.bf16 %v5472_v13  ;;  %v4142_v31 = vunpack.i.l.bf16 %v5472_v13 }
 0x38e   : > { %v1226_v34 = vsel %vm235_vm2, %v4142_v31, %v4143_v22 }
 0x38f   : > { %v3707_v41 = vpack.c.bf16 %v1226_v34, %v1208_v30  ;;  %v5486_v52 = vpop.permute.xlu1 %4150 }
 0x390   : > { %v4153_v55 = vunpack.i.h.bf16 %v5486_v52  ;;  %v4152_v18 = vunpack.i.l.bf16 %v5486_v52 }
 0x391   : > { %3708 = vmatprep.subr.bf16.mxu0 %v3707_v41 }
 0x392   : > { %v1262_v46 = vsel %vm7489_vm3, %v4152_v18, %v4153_v55  ;;  %vm7491_vm3 = vmmov %vm7486_vm0 }
 0x393   : > { %v3711_v27 = vpack.c.bf16 %v1262_v46, %v1244_v24 }
 0x39f   : > { %v5488_v53 = vpop.permute.xlu0 %4155  ;;  %v5490_v5 = vpop.permute.xlu1 %4165 }
 0x3a0   : > { %v4158_v38 = vunpack.i.h.bf16 %v5488_v53  ;;  %v4157_v36 = vunpack.i.l.bf16 %v5488_v53  ;;  %v4168_v54 = vunpack.i.h.bf16 %v5490_v5  ;;  %v4167_v8 = vunpack.i.l.bf16 %v5490_v5 }
 0x3a2   : > { %v1279_v7 = vsel %vm292_vm5, %v4157_v36, %v4158_v38  ;;  %v1280_v37 = vsel %vm292_vm5, %v5466_v42, %v4157_v36  ;;  %v1315_v34 = vsel %vm330_vm11, %v4167_v8, %v4168_v54 }
 0x3a3   : > { %v5492_v43 = vpop.permute.xlu0 %4160  ;;  %v5494_v47 = vpop.permute.xlu1 %4175  ;;  %v3715_v63 = vpack.c.bf16 %v1279_v7, %v5388_v14  ;;  %v3717_v30 = vpack.c.bf16 %v1280_v37, %v5385_v2 }
 0x3a4   : > { %v4177_v40 = vunpack.i.l.bf16 %v5494_v47  ;;  %v4163_v48 = vunpack.i.h.bf16 %v5492_v43  ;;  %v4162_v4 = vunpack.i.l.bf16 %v5492_v43  ;;  %v4178_v2 = vunpack.i.h.bf16 %v5494_v47 }
 0x3a6   : > { %v1227_v28 = vsel %vm235_vm2, %v4177_v40, %v4142_v31  ;;  %v1297_v12 = vsel %vm311_vm10, %v4162_v4, %v4163_v48  ;;  %v1222_v6 = vsel %vm235_vm2, %v4178_v2, %v4177_v40 }
 0x3a7   : > { %v4171_v3 = vpop.permute.xlu0 %4170  ;;  %v5501_v20 = vpop.permute.xlu1 %1256  ;;  %v3719_v41 = vpack.c.bf16 %v1315_v34, %v1297_v12 }
 0x3a8   : > { %v4172_v44 = vunpack.i.l.bf16 %v4171_v3  ;;  %v1263_v21 = vsel %vm7490_vm7, %v5501_v20, %v4152_v18  ;;  %vm7492_vm7 = vmmov %vm7486_vm0 }
 0x3aa   : > { %v1209_v50 = vsel %vm216_vm4, %v4172_v44, %v4137_v16 }
 0x3ab   : > { %v5519_v0 = vpop.permute.xlu0 %4180  ;;  %v5521_v62 = vpop.permute.xlu1 %1300  ;;  %v3709_v35 = vpack.c.bf16 %v1227_v28, %v1209_v50 }
 0x3ac   : > { %v4182_v61 = vunpack.i.l.bf16 %v5519_v0  ;;  %v1316_v18 = vsel %vm330_vm11, %v5521_v62, %v4167_v8 }
 0x3ad   : > { %3710 = vmatpush1.bf16.msra.mxu0 %v3709_v35 }
 0x3ae   : > { %v1245_v23 = vsel %vm254_vm1, %v4182_v61, %v4147_v26  ;;  %3712 = vmatprep.subr.bf16.mxu0 %v3711_v27  ;;  %v4173_v26 = vunpack.i.h.bf16 %v4171_v3 }
 0x3af   : > { %v5539_v32 = vpop.permute.xlu0 %1282  ;;  %v5541_v10 = vpop.permute.xlu1 %1322  ;;  %v3713_v15 = vpack.c.bf16 %v1263_v21, %v1245_v23 }
 0x3b0   : > { %v1298_v14 = vsel %vm311_vm10, %v5539_v32, %v4162_v4  ;;  %v4183_v4 = vunpack.i.h.bf16 %v5519_v0  ;;  %v1204_v21 = vsel %vm216_vm4, %v4173_v26, %v4172_v44 }
 0x3b1   : > { %3714 = vmatpush1.bf16.msra.mxu0 %v3713_v15  ;;  %v3721_v46 = vpack.c.bf16 %v1316_v18, %v1298_v14 }
 0x3b2   : > { %3716 = vmatprep.subr.bf16.mxu0 %v3715_v63  ;;  %v1240_v40 = vsel %vm254_vm1, %v4183_v4, %v4182_v61 }
 0x3b3   : > { %v1321_v16 = vpop.permute.xlu0 %1320  ;;  %v4191_v31 = vpop.permute.xlu1 %4190 }
 0x3b4   : > { %v4193_v36 = vunpack.i.h.bf16 %v4191_v31  ;;  %v4192_v24 = vunpack.i.l.bf16 %v4191_v31  ;;  %v1333_v3 = vsel %vm7473_vm14, %v1321_v16, %v5541_v10 }
 0x3b5   : > { %3718 = vmatpush1.bf16.msra.mxu0 %v3717_v30 }
 0x3b6   : > { %3720 = vmatprep.subr.bf16.mxu0 %v3719_v41  ;;  %v1225_v23 = vsel %vm235_vm2, %v4143_v22, %v4193_v36  ;;  %v1224_v37 = vsel %vm235_vm2, %v4193_v36, %v4192_v24  ;;  %v1223_v14 = vsel %vm235_vm2, %v4192_v24, %v4178_v2  ;;  %v3739_v41 = vpack.c.bf16 %v1222_v6, %v1204_v21 }
 0x3b7   : > { %v4186_v28 = vpop.permute.xlu0 %4185  ;;  %v4196_v50 = vpop.permute.xlu1 %4195 }
 0x3b8   : > { %v4188_v35 = vunpack.i.h.bf16 %v4186_v28  ;;  %v4187_v27 = vunpack.i.l.bf16 %v4186_v28  ;;  %v4197_v7 = vunpack.i.l.bf16 %v4196_v50 }
 0x3b9   : > { %3722 = vmatpush1.bf16.msra.mxu0 %v3721_v46 }
 0x3ba   : > { %v1207_v8 = vsel %vm216_vm4, %v4138_v51, %v4188_v35  ;;  %1360 = vmatprep.subr.mxu0 %v1333_v3  ;;  %v1206_v15 = vsel %vm216_vm4, %v4188_v35, %v4187_v27  ;;  %v1205_v44 = vsel %vm216_vm4, %v4187_v27, %v4173_v26  ;;  %v4198_v51 = vunpack.i.h.bf16 %v4196_v50 }
 0x3bb   : > { %v1319_v63 = vpop.permute.xlu0 %1318  ;;  %v5583_v13 = vpop.permute.xlu1 %4200  ;;  %v3723_v12 = vpack.c.bf16 %v1224_v37, %v1206_v15  ;;  %v3725_v22 = vpack.c.bf16 %v1225_v23, %v1207_v8  ;;  %v1258_v34 = vsel %vm7486_vm0, %v4197_v7, %v5501_v20  ;;  %v3741_v47 = vpack.c.bf16 %v1223_v14, %v1205_v44 }
 0x3bc   : > { %v4202_v31 = vunpack.i.l.bf16 %v5583_v13  ;;  %v1334_v30 = vsel %vm7473_vm14, %v1319_v63, %v1321_v16  ;;  %v4203_v16 = vunpack.i.h.bf16 %v5583_v13  ;;  %v3743_v18 = vpack.c.bf16 %v1258_v34, %v1240_v40 }
 0x3bd   : > { %1361 = vmatpush1.msra.mxu0 %v1334_v30  ;;  %3724 = vmatprep.subr.bf16.mxu1 %v3723_v12  ;;  %v1259_v24 = vsel %vm7491_vm3, %v4198_v51, %v4197_v7  ;;  %vm7493_vm3 = vcmask 1040384  }
 0x3be   : > { %3600 = vmatmul.mubr.msk.f32.vlgmr.msra.gmra.mrb[6].mxu0 %vm7472_vm15, %v5463_v1  ;;  %3726 = vmatpush1.bf16.msra.mxu1 %v3725_v22  ;;  %v1281_v0 = vsel %vm292_vm5, %v4202_v31, %v5466_v42  ;;  %v1276_v2 = vsel %vm292_vm5, %v4203_v16, %v4202_v31 }
 0x3bf   : > { %3740 = vmatprep.subr.bf16.mxu0 %v3739_v41  ;;  %v1235_v20 = vpop.permute.xlu0 %1234  ;;  %v4211_v26 = vpop.permute.xlu1 %4210  ;;  %1550 = vmatprep.mubr.f32.mxu0 %v7411_v11  ;;  %v3747_v50 = vpack.c.bf16 %v1281_v0, %v5405_v49  ;;  %v3749_v23 = vpack.c.bf16 %v1276_v2, %v5402_v45  ;;  %v183_v2 = vld [vmem:[%s4673_s17 + $0x28] sm:$0x18] }
 0x3c0   : > { %v1241_v36 = vsel %vm254_vm1, %v1235_v20, %v4183_v4  ;;  %3742 = vmatpush1.bf16.msra.mxu0 %v3741_v47  ;;  %v4213_v3 = vunpack.i.h.bf16 %v4211_v26  ;;  %v4212_v21 = vunpack.i.l.bf16 %v4211_v26  ;;  %v179_v47 = vld [vmem:[%s4673_s17 + $0x8] sm:$0x18]  ;;  %v197_v26 = vld [vmem:[%s4673_s17 + $0x38] sm:$0x1f] }
 0x3c1   : > { %v3745_v61 = vpack.c.bf16 %v1259_v24, %v1241_v36  ;;  %3744 = vmatprep.subr.bf16.mxu0 %v3743_v18 }
 0x3c2   : > { %v1312_v52 = vsel %vm330_vm11, %v4213_v3, %v4212_v21  ;;  %v1317_v45 = vsel %vm330_vm11, %v4212_v21, %v5521_v62 }
 0x3c3   : > { %v1233_v46 = vpop.permute.xlu0 %1232  ;;  %v1251_v28 = vpop.permute.xlu1 %1250 }
 0x3c4   : > { %v1242_v35 = vsel %vm254_vm1, %v1233_v46, %v1235_v20  ;;  %v1243_v27 = vsel %vm254_vm1, %v4148_v25, %v1233_v46  ;;  %v1260_v42 = vsel %vm7492_vm7, %v1251_v28, %v4198_v51  ;;  %v1261_v7 = vsel %vm7486_vm0, %v4153_v55, %v1251_v28  ;;  %3746 = vmatpush1.bf16.msra.mxu0 %v3745_v61  ;;  %v196_v20 = vld [vmem:[%s4673_s17 + $0x30] sm:$0x1f]  ;;  %vm7494_vm7 = vmmov %vm7493_vm3  ;;  %v182_v61 = vld [vmem:[%s4673_s17 + $0x20] sm:$0x18] }
 0x3c5   : > { %v3729_v4 = vpack.c.bf16 %v1261_v7, %v1243_v27  ;;  %3748 = vmatprep.subr.bf16.mxu0 %v3747_v50  ;;  %v3727_v49 = vpack.c.bf16 %v1260_v42, %v1242_v35  ;;  %v1576_v18 = vrot.slane %v196_v20, 4  ;;  %v180_v28 = vld [vmem:[%s4673_s17 + $0x10] sm:$0x18]  ;;  %v189_v50 = vmul.f32 0.003921569, %v183_v2  ;;  %vm7495_vm0 = vmmov %vm7493_vm3 }
 0x3c6   : > { %v186_v35 = vmul.f32 0.003921569, %v180_v28  ;;  %v5689_v27 = vld [vmem:[%s4673_s17 + $0x40] sm:$0x1f]  ;;  %v188_v42 = vmul.f32 0.003921569, %v182_v61 }
 0x3c7   : > { %v4206_v29 = vpop.permute.xlu0 %4205  ;;  %3728 = vmatprep.subr.bf16.mxu1 %v3727_v49  ;;  %v1327_v15 = vpop.permute.xlu1 %1326  ;;  %v201_v7 = vld [vmem:[%s4673_s17 + $0x58] sm:$0x1f]  ;;  %v200_v49 = vld [vmem:[%s4673_s17 + $0x50] sm:$0x1f] }
 0x3c8   : > { %v4208_v8 = vunpack.i.h.bf16 %v4206_v29  ;;  %v4207_v25 = vunpack.i.l.bf16 %v4206_v29  ;;  %3750 = vmatpush1.bf16.msra.mxu0 %v3749_v23  ;;  %3730 = vmatpush1.bf16.msra.mxu1 %v3729_v4  ;;  %v1582_v4 = vrot.slane %v5689_v27, 4  ;;  %v1591_v21 = vrot.slane %v201_v7, 4 }
 0x3c9   : > { %v1616_v23 = vrot.slane %v189_v50, 2  ;;  %v192_v50 = vld [vmem:[%s4673_s17 + $0x10] sm:$0x80] }
 0x3ca   : > { %v1294_v55 = vsel %vm311_vm10, %v4208_v8, %v4207_v25  ;;  %v1299_v37 = vsel %vm311_vm10, %v4207_v25, %v5539_v32  ;;  %v1588_v25 = vrot.slane %v200_v49, 4  ;;  %v1581_v27 = vrot.slane %v192_v50, 4 }
 0x3cb   : > { %v1329_v44 = vpop.permute.xlu0 %1328  ;;  %v3751_v13 = vpack.c.bf16 %v1317_v45, %v1299_v37  ;;  %v3753_v12 = vpack.c.bf16 %v1312_v52, %v1294_v55  ;;  %v1289_v6 = vpop.permute.xlu1 %1288  ;;  %v5702_v37 = vld [vmem:[%s4673_s17 + $0x48] sm:$0x1f] }
 0x3cc   : > { %v1335_v22 = vsel %vm7473_vm14, %v1329_v44, %v1319_v63  ;;  %v1330_v30 = vsel %vm7473_vm14, %v1327_v15, %v1329_v44  ;;  %v1295_v63 = vsel %vm311_vm10, %v1289_v6, %v4208_v8  ;;  %v1296_v53 = vsel %vm311_vm10, %v4163_v48, %v1289_v6  ;;  %v181_v8 = vld [vmem:[%s4673_s17 + $0x18] sm:$0x18] }
 0x3cd   : > { %3752 = vmatprep.subr.bf16.mxu0 %v3751_v13  ;;  %v187_v55 = vmul.f32 0.003921569, %v181_v8  ;;  %v1585_v45 = vrot.slane %v5702_v37, 4 }
 0x3ce   : > { %3754 = vmatpush1.bf16.msra.mxu0 %v3753_v12 }
 0x3cf   : > { %v1271_v51 = vpop.permute.xlu0 %1270  ;;  %1502 = vmatprep.subr.mxu0 %v1335_v22  ;;  %v1614_v44 = vrot.slane %v187_v55, 2  ;;  %v193_v55 = vld [vmem:[%s4673_s17 + $0x18] sm:$0x80] }
 0x3d0   : > { %v1277_v31 = vsel %vm292_vm5, %v1271_v51, %v4203_v16  ;;  %v1278_v32 = vsel %vm292_vm5, %v4158_v38, %v1271_v51  ;;  %v1325_v38 = vpop.permute.xlu1 %1324  ;;  %v185_v16 = vmul.f32 0.003921569, %v179_v47  ;;  %v194_v47 = vld [vmem:[%s4673_s17 + $0x20] sm:$0x80] }
 0x3d1   : > { %v3733_v62 = vpack.c.bf16 %v1278_v32, %v5399_v56  ;;  %v3731_v34 = vpack.c.bf16 %v1277_v31, %v5422_v58  ;;  %v1331_v48 = vsel %vm7473_vm14, %v1325_v38, %v1327_v15  ;;  %v1332_v5 = vsel %vm7473_vm14, %v5541_v10, %v1325_v38  ;;  %v190_v31 = vld [vmem:[%s4673_s17] sm:$0x80]  ;;  %v191_v32 = vld [vmem:[%s4673_s17 + $0x8] sm:$0x80] }
 0x3d2   : > { %1503 = vmatpush1.msra.mxu0 %v1330_v30  ;;  %v1579_v10 = vrot.slane %v197_v26, 4  ;;  %v1612_v24 = vrot.slane %v185_v16, 2  ;;  %v1615_v15 = vrot.slane %v188_v42, 2  ;;  %v5715_v22 = vsel %vm7495_vm0, %v1585_v45, %v1614_v44 }
 0x3d3   : > { %v1307_v14 = vpop.permute.xlu0 %1306  ;;  %3732 = vmatprep.subr.bf16.mxu1 %v3731_v34  ;;  %3602 = vmatmul.mubr.msk.f32.vlgmr.msra.gmra.mrb[8].mxu0 %vm7472_vm15, %v5463_v1  ;;  %v1578_v30 = vrot.slane %v191_v32, 4  ;;  %v1587_v16 = vrot.slane %v194_v47, 4  ;;  %v4637_v47 = vmov 99  }
 0x3d4   : > { %v1313_v56 = vsel %vm330_vm11, %v1307_v14, %v4213_v3  ;;  %v1314_v58 = vsel %vm330_vm11, %v4168_v54, %v1307_v14  ;;  %3734 = vmatpush1.bf16.msra.mxu1 %v3733_v62  ;;  %2433 = vmatprep.mubr.f32.mxu0 %v7411_v11  ;;  %v178_v54 = vld [vmem:[%s4673_s17] sm:$0x18]  ;;  %v1613_v3 = vrot.slane %v186_v35, 2  ;;  %v1575_v62 = vrot.slane %v190_v31, 4 }
 0x3d5   : > { %v3737_v43 = vpack.c.bf16 %v1314_v58, %v1296_v53  ;;  %v3735_v41 = vpack.c.bf16 %v1313_v56, %v1295_v63  ;;  %v184_v40 = vmul.f32 0.003921569, %v178_v54  ;;  %v1584_v31 = vrot.slane %v193_v55, 4  ;;  %4434 = vset.pattern.permute.xlu1 %v4637_v47 }
 0x3d6   : > { %v5696_v29 = vsel %vm7495_vm0, %v1582_v4, %v1613_v3  ;;  %v1577_v56 = vsel %vm503_vm8, %v1575_v62, %v1576_v18 }
 0x3d7   : > { %3736 = vmatprep.subr.bf16.mxu1 %v3735_v41  ;;  %v1611_v36 = vrot.slane %v184_v40, 2  ;;  %v195_v40 = vld [vmem:[%s4673_s17 + $0x28] sm:$0x80]  ;;  %v1586_v62 = vsel %vm503_vm8, %v1584_v31, %v1585_v45  ;;  %s3924_s17 = smul.u32 24, %s7695_s13 }
 0x3d8   : > { %3738 = vmatpush1.bf16.msra.mxu1 %v3737_v43  ;;  %v1580_v43 = vsel %vm503_vm8, %v1578_v30, %v1579_v10  ;;  %v1590_v20 = vrot.slane %v195_v40, 4 }
 0x3d9   : > { %1431 = vmatprep.subr.mxu1 %v1331_v48  ;;  %v5678_v0 = vsel %vm7493_vm3, %v1576_v18, %v1611_v36  ;;  %vm7496_vm3 = vmmov %vm7495_vm0 }
 0x3da   : > { %v4224_v52 = vpack.i.bf16 %v5678_v0, %v5696_v29  ;;  %v5707_v13 = vsel %vm7496_vm3, %v1591_v21, %v1616_v23  ;;  %v1592_v2 = vsel %vm503_vm8, %v1590_v20, %v1591_v21  ;;  %v1583_v21 = vsel %vm503_vm8, %v1581_v27, %v1582_v4 }
 0x3db   : > { %vm7517_vm3 = vcmp.lt.s32.totalorder %v4755_v17, 1 }
 0x3dc   : > { %1432 = vmatpush1.msra.mxu1 %v1332_v5 }
 0x3dd   : > { %3601 = vmatmul.mubr.msk.f32.vlgmr.msra.gmra.mrb[6].mxu1 %vm7472_vm15, %v5463_v1  ;;  %v5681_v1 = vsel %vm7494_vm7, %v1579_v10, %v1612_v24  ;;  %vm7497_vm7 = vmmov %vm7495_vm0  ;;  %v1589_v10 = vsel %vm503_vm8, %v1587_v16, %v1588_v25  ;;  %vm7522_vm0 = vcmask 1045504  }
 0x3de   : > { %2362 = vmatprep.mubr.f32.mxu1 %v7411_v11  ;;  %v4214_v46 = vpack.i.bf16 %v5681_v1, %v5678_v0  ;;  %v5710_v12 = vsel %vm7497_vm7, %v1588_v25, %v1615_v15  ;;  %v4219_v6 = vpack.i.bf16 %v5707_v13, %v5681_v1  ;;  %v2075_v27 = vrot.slane %v5681_v1, 4  ;;  %vm7519_vm7 = vmmov %vm7517_vm3 }
 0x3df   : > { %v5721_v51 = vpack.i.bf16 %v5715_v22, %v5710_v12 }
 0x3e0   : > { %4215 = vrot.lane.b32.xlu1 %v4214_v46, %s4628_s21  ;;  %4220 = vrot.lane.b32.xlu0 %v4219_v6, %s4625_s18 }
 0x3e4   : > { %4225 = vrot.lane.b32.xlu1 %v4224_v52, %s4631_s24  ;;  %v1340_v34 = vpop.permute.xlu0 %1339 }
 0x3e8   : > { %4230 = vrot.lane.b32.xlu1 %v5721_v51, %s4628_s21 }
 0x452   : > { %v5883_v40 = vpop.permute.xlu0 %4220 }
 0x491   : > { %v1410_v63 = vpop.f32.mrb[6].mxu0 }
 0x492   : > { %v1411_v14 = vadd.f32 %v1410_v63, %v1340_v34  ;;  %v1412_v53 = vpop.f32.mrb[7].mxu0 }
 0x493   : > { %v1413_v58 = vadd.f32 %v1412_v53, %v1340_v34 }
 0x494   : > { %v5730_v38 = vmul.f32 %v1411_v14, %v5090_v60 }
 0x495   : > { %v5734_v41 = vmul.f32 %v1413_v58, %v5092_v39  ;;  %v5873_v58 = vpop.permute.xlu1 %4215 }
 0x496   : > { %7498 = vst [vmem:[#allocation8_spill] sm:$0xff] %v5730_v38  ;;  %v5738_v48 = vsel %vm482_vm6, %v5730_v38, %v1577_v56  ;;  %v4414_v56 = vpack.i.bf16 %v5710_v12, %v5707_v13 }
 0x497   : > { %7499 = vst [vmem:[#allocation9_spill] sm:$0xff] %v5734_v41  ;;  %v5742_v5 = vsel %vm482_vm6, %v5734_v41, %v1580_v43  ;;  %v4249_v4 = vpack.i.bf16 %v5678_v0, %v5738_v48  ;;  %v4264_v52 = vpack.i.bf16 %v5681_v1, %v5738_v48  ;;  %v7419_v50 = vrot.slane %v5738_v48, 4 }
 0x498   : > { %v4274_v54 = vpack.i.bf16 %v5742_v5, %v5738_v48  ;;  %v4279_v44 = vpack.i.bf16 %v5681_v1, %v5742_v5 }
 0x499   : > { %v5875_v43 = vpop.permute.xlu1 %4225 }
 0x49a   : > { %7507 = vst [vmem:[#allocation17_spill] sm:$0xff] %v5875_v43  ;;  %v7429_v31 = vunpack.i.h.bf16 %v5875_v43 }
 0x49d   : > { %v5885_v16 = vpop.permute.xlu1 %4230 }
 0x4a6   : > { %v1552_v26 = vpop.f32.mrb[8].mxu0 }
 0x4a7   : > { %v1553_v18 = vadd.f32 %v1552_v26, %v1340_v34  ;;  %v1554_v36 = vpop.f32.mrb[9].mxu0 }
 0x4a8   : > { %v1555_v24 = vadd.f32 %v1554_v36, %v1340_v34 }
 0x4a9   : > { %v5750_v61 = vmul.f32 %v1553_v18, %v5106_v57 }
 0x4aa   : > { %v5754_v46 = vmul.f32 %v1555_v24, %v5108_v33 }
 0x4ab   : > { %7500 = vst [vmem:[#allocation10_spill] sm:$0xff] %v5750_v61  ;;  %v5758_v28 = vsel %vm482_vm6, %v5750_v61, %v1589_v10 }
 0x4ac   : > { %7501 = vst [vmem:[#allocation11_spill] sm:$0xff] %v5754_v46  ;;  %7502 = vst [vmem:[#allocation12_spill] sm:$0xff] %v5758_v28  ;;  %v5763_v35 = vsel %vm482_vm6, %v5754_v46, %v1592_v2  ;;  %v4344_v14 = vpack.i.bf16 %v5710_v12, %v5758_v28  ;;  %v7424_v2 = vrot.slane %v5742_v5, 4 }
 0x4ad   : > { %v5767_v42 = vpack.i.bf16 %v5758_v28, %v5763_v35  ;;  %v4324_v37 = vpack.i.bf16 %v5763_v35, %v5707_v13  ;;  %v4314_v45 = vpack.i.bf16 %v5678_v0, %v5763_v35  ;;  %v4329_v63 = vpack.i.bf16 %v5707_v13, %v5763_v35 }
 0x4b0   : > { %v1481_v7 = vpop.f32.mrb[6].mxu1 }
 0x4b1   : > { %v1482_v49 = vadd.f32 %v1481_v7, %v1340_v34  ;;  %v1483_v3 = vpop.f32.mrb[7].mxu1  ;;  %v7421_v7 = vunpack.i.l.bf16 %v5873_v58 }
 0x4b2   : > { %v1484_v6 = vadd.f32 %v1483_v3, %v1340_v34  ;;  %v7420_v3 = vunpack.i.l.bf16 %v5885_v16 }
 0x4b3   : > { %v5771_v23 = vmul.f32 %v1482_v49, %v5121_v59  ;;  %v7413_v49 = vunpack.i.h.bf16 %v5885_v16 }
 0x4b4   : > { %v5802_v32 = vmul.f32 %v1484_v6, %v5131_v19  ;;  %v2077_v6 = vrot.slane %v5696_v29, 4 }
 0x4b5   : > { %7503 = vst [vmem:[#allocation13_spill] sm:$0xff] %v5771_v23  ;;  %v5775_v8 = vsel %vm482_vm6, %v5771_v23, %v1583_v21 }
 0x4b6   : > { %7504 = vst [vmem:[#allocation14_spill] sm:$0xff] %v5775_v8  ;;  %v4239_v25 = vpack.i.bf16 %v5696_v29, %v5775_v8  ;;  %v4304_v15 = vpack.i.bf16 %v5775_v8, %v5742_v5  ;;  %7505 = vst [vmem:[#allocation15_spill] sm:$0xff] %v5802_v32  ;;  %v5811_v30 = vsel %vm482_vm6, %v5802_v32, %v1586_v62  ;;  %v7416_v55 = vrot.slane %v5775_v8, 4 }
 0x4b7   : > { %7506 = vst [vmem:[#allocation16_spill] sm:$0xff] %v5811_v30  ;;  %v4309_v34 = vpack.i.bf16 %v5811_v30, %v5758_v28  ;;  %v4369_v53 = vpack.i.bf16 %v5775_v8, %v5696_v29  ;;  %v7425_v62 = vunpack.i.l.bf16 %v5875_v43 }
 0x4b8   : > { %4240 = vrot.lane.b32.xlu1 %v4239_v25, %s4630_s23  ;;  %4235 = vrot.lane.b32.xlu0 %v4239_v25, %s4629_s22  ;;  %v5974_v11 = vsel %vm503_vm8, %v7416_v55, %v2077_v6 }
 0x4b9   : > { %7516 = vst [vmem:[#allocation26_spill] sm:$0xff] %v5974_v11 }
 0x4bc   : > { %4250 = vrot.lane.b32.xlu0 %v4249_v4, %s4627_s20  ;;  %4245 = vrot.lane.b32.xlu1 %v4249_v4, %s4626_s19 }
 0x4c0   : > { %4260 = vrot.lane.b32.xlu0 %v4249_v4, %s4630_s23  ;;  %4255 = vrot.lane.b32.xlu1 %v4249_v4, %s4629_s22  ;;  %v7414_v4 = vrot.slane %v5758_v28, 4 }
 0x4c4   : > { %4265 = vrot.lane.b32.xlu0 %v4264_v52, %s4631_s24  ;;  %1887 = vrot.lane.b32.xlu1 %v5738_v48, %s4633_s25  ;;  %v7415_v52 = vrot.slane %v5811_v30, 4 }
 0x4c8   : > { %4275 = vrot.lane.b32.xlu0 %v4274_v54, %s4628_s21  ;;  %4270 = vrot.lane.b32.xlu1 %v4274_v54, %s4625_s18  ;;  %v5880_v54 = vld [vmem:[%s7406_s2 + $0x13] sm:$0xff] }
 0x4cc   : > { %4280 = vrot.lane.b32.xlu0 %v4279_v44, %s4626_s19  ;;  %4285 = vrot.lane.b32.xlu1 %v4279_v44, %s4627_s20 }
 0x4d0   : > { %4295 = vrot.lane.b32.xlu0 %v4279_v44, %s4630_s23  ;;  %4290 = vrot.lane.b32.xlu1 %v4279_v44, %s4629_s22  ;;  %v2079_v44 = vrot.slane %v5715_v22, 4 }
 0x4d4   : > { %4305 = vrot.lane.b32.xlu0 %v4304_v15, %s4633_s25  ;;  %4300 = vrot.lane.b32.xlu1 %v4304_v15, %s4631_s24  ;;  %v7417_v15 = vrot.slane %v5763_v35, 4 }
 0x4d8   : > { %4310 = vrot.lane.b32.xlu0 %v4309_v34, %s4625_s18  ;;  %4325 = vrot.lane.b32.xlu1 %v4324_v37, %s4628_s21 }
 0x4dc   : > { %4315 = vrot.lane.b32.xlu0 %v4314_v45, %s4625_s18  ;;  %4330 = vrot.lane.b32.xlu1 %v4329_v63, %s4626_s19 }
 0x4e0   : > { %4320 = vrot.lane.b32.xlu0 %v4309_v34, %s4628_s21  ;;  %4335 = vrot.lane.b32.xlu1 %v5721_v51, %s4625_s18  ;;  %v4349_v51 = vpack.i.bf16 %v5715_v22, %v5811_v30  ;;  %v5925_v34 = vsel %vm503_vm8, %v7424_v2, %v2075_v27 }
 0x4e4   : > { %4340 = vrot.lane.b32.xlu0 %v4329_v63, %s4627_s20  ;;  %1897 = vrot.lane.b32.xlu1 %v5696_v29, %s4633_s25  ;;  %v5940_v29 = vsel %vm216_vm4, %v7413_v49, %v7420_v3 }
 0x4e8   : > { %1893 = vrot.lane.b32.xlu0 %v5681_v1, %s4633_s25  ;;  %1889 = vrot.lane.b32.xlu1 %v5678_v0, %s4633_s25  ;;  %v2083_v1 = vrot.slane %v5707_v13, 4 }
 0x4ec   : > { %4345 = vrot.lane.b32.xlu0 %v4344_v14, %s4626_s19  ;;  %4355 = vrot.lane.b32.xlu1 %v4344_v14, %s4627_s20 }
 0x4f0   : > { %4350 = vrot.lane.b32.xlu0 %v4349_v51, %s4626_s19  ;;  %4365 = vrot.lane.b32.xlu1 %v4349_v51, %s4627_s20 }
 0x4f4   : > { %4360 = vrot.lane.b32.xlu0 %v4239_v25, %s4625_s18  ;;  %4375 = vrot.lane.b32.xlu1 %v4239_v25, %s4626_s19 }
 0x4f8   : > { %4370 = vrot.lane.b32.xlu0 %v4369_v53, %s4628_s21  ;;  %4380 = vrot.lane.b32.xlu1 %v4344_v14, %s4629_s22  ;;  %v5957_v53 = vsel %vm503_vm8, %v7417_v15, %v2083_v1 }
 0x4f9   : > { %7513 = vst [vmem:[#allocation23_spill] sm:$0xff] %v5957_v53 }
 0x4fc   : > { %4385 = vrot.lane.b32.xlu0 %v4239_v25, %s4627_s20  ;;  %4405 = vrot.lane.b32.xlu1 %v4329_v63, %s4630_s23 }
 0x500   : > { %4390 = vrot.lane.b32.xlu0 %v4344_v14, %s4630_s23  ;;  %4410 = vrot.lane.b32.xlu1 %v5767_v42, %s4631_s24 }
 0x504   : > { %4395 = vrot.lane.b32.xlu0 %v4329_v63, %s4629_s22  ;;  %4415 = vrot.lane.b32.xlu1 %v4414_v56, %s4631_s24 }
 0x508   : > { %4400 = vrot.lane.b32.xlu0 %v4349_v51, %s4629_s22  ;;  %4430 = vrot.lane.b32.xlu1 %v5767_v42, %s4633_s25  ;;  %v7418_v42 = vunpack.i.h.bf16 %v5873_v58 }
 0x50a   : > { %v1668_v63 = vsel %vm216_vm4, %v7421_v7, %v7418_v42 }
 0x50c   : > { %4420 = vrot.lane.b32.xlu0 %v4349_v51, %s4630_s23  ;;  %1909 = vrot.lane.b32.xlu1 %v5707_v13, %s4633_s25 }
 0x510   : > { %4425 = vrot.lane.b32.xlu0 %v4349_v51, %s4631_s24  ;;  %1899 = vrot.lane.b32.xlu1 %v5811_v30, %s4633_s25 }
 0x514   : > { %1905 = vrot.lane.b32.xlu0 %v5710_v12, %s4633_s25  ;;  %2274 = vperm.xlu1 %4434, %v5880_v54  }
 0x518   : > { %1901 = vrot.lane.b32.xlu0 %v5715_v22, %s4633_s25  ;;  %4615 = vset.pattern.permute.xlu1 %v4636_v9  ;;  %v2073_v9 = vrot.slane %v5678_v0, 4  ;;  %v2081_v0 = vrot.slane %v5710_v12, 4 }
 0x51a   : > { %v5930_v13 = vsel %vm503_vm8, %v7419_v50, %v2073_v9  ;;  %v5962_v56 = vsel %vm503_vm8, %v7414_v4, %v2081_v0  ;;  %v5969_v9 = vsel %vm503_vm8, %v7415_v52, %v2079_v44 }
 0x51b   : > { %7514 = vst [vmem:[#allocation24_spill] sm:$0xff] %v5962_v56  ;;  %7515 = vst [vmem:[#allocation25_spill] sm:$0xff] %v5969_v9 }
 0x52a   : > { %v5888_v20 = vpop.permute.xlu1 %4240  ;;  %v5890_v26 = vpop.permute.xlu0 %4235 }
 0x52b   : > { %7508 = vst [vmem:[#allocation18_spill] sm:$0xff] %v5888_v20  ;;  %7509 = vst [vmem:[#allocation19_spill] sm:$0xff] %v5890_v26 }
 0x52e   : > { %v5892_v18 = vpop.permute.xlu0 %4250  ;;  %v5894_v36 = vpop.permute.xlu1 %4245 }
 0x52f   : > { %v7431_v49 = vunpack.i.h.bf16 %v5894_v36  ;;  %v7427_v44 = vunpack.i.l.bf16 %v5894_v36  ;;  %v7437_v12 = vunpack.i.h.bf16 %v5892_v18  ;;  %v7544_v28 = vunpack.i.l.bf16 %v5894_v36 }
 0x532   : > { %v5896_v10 = vpop.permute.xlu0 %4260  ;;  %v5898_v24 = vpop.permute.xlu1 %4255 }
 0x533   : > { %7510 = vst [vmem:[#allocation20_spill] sm:$0xff] %v5898_v24  ;;  %v7442_v61 = vunpack.i.h.bf16 %v5898_v24  ;;  %v7443_v46 = vunpack.i.l.bf16 %v5898_v24 }
 0x536   : > { %v5908_v21 = vpop.permute.xlu0 %4265  ;;  %v5910_v25 = vpop.permute.xlu1 %1887 }
 0x537   : > { %7511 = vst [vmem:[#allocation21_spill] sm:$0xff] %v5908_v21  ;;  %7512 = vst [vmem:[#allocation22_spill] sm:$0xff] %v5910_v25  ;;  %v4268_v0 = vunpack.i.h.bf16 %v5908_v21 }
 0x539   : > { %v6007_v27 = vsel %vm330_vm11, %v4268_v0, %v7425_v62 }
 0x53a   : > { %v5942_v37 = vpop.permute.xlu0 %4275  ;;  %v5944_v45 = vpop.permute.xlu1 %4270 }
 0x53b   : > { %v7422_v14 = vunpack.i.h.bf16 %v5944_v45  ;;  %v7423_v51 = vunpack.i.l.bf16 %v5944_v45  ;;  %v7432_v52 = vunpack.i.h.bf16 %v5942_v37  ;;  %v7433_v6 = vunpack.i.l.bf16 %v5942_v37 }
 0x53c   : > { %v7542_v56 = vunpack.i.l.bf16 %v5944_v45 }
 0x53d   : > { %v5985_v4 = vsel %vm235_vm2, %v7423_v51, %v7422_v14  ;;  %v6030_v51 = vsel %vm330_vm11, %v7429_v31, %v4268_v0 }
 0x53e   : > { %v7430_v55 = vrot.slane %v5985_v4, 5  ;;  %v5991_v15 = vpop.permute.xlu0 %4280  ;;  %v5993_v42 = vpop.permute.xlu1 %4285 }
 0x53f   : > { %v7428_v50 = vunpack.i.h.bf16 %v5991_v15  ;;  %v7426_v3 = vunpack.i.l.bf16 %v5991_v15  ;;  %v7436_v7 = vunpack.i.h.bf16 %v5993_v42  ;;  %v7441_v14 = vunpack.i.l.bf16 %v5993_v42 }
 0x540   : > { %v2230_v62 = vsel %vm482_vm6, %v1668_v63, %v7430_v55 }
 0x541   : > { %v6015_v47 = vsel %vm254_vm1, %v7427_v44, %v7426_v3  ;;  %v1740_v2 = vsel %vm254_vm1, %v7431_v49, %v7428_v50  ;;  %v1667_v50 = vsel %vm216_vm4, %v7433_v6, %v7432_v52  ;;  %v1776_v63 = vsel %vm7517_vm3, %v7437_v12, %v7436_v7 }
 0x542   : > { %v1985_v44 = vrot.slane %v1740_v2, 2  ;;  %v4296_v1 = vpop.permute.xlu0 %4295  ;;  %v4291_v22 = vpop.permute.xlu1 %4290  ;;  %v7518_v2 = vunpack.i.l.bf16 %v5892_v18  ;;  %v7447_v49 = vunpack.i.l.bf16 %v5896_v10  ;;  %v3755_v6 = vpack.c.bf16 %v2230_v62, %v1667_v50 }
 0x543   : > { %v4293_v31 = vunpack.i.h.bf16 %v4291_v22  ;;  %v4292_v55 = vunpack.i.l.bf16 %v4291_v22  ;;  %v4298_v3 = vunpack.i.h.bf16 %v4296_v1  ;;  %v4297_v52 = vunpack.i.l.bf16 %v4296_v1 }
 0x544   : > { %v1775_v0 = vsel %vm7519_vm7, %v7518_v2, %v7441_v14  ;;  %v2033_v32 = vrot.slane %v1776_v63, 7  ;;  %3756 = vmatprep.subr.bf16.mxu1 %v3755_v6  ;;  %v7521_v1 = vrot.slane %v6015_v47, 2  ;;  %v7523_v62 = vunpack.i.h.bf16 %v5890_v26 }
 0x545   : > { %v2026_v38 = vrot.slane %v1775_v0, 7  ;;  %v7524_v7 = vunpack.i.l.bf16 %v5890_v26  ;;  %v6080_v63 = vsel %vm292_vm5, %v7443_v46, %v4292_v55  ;;  %v6086_v0 = vsel %vm292_vm5, %v7442_v61, %v4293_v31 }
 0x546   : > { %v6057_v2 = vpop.permute.xlu0 %4305  ;;  %v6059_v22 = vpop.permute.xlu1 %4300  ;;  %v6064_v50 = vsel %vm7522_vm0, %v7521_v1, %v1985_v44  ;;  %v6070_v14 = vsel %vm292_vm5, %v4293_v31, %v7523_v62  ;;  %v7525_v1 = vunpack.i.h.bf16 %v5888_v20  ;;  %v7527_v31 = vunpack.i.h.bf16 %v5896_v10 }
 0x547   : > { %7520 = vst [vmem:[#allocation27_spill] sm:$0xff] %v6059_v22  ;;  %v1809_v6 = vsel %vm292_vm5, %v4292_v55, %v7524_v7  ;;  %v7526_v7 = vunpack.i.l.bf16 %v5888_v20  ;;  %v6104_v55 = vsel %vm311_vm10, %v7447_v49, %v4297_v52  ;;  %vm7528_vm3 = vcmask 1040384  }
 0x548   : > { %v6092_v62 = vsel %vm311_vm10, %v4298_v3, %v7525_v1  ;;  %v6110_v61 = vsel %vm311_vm10, %v7527_v31, %v4298_v3  ;;  %v2110_v46 = vrot.slane %v1809_v6, 1  ;;  %v2034_v3 = vsel %vm7528_vm3, %v2026_v38, %v2033_v32  ;;  %vm7529_vm7 = vmmov %vm7528_vm3 }
 0x549   : > { %v6098_v23 = vsel %vm311_vm10, %v4297_v52, %v7526_v7  ;;  %v4302_v7 = vunpack.i.l.bf16 %v6059_v22  ;;  %v2165_v31 = vrot.slane %v6092_v62, 6  ;;  %v6127_v12 = vsel %vm7529_vm7, %v1985_v44, %v2026_v38  ;;  %vm7558_vm7 = vmmov %vm7522_vm0 }
 0x54a   : > { %v6118_v49 = vpop.permute.xlu0 %4310  ;;  %v6120_v57 = vpop.permute.xlu1 %4325  ;;  %v7530_v52 = vunpack.i.h.bf16 %v6059_v22  ;;  %v7531_v32 = vunpack.i.l.bf16 %v5908_v21  ;;  %v7532_v44 = vrot.slane %v5742_v5, 4  ;;  %v7533_v41 = vrot.slane %v6070_v14, 1 }
 0x54b   : > { %v4312_v38 = vunpack.i.l.bf16 %v6118_v49  ;;  %v7534_v1 = vunpack.i.l.bf16 %v6057_v2  ;;  %v6167_v5 = vsel %vm510_vm9, %v5925_v34, %v2110_v46  ;;  %v7537_v9 = vunpack.i.h.bf16 %v6118_v49 }
 0x54c   : > { %v6135_v39 = vsel %vm330_vm11, %v4302_v7, %v7530_v52  ;;  %v6141_v62 = vsel %vm330_vm11, %v7531_v32, %v4302_v7  ;;  %v6148_v33 = vsel %vm503_vm8, %v2034_v3, %v7532_v44  ;;  %v6153_v52 = vsel %vm510_vm9, %v2110_v46, %v7533_v41 }
 0x54d   : > { %v6160_v7 = vsel %vm7473_vm14, %v5910_v25, %v7534_v1  ;;  %v7535_v3 = vrot.slane %v6086_v0, 1  ;;  %v7536_v41 = vrot.slane %v6080_v63, 1  ;;  %v4327_v32 = vunpack.i.l.bf16 %v6120_v57 }
 0x54e   : > { %v4316_v6 = vpop.permute.xlu0 %4315  ;;  %v6163_v60 = vpop.permute.xlu1 %4330  ;;  %v3763_v34 = vpack.c.bf16 %v6148_v33, %v6127_v12  ;;  %v7540_v33 = vunpack.i.l.bf16 %v5942_v37  ;;  %v7541_v12 = vunpack.i.h.bf16 %v6120_v57  ;;  %vm7557_vm3 = vcmp.lt.s32.totalorder %v4755_v17, 1 }
 0x54f   : > { %v6174_v44 = vsel %vm510_vm9, %v7536_v41, %v7535_v3  ;;  %v4318_v59 = vunpack.i.h.bf16 %v4316_v6  ;;  %v4317_v25 = vunpack.i.l.bf16 %v4316_v6  ;;  %v6187_v3 = vsel %vm235_vm2, %v7537_v9, %v4312_v38  ;;  %vm7561_vm15 = vmmov %vm7557_vm3 }
 0x550   : > { %v7538_v41 = vunpack.i.l.bf16 %v5883_v40  ;;  %v7539_v6 = vunpack.i.h.bf16 %v5883_v40  ;;  %v1669_v9 = vsel %vm216_vm4, %v7541_v12, %v7540_v33  ;;  %v7546_v33 = vunpack.i.h.bf16 %v5894_v36 }
 0x552   : > { %v1704_v19 = vsel %vm235_vm2, %v4318_v59, %v7538_v41  ;;  %v1706_v1 = vsel %vm235_vm2, %v7539_v6, %v4318_v59  ;;  %v1705_v41 = vsel %vm235_vm2, %v4317_v25, %v7542_v56  ;;  %v6209_v20 = vpop.permute.xlu0 %4320  ;;  %v6211_v59 = vpop.permute.xlu1 %4335  ;;  %v7543_v6 = vunpack.i.l.bf16 %v5873_v58 }
 0x553   : > { %v1941_v46 = vrot.slane %v1706_v1, 5  ;;  %v1943_v22 = vrot.slane %v1704_v19, 5  ;;  %v1935_v53 = vrot.slane %v1705_v41, 5  ;;  %v7545_v1 = vunpack.i.l.bf16 %v6163_v60 }
 0x554   : > { %v1670_v11 = vsel %vm216_vm4, %v4327_v32, %v7543_v6  ;;  %v7547_v56 = vunpack.i.h.bf16 %v6163_v60  ;;  %v4337_v30 = vunpack.i.l.bf16 %v6211_v59  ;;  %v7550_v6 = vrot.slane %v6098_v23, 6 }
 0x555   : > { %v1741_v19 = vsel %vm254_vm1, %v7545_v1, %v7544_v28  ;;  %v2229_v24 = vsel %vm482_vm6, %v1670_v11, %v1935_v53  ;;  %v7548_v28 = vrot.slane %v5985_v4, 5  ;;  %v1939_v11 = vrot.slane %v6187_v3, 5 }
 0x556   : > { %v1742_v12 = vsel %vm254_vm1, %v7547_v56, %v7546_v33  ;;  %v1977_v8 = vrot.slane %v1741_v19, 2  ;;  %v4341_v1 = vpop.permute.xlu0 %4340  ;;  %v6237_v21 = vpop.permute.xlu1 %1897  ;;  %v3757_v33 = vpack.c.bf16 %v2229_v24, %v1669_v9  ;;  %v7549_v19 = vrot.slane %v6015_v47, 2 }
 0x557   : > { %v1983_v26 = vrot.slane %v1742_v12, 2  ;;  %v1944_v36 = vsel %vm482_vm6, %v7548_v28, %v1943_v22  ;;  %v1942_v12 = vsel %vm482_vm6, %v1935_v53, %v1941_v46  ;;  %v2166_v43 = vsel %vm517_vm12, %v7550_v6, %v2165_v31 }
 0x558   : > { %v2236_v56 = vsel %vm7522_vm0, %v1944_v36, %v7549_v19  ;;  %v4343_v41 = vunpack.i.h.bf16 %v4341_v1  ;;  %v7551_v4 = vrot.slane %v6080_v63, 1  ;;  %v7552_v24 = vrot.slane %v6135_v39, 3  ;;  %3758 = vmatpush1.bf16.msra.mxu1 %v3757_v33 }
 0x559   : > { %v6260_v53 = vsel %vm235_vm2, %v4312_v38, %v4317_v25  ;;  %v7553_v31 = vunpack.i.l.bf16 %v6209_v20  ;;  %v7554_v46 = vunpack.i.h.bf16 %v6209_v20  ;;  %v4342_v9 = vunpack.i.l.bf16 %v4341_v1 }
 0x55a   : > { %v6251_v22 = vsel %vm510_vm9, %v5930_v13, %v7551_v4  ;;  %v6256_v47 = vsel %vm524_vm13, %v2166_v43, %v7552_v24  ;;  %v3759_v13 = vpack.c.bf16 %v6064_v50, %v2236_v56  ;;  %v7555_v6 = vunpack.i.h.bf16 %v6211_v59  ;;  %v1894_v4 = vpop.permute.xlu0 %1893  ;;  %v6293_v24 = vpop.permute.xlu1 %1889 }
 0x55b   : > { %v6268_v63 = vsel %vm216_vm4, %v7554_v46, %v7553_v31  ;;  %v7556_v25 = vunpack.i.h.bf16 %v5892_v18  ;;  %v1984_v28 = vsel %vm7558_vm7, %v1977_v8, %v1983_v26  ;;  %v2235_v36 = vsel %vm7522_vm0, %v1942_v12, %v1977_v8 }
 0x55c   : > { %v6275_v43 = vsel %vm235_vm2, %v7555_v6, %v4337_v30  ;;  %v7559_v1 = vunpack.i.h.bf16 %v5883_v40  ;;  %v7560_v33 = vunpack.i.l.bf16 %v5892_v18  ;;  %3760 = vmatprep.subr.bf16.mxu1 %v3759_v13  ;;  %v3761_v31 = vpack.c.bf16 %v1984_v28, %v2235_v36 }
 0x55d   : > { %v1778_v38 = vsel %vm7557_vm3, %v4343_v41, %v7556_v25  ;;  %v7562_v46 = vunpack.i.l.bf16 %v5885_v16  ;;  %v3769_v12 = vpack.c.bf16 %v6174_v44, %v6251_v22  ;;  %v1940_v13 = vrot.slane %v6260_v53, 5 }
 0x55e   : > { %v6287_v50 = vsel %vm235_vm2, %v4337_v30, %v7559_v1  ;;  %v1777_v19 = vsel %vm7561_vm15, %v4342_v9, %v7560_v33  ;;  %v2031_v56 = vrot.slane %v1778_v38, 7  ;;  %v6303_v30 = vsel %vm482_vm6, %v5940_v29, %v1939_v11  ;;  %3762 = vmatpush1.bf16.msra.mxu1 %v3761_v31  ;;  %v4356_v1 = vpop.permute.xlu1 %4355 }
 0x55f   : > { %v1660_v8 = vsel %vm216_vm4, %v7562_v46, %v4327_v32  ;;  %v2025_v18 = vrot.slane %v1777_v19, 7  ;;  %v3805_v6 = vpack.c.bf16 %v6303_v30, %v6268_v63  ;;  %v1949_v25 = vrot.slane %v6275_v43, 5  ;;  %3764 = vmatprep.subr.bf16.mxu1 %v3763_v34 }
 0x560   : > { %v7563_v32 = vrot.slane %v6098_v23, 6  ;;  %v7564_v38 = vrot.slane %v6070_v14, 1  ;;  %v1951_v29 = vrot.slane %v6287_v50, 5  ;;  %vm7565_vm15 = vcmask 1040384   ;;  %v4346_v14 = vpop.permute.xlu0 %4345 }
 0x561   : > { %v2032_v36 = vsel %vm7565_vm15, %v2025_v18, %v2031_v56  ;;  %vm7566_vm3 = vmmov %vm7565_vm15  ;;  %v6323_v53 = vsel %vm7473_vm14, %v1894_v4, %v6237_v21  ;;  %v6328_v23 = vsel %vm7473_vm14, %v6293_v24, %v1894_v4  ;;  %v7567_v34 = vrot.slane %v5738_v48, 4 }
 0x562   : > { %v2260_v28 = vsel %vm517_vm12, %v7564_v38, %v7563_v32  ;;  %v2241_v44 = vsel %vm7566_vm3, %v1983_v26, %v2025_v18  ;;  %v7568_v26 = vrot.slane %v6110_v61, 6  ;;  %v4348_v19 = vunpack.i.h.bf16 %v4346_v14 }
 0x563   : > { %v3771_v22 = vpack.c.bf16 %v6256_v47, %v2260_v28  ;;  %v2247_v50 = vsel %vm503_vm8, %v2032_v36, %v7567_v34  ;;  %v7569_v47 = vrot.slane %v6104_v55, 6  ;;  %v4347_v56 = vunpack.i.l.bf16 %v4346_v14 }
 0x564   : > { %v4358_v31 = vunpack.i.h.bf16 %v4356_v1  ;;  %v4357_v46 = vunpack.i.l.bf16 %v4356_v1  ;;  %v3765_v18 = vpack.c.bf16 %v2247_v50, %v2241_v44  ;;  %v7571_v32 = vrot.slane %v6086_v0, 1 }
 0x565   : > { %v2164_v33 = vsel %vm517_vm12, %v7569_v47, %v7568_v26  ;;  %v7570_v4 = vmov %v7569_v47  ;;  %v7572_v48 = vrot.slane %v6141_v62, 3  ;;  %v7573_v61 = vunpack.i.h.bf16 %v6057_v2 }
 0x566   : > { %v2259_v38 = vsel %vm517_vm12, %v7571_v32, %v7570_v4  ;;  %v7574_v36 = vunpack.i.l.bf16 %v6057_v2  ;;  %v7575_v1 = vunpack.i.l.bf16 %v6163_v60  ;;  %v7576_v0 = vunpack.i.h.bf16 %v6163_v60  ;;  %3766 = vmatpush1.bf16.msra.mxu1 %v3765_v18 }
 0x567   : > { %v2265_v28 = vsel %vm524_vm13, %v2164_v33, %v7572_v48  ;;  %v7577_v34 = vrot.slane %v6007_v27, 3  ;;  %v7578_v50 = vrot.slane %v6135_v39, 3  ;;  %v7579_v47 = vrot.slane %v6030_v51, 3  ;;  %v6376_v27 = vpop.permute.xlu1 %4365 }
 0x568   : > { %v1917_v14 = vsel %vm7473_vm14, %v7574_v36, %v7573_v61  ;;  %v1731_v55 = vsel %vm254_vm1, %v4347_v56, %v7575_v1  ;;  %v1732_v44 = vsel %vm254_vm1, %v4348_v19, %v7576_v0  ;;  %v7580_v33 = vmov %v7572_v48  ;;  %v4351_v48 = vpop.permute.xlu0 %4350 }
 0x569   : > { %v2208_v26 = vsel %vm524_vm13, %v7578_v50, %v7577_v34  ;;  %v6370_v4 = vsel %vm524_vm13, %v7580_v33, %v7579_v47  ;;  %vm7581_vm7 = vcmp.lt.s32.totalorder %v4755_v17, 1  ;;  %v7583_v39 = vunpack.i.h.bf16 %v6120_v57 }
 0x56a   : > { %v1768_v32 = vsel %vm7581_vm7, %v4358_v31, %v4343_v41  ;;  %vm7582_vm0 = vmmov %vm7581_vm7  ;;  %v7584_v61 = vunpack.i.l.bf16 %v6209_v20  ;;  %v6387_v62 = vsel %vm482_vm6, %v1660_v8, %v1940_v13  ;;  %v7585_v41 = vpack.c.bf16 %v6153_v52, %v6167_v5 }
 0x56b   : > { %v1767_v60 = vsel %vm7582_vm0, %v4357_v46, %v4342_v9  ;;  %v4353_v9 = vunpack.i.h.bf16 %v4351_v48  ;;  %v4352_v18 = vunpack.i.l.bf16 %v4351_v48  ;;  %v4368_v36 = vunpack.i.h.bf16 %v6376_v27  ;;  %vm7586_vm15 = vmmov %vm7582_vm0 }
 0x56c   : > { %v6384_v51 = vsel %vm216_vm4, %v7584_v61, %v7583_v39  ;;  %3768 = vmatprep.subr.bf16.mxu1 %v7585_v41  ;;  %v4367_v1 = vunpack.i.l.bf16 %v6376_v27  ;;  %v1982_v57 = vrot.slane %v1731_v55, 2  ;;  %v1993_v0 = vrot.slane %v1732_v44, 2  ;;  %v4361_v5 = vpop.permute.xlu0 %4360  ;;  %v4376_v55 = vpop.permute.xlu1 %4375  ;;  %vm7587_vm3 = vmmov %vm7582_vm0 }
 0x56d   : > { %v3773_v34 = vpack.c.bf16 %v2265_v28, %v2259_v38  ;;  %v3775_v50 = vpack.c.bf16 %v1917_v14, %v2208_v26  ;;  %v2041_v47 = vrot.slane %v1768_v32, 7  ;;  %v2030_v33 = vrot.slane %v1767_v60, 7  ;;  %3770 = vmatpush1.bf16.msra.mxu1 %v3769_v12 }
 0x56e   : > { %v1733_v8 = vsel %vm254_vm1, %v4352_v18, %v4347_v56  ;;  %v6398_v39 = vsel %vm254_vm1, %v4353_v9, %v4348_v19  ;;  %v6404_v52 = vsel %vm7586_vm15, %v4367_v1, %v4357_v46  ;;  %v3777_v38 = vpack.c.bf16 %v6160_v7, %v6370_v4  ;;  %3772 = vmatprep.subr.bf16.mxu1 %v3771_v22 }
 0x56f   : > { %v3803_v28 = vpack.c.bf16 %v6387_v62, %v6384_v51  ;;  %v1952_v56 = vsel %vm482_vm6, %v1940_v13, %v1951_v29  ;;  %v6415_v19 = vsel %vm7587_vm3, %v4368_v36, %v4358_v31  ;;  %v4363_v46 = vunpack.i.h.bf16 %v4361_v5 }
 0x570   : > { %v4362_v14 = vunpack.i.l.bf16 %v4361_v5  ;;  %v4378_v12 = vunpack.i.h.bf16 %v4376_v55  ;;  %v1981_v44 = vrot.slane %v1733_v8, 2  ;;  %v1991_v26 = vrot.slane %v6398_v39, 2  ;;  %v4371_v48 = vpop.permute.xlu0 %4370  ;;  %v6443_v61 = vpop.permute.xlu1 %4380 }
 0x571   : > { %v4377_v32 = vunpack.i.l.bf16 %v4376_v55  ;;  %vm2277_vm7 = vcmask 809984   ;;  %v1950_v7 = vsel %vm482_vm6, %v1939_v11, %v1949_v25  ;;  %vm7588_vm0 = vcmask 1045504   ;;  %3774 = vmatpush1.bf16.msra.mxu1 %v3773_v34 }
 0x572   : > { %v6424_v13 = vsel %vm7588_vm0, %v1982_v57, %v1993_v0  ;;  %vm7589_vm15 = vmmov %vm7588_vm0  ;;  %vm7590_vm3 = vcmask 1040384   ;;  %v2029_v4 = vrot.slane %v6404_v52, 7  ;;  %v2039_v60 = vrot.slane %v6415_v19, 7  ;;  %3776 = vmatprep.subr.bf16.mxu1 %v3775_v50 }
 0x573   : > { %v6427_v29 = vsel %vm7589_vm15, %v1952_v56, %v1982_v57  ;;  %v2042_v22 = vsel %vm7590_vm3, %v2030_v33, %v2041_v47  ;;  %vm7591_vm14 = vmmov %vm7590_vm3  ;;  %v7592_v43 = vunpack.i.h.bf16 %v6118_v49  ;;  %v7593_v11 = vunpack.i.h.bf16 %v6211_v59 }
 0x574   : > { %v6431_v31 = vsel %vm7591_vm14, %v1993_v0, %v2030_v33  ;;  %v7594_v41 = vunpack.i.l.bf16 %v5883_v40  ;;  %v7595_v0 = vunpack.i.h.bf16 %v5944_v45  ;;  %v6455_v59 = vsel %vm254_vm1, %v4378_v12, %v4353_v9  ;;  %vm7598_vm14 = vmmov %vm7588_vm0 }
 0x575   : > { %v1699_v3 = vsel %vm235_vm2, %v4362_v14, %v7592_v43  ;;  %v1700_v25 = vsel %vm235_vm2, %v4363_v46, %v7593_v11  ;;  %v7596_v47 = vunpack.i.h.bf16 %v5991_v15  ;;  %v1735_v40 = vsel %vm254_vm1, %v4377_v32, %v4352_v18  ;;  %3778 = vmatpush1.bf16.msra.mxu1 %v3777_v38 }
 0x576   : > { %v1702_v57 = vsel %vm235_vm2, %v7594_v41, %v4363_v46  ;;  %v1701_v49 = vsel %vm235_vm2, %v7595_v0, %v4362_v14  ;;  %v7597_v33 = vunpack.i.l.bf16 %v5991_v15  ;;  %v3807_v9 = vpack.c.bf16 %v6424_v13, %v6427_v29  ;;  %3603 = vmatprep.subr.msk.mxu1 %vm482_vm6, %v6323_v53 }
 0x577   : > { %v6461_v34 = vsel %vm254_vm1, %v7596_v47, %v4378_v12  ;;  %v6476_v8 = vsel %vm7598_vm14, %v1981_v44, %v1991_v26  ;;  %v1938_v5 = vrot.slane %v1699_v3, 5  ;;  %v1947_v55 = vrot.slane %v1700_v25, 5  ;;  %v4386_v12 = vpop.permute.xlu0 %4385  ;;  %vm7606_vm14 = vmmov %vm7588_vm0 }
 0x578   : > { %v6469_v45 = vsel %vm254_vm1, %v7597_v33, %v4377_v32  ;;  %v4373_v50 = vunpack.i.h.bf16 %v4371_v48  ;;  %v4372_v56 = vunpack.i.l.bf16 %v4371_v48  ;;  %v1945_v46 = vrot.slane %v1702_v57, 5  ;;  %v6480_v32 = vpop.permute.xlu1 %4405 }
 0x579   : > { %v1937_v18 = vrot.slane %v1701_v49, 5  ;;  %v1987_v15 = vrot.slane %v6461_v34, 2  ;;  %v1989_v14 = vrot.slane %v6455_v59, 2  ;;  %v1979_v13 = vrot.slane %v6469_v45, 2  ;;  %3604 = vmatpush1.msk.msra.mxu1 %vm482_vm6, %v6328_v23 }
 0x57a   : > { %v1980_v29 = vrot.slane %v1735_v40, 2  ;;  %v7599_v43 = vunpack.i.h.bf16 %v5873_v58  ;;  %v4388_v11 = vunpack.i.h.bf16 %v4386_v12  ;;  %v4383_v25 = vunpack.i.h.bf16 %v6443_v61  ;;  %3804 = vmatprep.subr.bf16.mxu1 %v3803_v28  ;;  %3605 = vmatmul.mubr.msk.f32.vlgmr.msra.gmra.mrb[8].mxu1 %vm2277_vm7, %v5880_v54 }
 0x57b   : > { %v4387_v48 = vunpack.i.l.bf16 %v4386_v12  ;;  %v2239_v38 = vsel %vm7588_vm0, %v1950_v7, %v1981_v44  ;;  %v7600_v41 = vrot.slane %v5763_v35, 4  ;;  %v7601_v0 = vunpack.i.h.bf16 %v5885_v16  ;;  %3806 = vmatpush1.bf16.msra.mxu1 %v3805_v6 }
 0x57c   : > { %v1666_v3 = vsel %vm216_vm4, %v7599_v43, %v4372_v56  ;;  %v7602_v49 = vunpack.i.h.bf16 %v5942_v37  ;;  %v1948_v40 = vsel %vm482_vm6, %v1938_v5, %v1947_v55  ;;  %vm7603_vm15 = vcmp.lt.s32.totalorder %v4755_v17, 1  ;;  %v6523_v33 = vpop.permute.xlu1 %4410  ;;  %3808 = vmatprep.subr.bf16.mxu1 %v3807_v9 }
 0x57d   : > { %v6494_v57 = vsel %vm503_vm8, %v2042_v22, %v7600_v41  ;;  %v1664_v58 = vsel %vm216_vm4, %v4372_v56, %v7601_v0  ;;  %v2231_v47 = vsel %vm482_vm6, %v1666_v3, %v1937_v18  ;;  %v1771_v35 = vsel %vm7603_vm15, %v4387_v48, %v4367_v1  ;;  %vm7604_vm3 = vmmov %vm7603_vm15  ;;  %v6521_v22 = vpop.permute.xlu0 %4390 }
 0x57e   : > { %v1665_v53 = vsel %vm216_vm4, %v7602_v49, %v4373_v50  ;;  %v1772_v16 = vsel %vm7604_vm3, %v4388_v11, %v4368_v36  ;;  %v4408_v44 = vunpack.i.h.bf16 %v6480_v32  ;;  %v7605_v37 = vunpack.i.h.bf16 %v6209_v20  ;;  %vm7608_vm15 = vmmov %vm7604_vm3 }
 0x57f   : > { %v4382_v1 = vunpack.i.l.bf16 %v6443_v61  ;;  %v1990_v20 = vsel %vm7606_vm14, %v1980_v29, %v1989_v14  ;;  %v1946_v23 = vsel %vm482_vm6, %v1937_v18, %v1945_v46  ;;  %v1988_v27 = vsel %vm7588_vm0, %v1979_v13, %v1987_v15  ;;  %vm7612_vm14 = vmmov %vm7588_vm0 }
 0x580   : > { %v1663_v7 = vsel %vm216_vm4, %v4373_v50, %v7605_v37  ;;  %v3781_v36 = vpack.c.bf16 %v2231_v47, %v1665_v53  ;;  %v7607_v45 = vunpack.i.h.bf16 %v5993_v42  ;;  %v4407_v62 = vunpack.i.l.bf16 %v6480_v32 }
 0x581   : > { %v2232_v28 = vsel %vm482_vm6, %v1664_v58, %v1938_v5  ;;  %v7609_v55 = vmov 0.0   ;;  %v7610_v50 = vunpack.i.l.bf16 %v5993_v42  ;;  %v2028_v46 = vrot.slane %v1771_v35, 7  ;;  %v4396_v6 = vpop.permute.xlu0 %4395  ;;  %v6564_v42 = vpop.permute.xlu1 %4415 }
 0x582   : > { %v6542_v51 = vsel %vm7608_vm15, %v7607_v45, %v4388_v11  ;;  %2504 = vmatprep.mubr.f32.mxu1 %v7609_v55  ;;  %v2037_v18 = vrot.slane %v1772_v16, 7  ;;  %v3779_v12 = vpack.c.bf16 %v2232_v28, %v1663_v7  ;;  %v7611_v32 = vunpack.i.h.bf16 %v5896_v10 }
 0x583   : > { %v6554_v56 = vsel %vm7604_vm3, %v7610_v50, %v4387_v48  ;;  %v4393_v63 = vunpack.i.h.bf16 %v6521_v22  ;;  %v2238_v30 = vsel %vm7612_vm14, %v1948_v40, %v1980_v29  ;;  %v3809_v43 = vpack.c.bf16 %v6476_v8, %v2239_v38  ;;  %v7621_v50 = vld [vmem:[#allocation16_spill] sm:$0xff] }
 0x584   : > { %v6560_v5 = vsel %vm311_vm10, %v4408_v44, %v7611_v32  ;;  %3780 = vmatprep.subr.bf16.mxu0 %v3779_v12  ;;  %v4392_v3 = vunpack.i.l.bf16 %v6521_v22  ;;  %v4413_v9 = vunpack.i.h.bf16 %v6523_v33  ;;  %v4412_v11 = vunpack.i.l.bf16 %v6523_v33  ;;  %v7623_v32 = vld [vmem:[#allocation17_spill] sm:$0xff] }
 0x585   : > { %v2237_v48 = vsel %vm7588_vm0, %v1946_v23, %v1979_v13  ;;  %v2027_v41 = vrot.slane %v6554_v56, 7  ;;  %v2035_v0 = vrot.slane %v6542_v51, 7  ;;  %v7613_v29 = vunpack.i.l.bf16 %v5896_v10  ;;  %3782 = vmatpush1.bf16.msra.mxu0 %v3781_v36  ;;  %3810 = vmatpush1.bf16.msra.mxu1 %v3809_v43  ;;  %v4401_v16 = vpop.permute.xlu0 %4400  ;;  %v7616_v23 = vld [vmem:[#allocation21_spill] sm:$0xff] }
 0x586   : > { %v3783_v8 = vpack.c.bf16 %v1990_v20, %v2238_v30  ;;  %v2173_v38 = vrot.slane %v6560_v5, 6  ;;  %v4398_v49 = vunpack.i.h.bf16 %v4396_v6  ;;  %v4397_v53 = vunpack.i.l.bf16 %v4396_v6 }
 0x587   : > { %v6577_v58 = vsel %vm311_vm10, %v4407_v62, %v7613_v29  ;;  %v4418_v47 = vunpack.i.h.bf16 %v6564_v42  ;;  %v4417_v13 = vunpack.i.l.bf16 %v6564_v42  ;;  %v3785_v40 = vpack.c.bf16 %v1988_v27, %v2237_v48 }
 0x588   : > { %3784 = vmatprep.subr.bf16.mxu0 %v3783_v8  ;;  %v3811_v10 = vpack.c.bf16 %v6494_v57, %v6431_v31  ;;  %vm7614_vm15 = vcmask 1040384   ;;  %v6589_v37 = vsel %vm311_vm10, %v4392_v3, %v4407_v62  ;;  %v6595_v7 = vsel %vm311_vm10, %v4393_v63, %v4408_v44 }
 0x589   : > { %v2038_v35 = vsel %vm7614_vm15, %v2028_v46, %v2037_v18  ;;  %v6601_v31 = vsel %vm330_vm11, %v4413_v9, %v4412_v11  ;;  %vm7615_vm3 = vmmov %vm7614_vm15  ;;  %v2162_v20 = vrot.slane %v6577_v58, 6  ;;  %v7617_v27 = vunpack.i.l.bf16 %v7616_v23  ;;  %3786 = vmatpush1.bf16.msra.mxu0 %v3785_v40 }
 0x58a   : > { %v2244_v57 = vsel %vm7615_vm3, %v1989_v14, %v2028_v46  ;;  %v1803_v44 = vsel %vm292_vm5, %v4382_v1, %v4397_v53  ;;  %v6621_v59 = vsel %vm292_vm5, %v4383_v25, %v4398_v49  ;;  %3812 = vmatprep.subr.bf16.mxu1 %v3811_v10  ;;  %v7618_v14 = vld [vmem:[#allocation20_spill] sm:$0xff]  ;;  %v7622_v56 = vrot.slane %v7621_v50, 4  ;;  %vm7627_vm14 = vmmov %vm7615_vm3 }
 0x58b   : > { %v6611_v36 = vsel %vm330_vm11, %v4412_v11, %v7617_v27  ;;  %v7619_v45 = vunpack.i.l.bf16 %v7618_v14  ;;  %v7620_v62 = vunpack.i.h.bf16 %v7618_v14  ;;  %v4403_v18 = vunpack.i.h.bf16 %v4401_v16  ;;  %v6665_v14 = vpop.permute.xlu1 %4430  ;;  %vm7628_vm0 = vmmov %vm7615_vm3 }
 0x58c   : > { %v2250_v46 = vsel %vm503_vm8, %v2038_v35, %v7622_v56  ;;  %v6638_v12 = vsel %vm330_vm11, %v4418_v47, %v4417_v13  ;;  %v7624_v30 = vunpack.i.h.bf16 %v7623_v32  ;;  %v4402_v11 = vunpack.i.l.bf16 %v4401_v16  ;;  %v7625_v16 = vld [vmem:[#allocation19_spill] sm:$0xff]  ;;  %vm7629_vm15 = vmmov %vm7628_vm0 }
 0x58d   : > { %v1813_v51 = vsel %vm292_vm5, %v4397_v53, %v7619_v45  ;;  %v1814_v28 = vsel %vm292_vm5, %v4398_v49, %v7620_v62  ;;  %v3787_v43 = vpack.c.bf16 %v2250_v46, %v2244_v57  ;;  %v2161_v48 = vrot.slane %v6589_v37, 6  ;;  %v4421_v49 = vpop.permute.xlu0 %4420  ;;  %vm7632_vm3 = vmmov %vm7628_vm0 }
 0x58e   : > { %v6644_v6 = vsel %vm330_vm11, %v4417_v13, %v7624_v30  ;;  %v2171_v29 = vrot.slane %v6595_v7, 6  ;;  %v2203_v58 = vrot.slane %v6601_v31, 3  ;;  %v2204_v8 = vrot.slane %v6611_v36, 3  ;;  %v7646_v7 = vld [vmem:[#allocation22_spill] sm:$0xff] }
 0x58f   : > { %v2113_v53 = vrot.slane %v1803_v44, 1  ;;  %v2114_v40 = vrot.slane %v1813_v51, 1  ;;  %v2123_v10 = vrot.slane %v6621_v59, 1  ;;  %v2125_v35 = vrot.slane %v1814_v28, 1  ;;  %3788 = vmatprep.subr.bf16.mxu0 %v3787_v43  ;;  %v7630_v28 = vld [vmem:[#allocation14_spill] sm:$0xff] }
 0x590   : > { %v2213_v13 = vrot.slane %v6638_v12, 3  ;;  %v2215_v57 = vrot.slane %v6644_v6, 3  ;;  %v7626_v23 = vunpack.i.h.bf16 %v7625_v16  ;;  %v6663_v44 = vsel %vm292_vm5, %v4403_v18, %v4383_v25 }
 0x591   : > { %v1805_v45 = vsel %vm292_vm5, %v4402_v11, %v4382_v1  ;;  %v2036_v51 = vsel %vm7627_vm14, %v2027_v41, %v2035_v0  ;;  %v2243_v62 = vsel %vm7628_vm0, %v1987_v15, %v2027_v41  ;;  %v2040_v25 = vsel %vm7629_vm15, %v2029_v4, %v2039_v60  ;;  %v7633_v1 = vld [vmem:[#allocation12_spill] sm:$0xff]  ;;  %v4426_v43 = vpop.permute.xlu0 %4425 }
 0x592   : > { %v6657_v27 = vsel %vm292_vm5, %v7626_v23, %v4403_v18  ;;  %v7631_v50 = vrot.slane %v7630_v28, 4  ;;  %v2245_v61 = vsel %vm7632_vm3, %v1991_v26, %v2029_v4  ;;  %v7634_v34 = vrot.slane %v7633_v1, 4  ;;  %v7636_v26 = vld [vmem:[#allocation23_spill] sm:$0xff] }
 0x593   : > { %v4423_v41 = vunpack.i.h.bf16 %v4421_v49  ;;  %v4433_v19 = vunpack.i.h.bf16 %v6665_v14  ;;  %v4422_v60 = vunpack.i.l.bf16 %v4421_v49  ;;  %v2119_v18 = vrot.slane %v6657_v27, 1 }
 0x594   : > { %v2249_v56 = vsel %vm503_vm8, %v2036_v51, %v7631_v50  ;;  %v2251_v15 = vsel %vm503_vm8, %v2040_v25, %v7634_v34  ;;  %v7635_v30 = vunpack.i.l.bf16 %v7625_v16  ;;  %v2126_v39 = vsel %vm510_vm9, %v2114_v40, %v2125_v35  ;;  %v7640_v50 = vld [vmem:[#allocation24_spill] sm:$0xff] }
 0x595   : > { %v3789_v0 = vpack.c.bf16 %v2249_v56, %v2243_v62  ;;  %v3813_v46 = vpack.c.bf16 %v2251_v15, %v2245_v61  ;;  %v2258_v4 = vsel %vm510_vm9, %v7636_v26, %v2114_v40  ;;  %v2112_v23 = vrot.slane %v1805_v45, 1  ;;  %v7637_v62 = vld [vmem:[#allocation18_spill] sm:$0xff]  ;;  %v1906_v12 = vpop.permute.xlu0 %1905 }
 0x596   : > { %v1807_v52 = vsel %vm292_vm5, %v7635_v30, %v4402_v11  ;;  %v2121_v51 = vrot.slane %v6663_v44, 1  ;;  %v7638_v49 = vunpack.i.h.bf16 %v7637_v62  ;;  %v1842_v11 = vsel %vm311_vm10, %v4423_v41, %v4393_v63  ;;  %v1910_v30 = vpop.permute.xlu1 %1909 }
 0x597   : > { %3790 = vmatpush1.bf16.msra.mxu0 %v3789_v0  ;;  %3814 = vmatpush1.bf16.msra.mxu1 %v3813_v46  ;;  %v1841_v40 = vsel %vm311_vm10, %v4422_v60, %v4392_v3  ;;  %v7639_v16 = vunpack.i.l.bf16 %v7637_v62  ;;  %v3815_v45 = vpack.c.bf16 %v2126_v39, %v2258_v4  ;;  %v2124_v28 = vsel %vm510_vm9, %v2113_v53, %v2123_v10  ;;  %v7642_v39 = vld [vmem:[#allocation27_spill] sm:$0xff]  ;;  %v7645_v62 = vld [vmem:[#allocation26_spill] sm:$0xff] }
 0x598   : > { %v1844_v25 = vsel %vm311_vm10, %v7638_v49, %v4423_v41  ;;  %v2257_v56 = vsel %vm510_vm9, %v7640_v50, %v2113_v53  ;;  %v2174_v22 = vsel %vm517_vm12, %v2162_v20, %v2173_v38  ;;  %v2264_v63 = vsel %vm517_vm12, %v2125_v35, %v2162_v20 }
 0x599   : > { %v1843_v44 = vsel %vm311_vm10, %v7639_v16, %v4422_v60  ;;  %v4428_v3 = vunpack.i.h.bf16 %v4426_v43  ;;  %v2111_v61 = vrot.slane %v1807_v52, 1  ;;  %3816 = vmatprep.subr.bf16.mxu1 %v3815_v45  ;;  %v3817_v1 = vpack.c.bf16 %v2124_v28, %v2257_v56 }
 0x59a   : > { %v2270_v34 = vsel %vm524_vm13, %v2174_v22, %v2204_v8  ;;  %v4427_v15 = vunpack.i.l.bf16 %v4426_v43  ;;  %v4432_v41 = vunpack.i.l.bf16 %v6665_v14  ;;  %v2167_v0 = vrot.slane %v1844_v25, 6  ;;  %v7644_v43 = vld [vmem:[#allocation25_spill] sm:$0xff]  ;;  %v1900_v28 = vpop.permute.xlu1 %1899 }
 0x59b   : > { %v2169_v46 = vrot.slane %v1842_v11, 6  ;;  %v3819_v53 = vpack.c.bf16 %v2270_v34, %v2264_v63  ;;  %v2159_v60 = vrot.slane %v1843_v44, 6  ;;  %v2160_v5 = vrot.slane %v1841_v40, 6  ;;  %3818 = vmatpush1.bf16.msra.mxu1 %v3817_v1  ;;  %v1902_v34 = vpop.permute.xlu0 %1901 }
 0x59c   : > { %v1877_v38 = vsel %vm330_vm11, %v4427_v15, %v4413_v9  ;;  %v1878_v20 = vsel %vm330_vm11, %v4428_v3, %v4418_v47  ;;  %v7641_v35 = vunpack.i.l.bf16 %v7623_v32  ;;  %v7643_v26 = vunpack.i.h.bf16 %v7642_v39  ;;  %v7656_v39 = vld [vmem:[#allocation6_spill] sm:$0xff] }
 0x59d   : > { %3820 = vmatprep.subr.bf16.mxu1 %v3819_v53  ;;  %v2122_v33 = vsel %vm510_vm9, %v2112_v23, %v2121_v51  ;;  %v2256_v9 = vsel %vm510_vm9, %v7644_v43, %v2112_v23  ;;  %v2120_v47 = vsel %vm510_vm9, %v2111_v61, %v2119_v18  ;;  %v2255_v32 = vsel %vm510_vm9, %v7645_v62, %v2111_v61  ;;  %v7659_v62 = vld [vmem:[#allocation3_spill] sm:$0xff] }
 0x59e   : > { %v1880_v52 = vsel %vm330_vm11, %v7641_v35, %v4428_v3  ;;  %v1879_v4 = vsel %vm330_vm11, %v7643_v26, %v4427_v15  ;;  %v3791_v42 = vpack.c.bf16 %v2122_v33, %v2256_v9  ;;  %v2172_v49 = vsel %vm517_vm12, %v2161_v48, %v2171_v29  ;;  %v2275_v53 = vpop.permute.xlu1 %2274 }
 0x59f   : > { %v2202_v25 = vrot.slane %v1877_v38, 3  ;;  %v2211_v11 = vrot.slane %v1878_v20, 3  ;;  %v3793_v40 = vpack.c.bf16 %v2120_v47, %v2255_v32  ;;  %v2263_v23 = vsel %vm517_vm12, %v2123_v10, %v2161_v48 }
 0x5a0   : > { %v2201_v16 = vrot.slane %v1879_v4, 3  ;;  %3792 = vmatprep.subr.bf16.mxu0 %v3791_v42  ;;  %v2269_v44 = vsel %vm524_vm13, %v2172_v49, %v2203_v58  ;;  %vm7647_vm8 = vcmp.lt.s32.totalorder %v4755_v17, 109  ;;  %v2216_v59 = vsel %vm524_vm13, %v2204_v8, %v2215_v57  ;;  %v7657_v4 = vld [vmem:[#allocation7_spill] sm:$0xff]  ;;  %v7658_v42 = vld [vmem:[#allocation2_spill] sm:$0xff] }
 0x5a1   : > { %v1921_v45 = vsel %vm7647_vm8, %v4432_v41, %v7646_v7  ;;  %vm7648_vm9 = vmmov %vm7647_vm8  ;;  %3794 = vmatpush1.bf16.msra.mxu0 %v3793_v40  ;;  %v3821_v37 = vpack.c.bf16 %v2269_v44, %v2263_v23  ;;  %v2214_v48 = vsel %vm524_vm13, %v2203_v58, %v2213_v13  ;;  %v2209_v10 = vrot.slane %v1880_v52, 3 }
 0x5a2   : > { %v1911_v29 = vsel %vm7648_vm9, %v4433_v19, %v4432_v41  ;;  %v3823_v50 = vpack.c.bf16 %v1921_v45, %v2216_v59  ;;  %v2170_v56 = vsel %vm517_vm12, %v2160_v5, %v2169_v46  ;;  %v2212_v22 = vsel %vm524_vm13, %v2202_v25, %v2211_v11  ;;  %vm7649_vm14 = vmmov %vm7647_vm8  ;;  %v7661_v45 = vld [vmem:[#allocation5_spill] sm:$0xff] }
 0x5a3   : > { %3822 = vmatpush1.bf16.msra.mxu1 %v3821_v37  ;;  %v2262_v6 = vsel %vm517_vm12, %v2121_v51, %v2160_v5  ;;  %v2268_v36 = vsel %vm524_vm13, %v2170_v56, %v2202_v25  ;;  %v2168_v8 = vsel %vm517_vm12, %v2159_v60, %v2167_v0  ;;  %v2261_v31 = vsel %vm517_vm12, %v2119_v18, %v2159_v60  ;;  %vm7650_vm0 = vmmov %vm7647_vm8 }
 0x5a4   : > { %3824 = vmatprep.subr.bf16.mxu1 %v3823_v50  ;;  %v3795_v57 = vpack.c.bf16 %v2268_v36, %v2262_v6  ;;  %v2267_v58 = vsel %vm524_vm13, %v2168_v8, %v2201_v16  ;;  %v3825_v13 = vpack.c.bf16 %v1911_v29, %v2214_v48  ;;  %v1913_v63 = vsel %vm7649_vm14, %v1900_v28, %v4433_v19  ;;  %vm7652_vm12 = vmmov %vm7650_vm0  ;;  %v6895_v48 = vld [vmem:[%s7406_s2 + $0x1b] sm:$0xff] }
 0x5a5   : > { %v3797_v51 = vpack.c.bf16 %v2267_v58, %v2261_v31  ;;  %v2210_v3 = vsel %vm524_vm13, %v2201_v16, %v2209_v10  ;;  %v3799_v61 = vpack.c.bf16 %v1913_v63, %v2212_v22  ;;  %v1922_v1 = vsel %vm7650_vm0, %v1910_v30, %v6293_v24  ;;  %vm7653_vm15 = vmmov %vm7650_vm0  ;;  %v7660_v16 = vld [vmem:[#allocation4_spill] sm:$0xff] }
 0x5a6   : > { %3796 = vmatprep.subr.bf16.mxu0 %v3795_v57  ;;  %v7651_v27 = vunpack.i.h.bf16 %v6057_v2  ;;  %v1912_v19 = vsel %vm7653_vm15, %v1906_v12, %v1910_v30  ;;  %vm7654_vm13 = vmmov %vm7650_vm0 }
 0x5a7   : > { %3826 = vmatpush1.bf16.msra.mxu1 %v3825_v13  ;;  %3798 = vmatpush1.bf16.msra.mxu0 %v3797_v51  ;;  %v1914_v15 = vsel %vm7654_vm13, %v1902_v34, %v1906_v12  ;;  %vm7655_vm3 = vmmov %vm7650_vm0 }
 0x5a8   : > { %v1915_v18 = vsel %vm7652_vm12, %v7651_v27, %v1900_v28  ;;  %3609 = vmatprep.subr.msk.mxu1 %vm482_vm6, %v1922_v1  ;;  %3800 = vmatprep.subr.bf16.mxu0 %v3799_v61  ;;  %v1916_v2 = vsel %vm7655_vm3, %v6237_v21, %v1902_v34  ;;  %vm7667_vm15 = vmmov %vm7650_vm0  ;;  %vm7669_vm3 = vcmask 588800  }
 0x5a9   : > { %v3801_v14 = vpack.c.bf16 %v1915_v18, %v2210_v3 }
 0x5ab   : > { %3610 = vmatpush1.msk.msra.mxu1 %vm482_vm6, %v1912_v19  ;;  %3802 = vmatpush1.bf16.msra.mxu0 %v3801_v14 }
 0x5ac   : > { %3606 = vmatprep.subr.msk.mxu0 %vm482_vm6, %v1914_v15  ;;  %3611 = vmatmul.mubr.msk.f32.vlgmr.msra.gmra.mrb[10].mxu1 %vm2277_vm7, %v5880_v54 }
 0x5ad   : > { %2881 = vmatprep.mubr.f32.mxu1 %v7609_v55 }
 0x5af   : > { %3607 = vmatpush1.msk.msra.mxu0 %vm482_vm6, %v1916_v2 }
 0x5b0   : > { %3608 = vmatmul.mubr.msk.f32.vlgmr.msra.gmra.mrb[10].mxu0 %vm2277_vm7, %v5880_v54  ;;  %vm7662_vm7 = vcmp.lt.s32.totalorder %v4755_v17, 1 }
 0x5b1   : > { %2739 = vmatprep.mubr.f32.mxu0 %v7609_v55  ;;  %vm7663_vm8 = vmmov %vm7662_vm7 }
 0x5b2   : > { %vm7664_vm9 = vmmov %vm7662_vm7 }
 0x5b3   : > { %vm7665_vm14 = vmmov %vm7662_vm7 }
 0x5b4   : > { %vm7666_vm12 = vmmov %vm7662_vm7 }
 0x5b5   : > { %vm7668_vm13 = vmmov %vm7662_vm7 }
 0x64d   : > { %v2364_v24 = vpop.f32.mrb[8].mxu1 }
 0x64e   : > { %v2366_v41 = vpop.f32.mrb[9].mxu1  ;;  %v2365_v35 = vadd.f32 %v2364_v24, %v2275_v53 }
 0x64f   : > { %v2367_v52 = vadd.f32 %v2366_v41, %v2275_v53 }
 0x650   : > { %v2511_v33 = vmax.f32 %v2365_v35, 0.0 }
 0x651   : > { %v2512_v43 = vmax.f32 %v2367_v52, 0.0 }
 0x652   : > { %v6833_v47 = vmul.f32 %v2511_v33, %v7658_v42 }
 0x653   : > { %v6836_v32 = vmul.f32 %v2512_v43, %v7659_v62 }
 0x655   : > { %v4450_v25 = vpack.i.bf16 %v6836_v32, %v6833_v47 }
 0x67f   : > { %v2506_v0 = vpop.f32.mrb[10].mxu1 }
 0x680   : > { %v2508_v46 = vpop.f32.mrb[11].mxu1  ;;  %v2507_v49 = vadd.f32 %v2506_v0, %v2275_v53 }
 0x681   : > { %v2509_v11 = vadd.f32 %v2508_v46, %v2275_v53 }
 0x682   : > { %v2515_v40 = vmax.f32 %v2507_v49, 0.0 }
 0x683   : > { %v2435_v60 = vpop.f32.mrb[10].mxu0  ;;  %v2516_v23 = vmax.f32 %v2509_v11, 0.0 }
 0x684   : > { %v2436_v5 = vadd.f32 %v2435_v60, %v2275_v53  ;;  %v2437_v30 = vpop.f32.mrb[11].mxu0  ;;  %v6848_v44 = vmul.f32 %v2515_v40, %v7660_v16 }
 0x685   : > { %v2438_v38 = vadd.f32 %v2437_v30, %v2275_v53  ;;  %v6853_v29 = vmul.f32 %v2516_v23, %v7661_v45 }
 0x686   : > { %v2513_v20 = vmax.f32 %v2436_v5, 0.0 }
 0x687   : > { %v2514_v21 = vmax.f32 %v2438_v38, 0.0  ;;  %v4490_v37 = vpack.i.bf16 %v6848_v44, %v6853_v29  ;;  %v4505_v59 = vpack.i.bf16 %v6853_v29, %v6833_v47 }
 0x688   : > { %v6823_v26 = vmul.f32 %v2513_v20, %v7656_v39 }
 0x689   : > { %v6826_v54 = vmul.f32 %v2514_v21, %v7657_v4 }
 0x68a   : > { %v4470_v7 = vpack.i.bf16 %v6823_v26, %v6836_v32 }
 0x68b   : > { %v4440_v9 = vpack.i.bf16 %v6823_v26, %v6826_v54 }
 0x68d   : > { %4441 = vrot.lane.b32.xlu1 %v4440_v9, %s4625_s18  ;;  %4436 = vrot.lane.b32.xlu0 %v4440_v9, %s4628_s21 }
 0x691   : > { %4446 = vrot.lane.b32.xlu0 %v4440_v9, %s4626_s19  ;;  %2631 = vrot.lane.b32.xlu1 %v6833_v47, %s4631_s24 }
 0x695   : > { %4451 = vrot.lane.b32.xlu0 %v4450_v25, %s4628_s21  ;;  %4456 = vrot.lane.b32.xlu1 %v4450_v25, %s4625_s18 }
 0x699   : > { %4461 = vrot.lane.b32.xlu0 %v4450_v25, %s4626_s19  ;;  %4466 = vrot.lane.b32.xlu1 %v4450_v25, %s4627_s20 }
 0x69d   : > { %4471 = vrot.lane.b32.xlu0 %v4470_v7, %s4629_s22  ;;  %4481 = vrot.lane.b32.xlu1 %v4470_v7, %s4631_s24 }
 0x6a1   : > { %4476 = vrot.lane.b32.xlu0 %v4470_v7, %s4630_s23  ;;  %4491 = vrot.lane.b32.xlu1 %v4490_v37, %s4625_s18 }
 0x6a5   : > { %4486 = vrot.lane.b32.xlu0 %v4490_v37, %s4628_s21  ;;  %4501 = vrot.lane.b32.xlu1 %v4490_v37, %s4627_s20 }
 0x6a9   : > { %4496 = vrot.lane.b32.xlu0 %v4490_v37, %s4626_s19  ;;  %4506 = vrot.lane.b32.xlu1 %v4505_v59, %s4629_s22 }
 0x6ad   : > { %2651 = vrot.lane.b32.xlu0 %v6836_v32, %s4633_s25  ;;  %4511 = vrot.lane.b32.xlu1 %v4440_v9, %s4627_s20 }
 0x6b1   : > { %4516 = vrot.lane.b32.xlu0 %v4505_v59, %s4630_s23  ;;  %2653 = vrot.lane.b32.xlu1 %v6823_v26, %s4633_s25 }
 0x6b5   : > { %2603 = vrot.lane.b32.xlu0 %v6848_v44, %s4629_s22  ;;  %2649 = vrot.lane.b32.xlu1 %v6833_v47, %s4633_s25 }
 0x6b9   : > { %2601 = vrot.lane.b32.xlu0 %v6826_v54, %s4629_s22  ;;  %2621 = vrot.lane.b32.xlu1 %v6848_v44, %s4630_s23 }
 0x6bd   : > { %4521 = vrot.lane.b32.xlu0 %v4490_v37, %s4631_s24  ;;  %2659 = vrot.lane.b32.xlu1 %v6853_v29, %s4633_s25 }
 0x6c1   : > { %2657 = vrot.lane.b32.xlu0 %v6848_v44, %s4633_s25  ;;  %2619 = vrot.lane.b32.xlu1 %v6826_v54, %s4630_s23 }
 0x6c5   : > { %2637 = vrot.lane.b32.xlu0 %v6826_v54, %s4631_s24  ;;  %2655 = vrot.lane.b32.xlu1 %v6826_v54, %s4633_s25 }
 0x6c9   : > { %2670 = vperm.xlu0 %4133, %v6895_v48  }
 0x6ff   : > { %v6898_v10 = vpop.permute.xlu1 %4441  ;;  %v6900_v28 = vpop.permute.xlu0 %4436 }
 0x700   : > { %v4443_v24 = vunpack.i.l.bf16 %v6898_v10  ;;  %v4438_v41 = vunpack.i.l.bf16 %v6900_v28 }
 0x703   : > { %v6902_v50 = vpop.permute.xlu0 %4446  ;;  %v6904_v56 = vpop.permute.xlu1 %2631 }
 0x707   : > { %v6906_v22 = vpop.permute.xlu0 %4451  ;;  %v6908_v6 = vpop.permute.xlu1 %4456 }
 0x708   : > { %v4454_v36 = vunpack.i.h.bf16 %v6906_v22  ;;  %v4453_v8 = vunpack.i.l.bf16 %v6906_v22  ;;  %v4459_v12 = vunpack.i.h.bf16 %v6908_v6  ;;  %v4458_v57 = vunpack.i.l.bf16 %v6908_v6 }
 0x70a   : > { %v2539_v31 = vsel %vm216_vm4, %v4453_v8, %v4454_v36  ;;  %v2557_v58 = vsel %vm235_vm2, %v4458_v57, %v4459_v12 }
 0x70b   : > { %v6922_v13 = vpop.permute.xlu0 %4461  ;;  %v6924_v63 = vpop.permute.xlu1 %4466  ;;  %v3827_v51 = vpack.c.bf16 %v2557_v58, %v2539_v31 }
 0x70c   : > { %v4464_v1 = vunpack.i.h.bf16 %v6922_v13  ;;  %v4463_v27 = vunpack.i.l.bf16 %v6922_v13  ;;  %v4469_v19 = vunpack.i.h.bf16 %v6924_v63  ;;  %v4468_v34 = vunpack.i.l.bf16 %v6924_v63 }
 0x70d   : > { %3828 = vmatprep.subr.bf16.mxu0 %v3827_v51 }
 0x70e   : > { %v2575_v53 = vsel %vm254_vm1, %v4463_v27, %v4464_v1  ;;  %v2593_v38 = vsel %vm7662_vm7, %v4468_v34, %v4469_v19  ;;  %vm7670_vm7 = vmmov %vm7650_vm0 }
 0x70f   : > { %v6926_v3 = vpop.permute.xlu0 %4471  ;;  %v6928_v61 = vpop.permute.xlu1 %4481  ;;  %v3831_v58 = vpack.c.bf16 %v2593_v38, %v2575_v53 }
 0x710   : > { %v4474_v60 = vunpack.i.h.bf16 %v6926_v3  ;;  %v4473_v20 = vunpack.i.l.bf16 %v6926_v3 }
 0x713   : > { %v6932_v18 = vpop.permute.xlu0 %4476  ;;  %v4492_v14 = vpop.permute.xlu1 %4491 }
 0x714   : > { %v4494_v15 = vunpack.i.h.bf16 %v4492_v14  ;;  %v4493_v2 = vunpack.i.l.bf16 %v4492_v14  ;;  %v4479_v51 = vunpack.i.h.bf16 %v6932_v18  ;;  %v4478_v14 = vunpack.i.l.bf16 %v6932_v18 }
 0x716   : > { %v2554_v35 = vsel %vm235_vm2, %v4443_v24, %v4494_v15  ;;  %v2558_v52 = vsel %vm235_vm2, %v4493_v2, %v4458_v57  ;;  %v2553_v21 = vsel %vm235_vm2, %v4494_v15, %v4493_v2  ;;  %v4448_v2 = vunpack.i.l.bf16 %v6902_v50 }
 0x717   : > { %v4487_v0 = vpop.permute.xlu0 %4486  ;;  %v4502_v46 = vpop.permute.xlu1 %4501 }
 0x718   : > { %v4489_v5 = vunpack.i.h.bf16 %v4487_v0  ;;  %v4488_v30 = vunpack.i.l.bf16 %v4487_v0  ;;  %v4503_v9 = vunpack.i.l.bf16 %v4502_v46  ;;  %v4504_v40 = vunpack.i.h.bf16 %v4502_v46 }
 0x719   : > { %v4484_v0 = vunpack.i.h.bf16 %v6928_v61 }
 0x71a   : > { %v2536_v33 = vsel %vm216_vm4, %v4438_v41, %v4489_v5  ;;  %v2540_v43 = vsel %vm216_vm4, %v4488_v30, %v4453_v8  ;;  %v2535_v49 = vsel %vm216_vm4, %v4489_v5, %v4488_v30  ;;  %v2610_v8 = vsel %vm292_vm5, %v4473_v20, %v4474_v60 }
 0x71b   : > { %v3829_v25 = vpack.c.bf16 %v2558_v52, %v2540_v43  ;;  %v3861_v11 = vpack.c.bf16 %v2554_v35, %v2536_v33  ;;  %v4497_v23 = vpop.permute.xlu0 %4496  ;;  %v4507_v7 = vpop.permute.xlu1 %4506  ;;  %v3859_v37 = vpack.c.bf16 %v2553_v21, %v2535_v49  ;;  %v2594_v46 = vsel %vm7663_vm8, %v4503_v9, %v4468_v34  ;;  %vm7671_vm8 = vmmov %vm7650_vm0 }
 0x71c   : > { %v4499_v59 = vunpack.i.h.bf16 %v4497_v23  ;;  %v4498_v57 = vunpack.i.l.bf16 %v4497_v23  ;;  %v4508_v31 = vunpack.i.l.bf16 %v4507_v7  ;;  %v4509_v15 = vunpack.i.h.bf16 %v4507_v7 }
 0x71d   : > { %3830 = vmatpush1.bf16.msra.mxu0 %v3829_v25  ;;  %3860 = vmatprep.subr.bf16.mxu1 %v3859_v37  ;;  %v4483_v5 = vunpack.i.l.bf16 %v6928_v61  ;;  %v2589_v21 = vsel %vm7664_vm9, %v4504_v40, %v4503_v9  ;;  %v2628_v49 = vsel %vm311_vm10, %v4478_v14, %v4479_v51  ;;  %vm7672_vm9 = vmmov %vm7669_vm3 }
 0x71e   : > { %v2576_v53 = vsel %vm254_vm1, %v4498_v57, %v4463_v27  ;;  %3832 = vmatprep.subr.bf16.mxu0 %v3831_v58  ;;  %3862 = vmatpush1.bf16.msra.mxu1 %v3861_v11  ;;  %v2571_v52 = vsel %vm254_vm1, %v4499_v59, %v4498_v57  ;;  %v2611_v33 = vsel %vm292_vm5, %v4508_v31, %v4473_v20  ;;  %v4439_v57 = vunpack.i.h.bf16 %v6900_v28 }
 0x71f   : > { %v3833_v30 = vpack.c.bf16 %v2594_v46, %v2576_v53  ;;  %v2652_v38 = vpop.permute.xlu0 %2651  ;;  %v4512_v35 = vpop.permute.xlu1 %4511  ;;  %v3863_v43 = vpack.c.bf16 %v2589_v21, %v2571_v52  ;;  %v3835_v27 = vpack.c.bf16 %v2610_v8, %v6836_v32  ;;  %v2612_v25 = vsel %vm292_vm5, %v4509_v15, %v4508_v31 }
 0x720   : > { %v4513_v34 = vunpack.i.l.bf16 %v4512_v35  ;;  %v2572_v9 = vsel %vm254_vm1, %v4448_v2, %v4499_v59  ;;  %v3837_v32 = vpack.c.bf16 %v2611_v33, %v6833_v47  ;;  %v2646_v37 = vsel %vm330_vm11, %v4483_v5, %v4484_v0 }
 0x721   : > { %3834 = vmatpush1.bf16.msra.mxu0 %v3833_v30  ;;  %3864 = vmatprep.subr.bf16.mxu1 %v3863_v43  ;;  %v3839_v59 = vpack.c.bf16 %v2646_v37, %v2628_v49  ;;  %v3867_v58 = vpack.c.bf16 %v2612_v25, %v6853_v29  ;;  %v2647_v47 = vsel %vm330_vm11, %v6904_v56, %v4483_v5  ;;  %v4514_v46 = vunpack.i.h.bf16 %v4512_v35 }
 0x722   : > { %v2590_v20 = vsel %vm7665_vm14, %v4513_v34, %v4504_v40  ;;  %3836 = vmatprep.subr.bf16.mxu0 %v3835_v27  ;;  %v4444_v40 = vunpack.i.h.bf16 %v6898_v10  ;;  %v2537_v21 = vsel %vm216_vm4, %v4439_v57, %v4438_v41  ;;  %v4449_v33 = vunpack.i.h.bf16 %v6902_v50  ;;  %vm7673_vm14 = vmmov %vm7650_vm0 }
 0x723   : > { %v3865_v11 = vpack.c.bf16 %v2590_v20, %v2572_v9  ;;  %v4517_v23 = vpop.permute.xlu0 %4516  ;;  %v6997_v7 = vpop.permute.xlu1 %2653  ;;  %v2538_v28 = vsel %vm216_vm4, %v4454_v36, %v4439_v57  ;;  %v2591_v10 = vsel %vm7666_vm12, %v4514_v46, %v4513_v34  ;;  %v2592_v36 = vsel %vm7668_vm13, %v4469_v19, %v4514_v46  ;;  %vm7674_vm12 = vmmov %vm7669_vm3 }
 0x724   : > { %v4518_v31 = vunpack.i.l.bf16 %v4517_v23  ;;  %v2555_v35 = vsel %vm235_vm2, %v4444_v40, %v4443_v24  ;;  %v4519_v27 = vunpack.i.h.bf16 %v4517_v23  ;;  %v2573_v6 = vsel %vm254_vm1, %v4449_v33, %v4448_v2 }
 0x725   : > { %3838 = vmatpush1.bf16.msra.mxu0 %v3837_v32  ;;  %3866 = vmatpush1.bf16.msra.mxu1 %v3865_v11  ;;  %v3843_v43 = vpack.c.bf16 %v2555_v35, %v2537_v21  ;;  %v2574_v50 = vsel %vm254_vm1, %v4464_v1, %v4449_v33 }
 0x726   : > { %v2629_v8 = vsel %vm311_vm10, %v4518_v31, %v4478_v14  ;;  %3840 = vmatprep.subr.bf16.mxu0 %v3839_v59  ;;  %3868 = vmatprep.subr.bf16.mxu1 %v3867_v58  ;;  %v2664_v14 = vsel %vm7650_vm0, %v2652_v38, %v6997_v7  ;;  %v3849_v2 = vpack.c.bf16 %v2592_v36, %v2574_v50 }
 0x727   : > { %v3841_v53 = vpack.c.bf16 %v2647_v47, %v2629_v8  ;;  %v2604_v30 = vpop.permute.xlu0 %2603  ;;  %v2650_v52 = vpop.permute.xlu1 %2649  ;;  %v2630_v9 = vsel %vm311_vm10, %v4519_v27, %v4518_v31 }
 0x728   : > { %v2607_v29 = vsel %vm292_vm5, %v2604_v30, %v4509_v15  ;;  %v2665_v24 = vsel %vm7667_vm15, %v2650_v52, %v2652_v38  ;;  %vm7675_vm15 = vmmov %vm7668_vm13 }
 0x729   : > { %v3869_v5 = vpack.c.bf16 %v2607_v29, %v6848_v44  ;;  %3842 = vmatpush1.bf16.msra.mxu0 %v3841_v53  ;;  %v2556_v44 = vsel %vm235_vm2, %v4459_v12, %v4444_v40  ;;  %v3847_v12 = vpack.c.bf16 %v2591_v10, %v2573_v6 }
 0x72a   : > { %2691 = vmatprep.subr.mxu0 %v2664_v14  ;;  %v3845_v22 = vpack.c.bf16 %v2556_v44, %v2538_v28 }
 0x72b   : > { %v2602_v41 = vpop.permute.xlu0 %2601  ;;  %v2622_v15 = vpop.permute.xlu1 %2621  ;;  %3870 = vmatpush1.bf16.msra.mxu1 %v3869_v5 }
 0x72c   : > { %v2608_v38 = vsel %vm292_vm5, %v2602_v41, %v2604_v30  ;;  %v2609_v25 = vsel %vm292_vm5, %v4474_v60, %v2602_v41  ;;  %v2625_v13 = vsel %vm311_vm10, %v2622_v15, %v4519_v27 }
 0x72d   : > { %2692 = vmatpush1.msra.mxu0 %v2665_v24  ;;  %v3851_v20 = vpack.c.bf16 %v2608_v38, %v6826_v54  ;;  %v3853_v37 = vpack.c.bf16 %v2609_v25, %v6823_v26 }
 0x72e   : > { %3612 = vmatmul.mubr.msk.f32.vlgmr.msra.gmra.mrb[12].mxu0 %vm7669_vm3, %v6895_v48  ;;  %3844 = vmatprep.subr.bf16.mxu0 %v3843_v43  ;;  %vm7676_vm3 = vmmov %vm7650_vm0 }
 0x72f   : > { %v4522_v34 = vpop.permute.xlu0 %4521  ;;  %v2660_v49 = vpop.permute.xlu1 %2659  ;;  %3846 = vmatpush1.bf16.msra.mxu0 %v3845_v22  ;;  %2810 = vmatprep.mubr.f32.mxu0 %v7609_v55 }
 0x730   : > { %v4524_v63 = vunpack.i.h.bf16 %v4522_v34  ;;  %v4523_v19 = vunpack.i.l.bf16 %v4522_v34  ;;  %3848 = vmatprep.subr.bf16.mxu0 %v3847_v12  ;;  %v2666_v54 = vsel %vm7670_vm7, %v2660_v49, %v2650_v52  ;;  %vm7677_vm7 = vmmov %vm7650_vm0 }
 0x732   : > { %v2643_v1 = vsel %vm330_vm11, %v4524_v63, %v4523_v19  ;;  %v2648_v32 = vsel %vm330_vm11, %v4523_v19, %v6904_v56 }
 0x733   : > { %v3873_v11 = vpack.c.bf16 %v2643_v1, %v2625_v13  ;;  %v2658_v3 = vpop.permute.xlu0 %2657  ;;  %v2620_v23 = vpop.permute.xlu1 %2619  ;;  %3850 = vmatpush1.bf16.msra.mxu0 %v3849_v2  ;;  %v3871_v60 = vpack.c.bf16 %v2648_v32, %v2630_v9 }
 0x734   : > { %3852 = vmatprep.subr.bf16.mxu0 %v3851_v20  ;;  %v2626_v31 = vsel %vm311_vm10, %v2620_v23, %v2622_v15  ;;  %v2627_v56 = vsel %vm311_vm10, %v4479_v51, %v2620_v23  ;;  %v2661_v58 = vsel %vm7671_vm8, %v2658_v3, %v2660_v49  ;;  %vm7680_vm8 = vmmov %vm7672_vm9 }
 0x735   : > { %3872 = vmatprep.subr.bf16.mxu1 %v3871_v60 }
 0x736   : > { %3874 = vmatpush1.bf16.msra.mxu1 %v3873_v11 }
 0x737   : > { %v2638_v57 = vpop.permute.xlu0 %2637  ;;  %3854 = vmatpush1.bf16.msra.mxu0 %v3853_v37  ;;  %2833 = vmatprep.subr.mxu1 %v2666_v54  ;;  %v2656_v8 = vpop.permute.xlu1 %2655 }
 0x738   : > { %v2644_v59 = vsel %vm330_vm11, %v2638_v57, %v4524_v63  ;;  %v2645_v26 = vsel %vm330_vm11, %v4484_v0, %v2638_v57  ;;  %v2662_v18 = vsel %vm7673_vm14, %v2656_v8, %v2658_v3  ;;  %v2663_v61 = vsel %vm7650_vm0, %v6997_v7, %v2656_v8 }
 0x739   : > { %v3855_v40 = vpack.c.bf16 %v2644_v59, %v2626_v31  ;;  %v3857_v47 = vpack.c.bf16 %v2645_v26, %v2627_v56 }
 0x73a   : > { %2834 = vmatpush1.msra.mxu1 %v2661_v58 }
 0x73b   : > { %3856 = vmatprep.subr.bf16.mxu0 %v3855_v40  ;;  %3614 = vmatmul.mubr.msk.f32.vlgmr.msra.gmra.mrb[12].mxu1 %vm7672_vm9, %v6895_v48 }
 0x73c   : > { %3858 = vmatpush1.bf16.msra.mxu0 %v3857_v47  ;;  %3187 = vmatprep.mubr.f32.mxu1 %v7609_v55 }
 0x73d   : > { %2762 = vmatprep.subr.mxu0 %v2662_v18 }
 0x740   : > { %2763 = vmatpush1.msra.mxu0 %v2663_v61 }
 0x741   : > { %3613 = vmatmul.mubr.msk.f32.vlgmr.msra.gmra.mrb[14].mxu0 %vm7674_vm12, %v6895_v48  ;;  %vm7687_vm12 = vmmov %vm7680_vm8 }
 0x742   : > { %3116 = vmatprep.mubr.f32.mxu0 %v7609_v55 }
 0x748   : > { %v2671_v51 = vpop.permute.xlu0 %2670 }
 0x801   : > { %v2741_v0 = vpop.f32.mrb[12].mxu0 }
 0x802   : > { %v2742_v46 = vadd.f32 %v2741_v0, %v2671_v51  ;;  %v2743_v53 = vpop.f32.mrb[13].mxu0 }
 0x803   : > { %v2744_v30 = vadd.f32 %v2743_v53, %v2671_v51 }
 0x804   : > { %v2888_v52 = vmax.f32 %v2742_v46, 0.0 }
 0x805   : > { %v2889_v21 = vmax.f32 %v2744_v30, 0.0 }
 0x806   : > { %v7098_v29 = vmul.f32 %v2888_v52, %v7658_v42 }
 0x807   : > { %v7105_v48 = vmul.f32 %v2889_v21, %v7659_v62 }
 0x808   : > { %2990 = vrot.lane.b32.xlu1 %v7098_v29, %s4630_s23  ;;  %2972 = vrot.lane.b32.xlu0 %v7098_v29, %s4629_s22 }
 0x809   : > { %v4525_v42 = vpack.i.bf16 %v7105_v48, %v7098_v29 }
 0x80c   : > { %3026 = vrot.lane.b32.xlu1 %v7098_v29, %s4633_s25  ;;  %3008 = vrot.lane.b32.xlu0 %v7098_v29, %s4631_s24 }
 0x80e   : > { %v2883_v7 = vpop.f32.mrb[12].mxu1 }
 0x80f   : > { %v2885_v33 = vpop.f32.mrb[13].mxu1  ;;  %v2884_v43 = vadd.f32 %v2883_v7, %v2671_v51 }
 0x810   : > { %4526 = vrot.lane.b32.xlu1 %v4525_v42, %s4628_s21  ;;  %4531 = vrot.lane.b32.xlu0 %v4525_v42, %s4625_s18  ;;  %v2886_v5 = vadd.f32 %v2885_v33, %v2671_v51 }
 0x811   : > { %v2892_v27 = vmax.f32 %v2884_v43, 0.0 }
 0x812   : > { %v2893_v62 = vmax.f32 %v2886_v5, 0.0 }
 0x813   : > { %v7139_v6 = vmul.f32 %v2892_v27, %v7660_v16 }
 0x814   : > { %v2812_v14 = vpop.f32.mrb[14].mxu0  ;;  %4536 = vrot.lane.b32.xlu1 %v4525_v42, %s4626_s19  ;;  %4541 = vrot.lane.b32.xlu0 %v4525_v42, %s4627_s20  ;;  %v7120_v41 = vmul.f32 %v2893_v62, %v7661_v45 }
 0x815   : > { %v2813_v35 = vadd.f32 %v2812_v14, %v2671_v51  ;;  %v2814_v28 = vpop.f32.mrb[15].mxu0 }
 0x816   : > { %v2815_v24 = vadd.f32 %v2814_v28, %v2671_v51 }
 0x817   : > { %v2890_v44 = vmax.f32 %v2813_v35, 0.0 }
 0x818   : > { %3028 = vrot.lane.b32.xlu1 %v7105_v48, %s4633_s25  ;;  %v2891_v22 = vmax.f32 %v2815_v24, 0.0 }
 0x819   : > { %v7123_v15 = vmul.f32 %v2890_v44, %v7656_v39 }
 0x81a   : > { %v7136_v39 = vmul.f32 %v2891_v22, %v7657_v4  ;;  %v7166_v4 = vld [vmem:[%s7406_s2 + $0x23] sm:$0x7] }
 0x81b   : > { %v4545_v10 = vpack.i.bf16 %v7123_v15, %v7120_v41  ;;  %v4565_v45 = vpack.i.bf16 %v7123_v15, %v7105_v48 }
 0x81c   : > { %v4580_v36 = vpack.i.bf16 %v7139_v6, %v7136_v39 }
 0x81d   : > { %4546 = vrot.lane.b32.xlu1 %v4545_v10, %s4628_s21  ;;  %4551 = vrot.lane.b32.xlu0 %v4545_v10, %s4625_s18 }
 0x821   : > { %4556 = vrot.lane.b32.xlu1 %v4545_v10, %s4626_s19  ;;  %4561 = vrot.lane.b32.xlu0 %v4545_v10, %s4627_s20 }
 0x825   : > { %4566 = vrot.lane.b32.xlu1 %v4565_v45, %s4629_s22  ;;  %4576 = vrot.lane.b32.xlu0 %v4565_v45, %s4631_s24 }
 0x829   : > { %4571 = vrot.lane.b32.xlu1 %v4565_v45, %s4630_s23  ;;  %3030 = vrot.lane.b32.xlu0 %v7123_v15, %s4633_s25 }
 0x82d   : > { %4581 = vrot.lane.b32.xlu1 %v4580_v36, %s4628_s21  ;;  %4586 = vrot.lane.b32.xlu0 %v4580_v36, %s4625_s18 }
 0x831   : > { %4591 = vrot.lane.b32.xlu1 %v4580_v36, %s4626_s19  ;;  %4596 = vrot.lane.b32.xlu0 %v4580_v36, %s4627_s20  ;;  %s170_s20 = scalar_lea.vmem %s7407_s3, %s3924_s17 }
 0x835   : > { %2982 = vrot.lane.b32.xlu1 %v7120_v41, %s4629_s22  ;;  %4601 = vrot.lane.b32.xlu0 %v4580_v36, %s4629_s22 }
 0x839   : > { %4611 = vrot.lane.b32.xlu1 %v4580_v36, %s4631_s24  ;;  %4606 = vrot.lane.b32.xlu0 %v4580_v36, %s4630_s23 }
 0x83d   : > { %3018 = vrot.lane.b32.xlu1 %v7120_v41, %s4631_s24  ;;  %3000 = vrot.lane.b32.xlu0 %v7120_v41, %s4630_s23 }
 0x841   : > { %3034 = vrot.lane.b32.xlu1 %v7139_v6, %s4633_s25  ;;  %3032 = vrot.lane.b32.xlu0 %v7136_v39, %s4633_s25 }
 0x845   : > { %3036 = vrot.lane.b32.xlu0 %v7120_v41, %s4633_s25  ;;  %3047 = vperm.xlu1 %4615, %v7166_v4  }
 0x87a   : > { %v7171_v16 = vpop.permute.xlu1 %2990  ;;  %v7173_v12 = vpop.permute.xlu0 %2972 }
 0x87e   : > { %v7175_v38 = vpop.permute.xlu1 %3026  ;;  %v7177_v34 = vpop.permute.xlu0 %3008 }
 0x882   : > { %v4527_v49 = vpop.permute.xlu1 %4526  ;;  %v4532_v50 = vpop.permute.xlu0 %4531 }
 0x883   : > { %v4529_v63 = vunpack.i.h.bf16 %v4527_v49  ;;  %v4528_v19 = vunpack.i.l.bf16 %v4527_v49  ;;  %v4534_v2 = vunpack.i.h.bf16 %v4532_v50  ;;  %v4533_v25 = vunpack.i.l.bf16 %v4532_v50 }
 0x885   : > { %v2916_v9 = vsel %vm216_vm4, %v4528_v19, %v4529_v63  ;;  %v2934_v20 = vsel %vm235_vm2, %v4533_v25, %v4534_v2 }
 0x886   : > { %v7183_v13 = vpop.permute.xlu1 %4536  ;;  %v3875_v1 = vpack.c.bf16 %v2934_v20, %v2916_v9  ;;  %v7185_v32 = vpop.permute.xlu0 %4541 }
 0x887   : > { %v4539_v3 = vunpack.i.h.bf16 %v7183_v13  ;;  %v4538_v23 = vunpack.i.l.bf16 %v7183_v13  ;;  %v4544_v60 = vunpack.i.h.bf16 %v7185_v32  ;;  %v4543_v37 = vunpack.i.l.bf16 %v7185_v32 }
 0x888   : > { %3876 = vmatprep.subr.bf16.mxu0 %v3875_v1 }
 0x889   : > { %v2952_v59 = vsel %vm254_vm1, %v4538_v23, %v4539_v3  ;;  %v2970_v26 = vsel %vm7675_vm15, %v4543_v37, %v4544_v60  ;;  %vm3277_vm15 = vcmask 23552  }
 0x88a   : > { %v7187_v11 = vpop.permute.xlu1 %3028  ;;  %v3879_v0 = vpack.c.bf16 %v2970_v26, %v2952_v59 }
 0x88f   : > { %v7193_v54 = vpop.permute.xlu1 %4546  ;;  %v7195_v57 = vpop.permute.xlu0 %4551 }
 0x890   : > { %v4548_v31 = vunpack.i.l.bf16 %v7193_v54  ;;  %v4553_v56 = vunpack.i.l.bf16 %v7195_v57  ;;  %v4549_v33 = vunpack.i.h.bf16 %v7193_v54  ;;  %v4554_v5 = vunpack.i.h.bf16 %v7195_v57 }
 0x892   : > { %v2917_v58 = vsel %vm216_vm4, %v4548_v31, %v4528_v19  ;;  %v2935_v40 = vsel %vm235_vm2, %v4553_v56, %v4533_v25  ;;  %v2915_v27 = vsel %vm216_vm4, %v4529_v63, %v4549_v33  ;;  %v2933_v36 = vsel %vm235_vm2, %v4534_v2, %v4554_v5 }
 0x893   : > { %v3877_v47 = vpack.c.bf16 %v2935_v40, %v2917_v58  ;;  %v7215_v8 = vpop.permute.xlu1 %4556  ;;  %v7217_v18 = vpop.permute.xlu0 %4561 }
 0x894   : > { %v4558_v61 = vunpack.i.l.bf16 %v7215_v8  ;;  %v4563_v51 = vunpack.i.l.bf16 %v7217_v18  ;;  %v4559_v59 = vunpack.i.h.bf16 %v7215_v8  ;;  %v4564_v26 = vunpack.i.h.bf16 %v7217_v18 }
 0x895   : > { %3878 = vmatpush1.bf16.msra.mxu0 %v3877_v47 }
 0x896   : > { %v2953_v46 = vsel %vm254_vm1, %v4558_v61, %v4538_v23  ;;  %v2971_v53 = vsel %vm7668_vm13, %v4563_v51, %v4543_v37  ;;  %3880 = vmatprep.subr.bf16.mxu0 %v3879_v0  ;;  %v3893_v37 = vpack.c.bf16 %v2933_v36, %v2915_v27  ;;  %v2951_v54 = vsel %vm254_vm1, %v4539_v3, %v4559_v59 }
 0x897   : > { %v3881_v30 = vpack.c.bf16 %v2971_v53, %v2953_v46  ;;  %v7229_v52 = vpop.permute.xlu1 %4566  ;;  %v7231_v21 = vpop.permute.xlu0 %4576 }
 0x898   : > { %v4569_v7 = vunpack.i.h.bf16 %v7229_v52  ;;  %v4568_v42 = vunpack.i.l.bf16 %v7229_v52  ;;  %v4579_v62 = vunpack.i.h.bf16 %v7231_v21  ;;  %v4578_v35 = vunpack.i.l.bf16 %v7231_v21 }
 0x899   : > { %3882 = vmatpush1.bf16.msra.mxu0 %v3881_v30 }
 0x89a   : > { %v2988_v14 = vsel %vm292_vm5, %v7173_v12, %v4568_v42  ;;  %v2987_v28 = vsel %vm292_vm5, %v4568_v42, %v4569_v7  ;;  %v3023_v50 = vsel %vm330_vm11, %v4578_v35, %v4579_v62 }
 0x89b   : > { %v3885_v44 = vpack.c.bf16 %v2988_v14, %v7098_v29  ;;  %v7247_v10 = vpop.permute.xlu1 %4571  ;;  %v7249_v24 = vpop.permute.xlu0 %3030  ;;  %v3883_v43 = vpack.c.bf16 %v2987_v28, %v7105_v48  ;;  %v3024_v29 = vsel %vm330_vm11, %v7177_v34, %v4578_v35 }
 0x89c   : > { %v4574_v22 = vunpack.i.h.bf16 %v7247_v10  ;;  %v4573_v45 = vunpack.i.l.bf16 %v7247_v10  ;;  %v3041_v40 = vsel %vm7676_vm3, %v7187_v11, %v7249_v24 }
 0x89d   : > { %3884 = vmatprep.subr.bf16.mxu0 %v3883_v43  ;;  %v3042_v43 = vsel %vm7677_vm7, %v7175_v38, %v7187_v11 }
 0x89e   : > { %v3006_v49 = vsel %vm311_vm10, %v7171_v16, %v4573_v45  ;;  %3886 = vmatpush1.bf16.msra.mxu0 %v3885_v44  ;;  %v3005_v48 = vsel %vm311_vm10, %v4573_v45, %v4574_v22 }
 0x89f   : > { %v3889_v63 = vpack.c.bf16 %v3024_v29, %v3006_v49  ;;  %v4582_v19 = vpop.permute.xlu1 %4581  ;;  %v4587_v2 = vpop.permute.xlu0 %4586  ;;  %v3887_v25 = vpack.c.bf16 %v3023_v50, %v3005_v48 }
 0x8a0   : > { %v4584_v9 = vunpack.i.h.bf16 %v4582_v19  ;;  %v4583_v20 = vunpack.i.l.bf16 %v4582_v19  ;;  %v4589_v1 = vunpack.i.h.bf16 %v4587_v2  ;;  %v4588_v23 = vunpack.i.l.bf16 %v4587_v2 }
 0x8a1   : > { %3888 = vmatprep.subr.bf16.mxu0 %v3887_v25 }
 0x8a2   : > { %v2913_v58 = vsel %vm216_vm4, %v4583_v20, %v4584_v9  ;;  %3890 = vmatpush1.bf16.msra.mxu0 %v3889_v63  ;;  %v2914_v47 = vsel %vm216_vm4, %v4549_v33, %v4583_v20  ;;  %v2932_v0 = vsel %vm235_vm2, %v4554_v5, %v4588_v23  ;;  %v2931_v46 = vsel %vm235_vm2, %v4588_v23, %v4589_v1 }
 0x8a3   : > { %v4592_v53 = vpop.permute.xlu1 %4591  ;;  %v4597_v30 = vpop.permute.xlu0 %4596  ;;  %3068 = vmatprep.subr.mxu0 %v3041_v40  ;;  %v3891_v42 = vpack.c.bf16 %v2932_v0, %v2914_v47  ;;  %v2912_v14 = vsel %vm216_vm4, %v4584_v9, %v4548_v31  ;;  %v2930_v33 = vsel %vm235_vm2, %v4589_v1, %v4553_v56  ;;  %vm7678_vm4 = vmmov %vm7668_vm13  ;;  %v3909_v56 = vpack.c.bf16 %v2931_v46, %v2913_v58 }
 0x8a4   : > { %v4594_v35 = vunpack.i.h.bf16 %v4592_v53  ;;  %v4593_v28 = vunpack.i.l.bf16 %v4592_v53  ;;  %v4599_v5 = vunpack.i.h.bf16 %v4597_v30  ;;  %v4598_v44 = vunpack.i.l.bf16 %v4597_v30  ;;  %vm7679_vm2 = vmmov %vm7678_vm4 }
 0x8a5   : > { %v2969_v57 = vsel %vm7678_vm4, %v4544_v60, %v4564_v26  ;;  %3892 = vmatprep.subr.bf16.mxu1 %v3891_v42  ;;  %v3907_v31 = vpack.c.bf16 %v2930_v33, %v2912_v14  ;;  %vm7681_vm9 = vmmov %vm7679_vm2  ;;  %v4638_v33 = vmov 3  }
 0x8a6   : > { %v2949_v45 = vsel %vm254_vm1, %v4593_v28, %v4594_v35  ;;  %3069 = vmatpush1.msra.mxu0 %v3042_v43  ;;  %3894 = vmatpush1.bf16.msra.mxu1 %v3893_v37  ;;  %v2950_v11 = vsel %vm254_vm1, %v4559_v59, %v4593_v28  ;;  %v2967_v13 = vsel %vm7679_vm2, %v4598_v44, %v4599_v5  ;;  %vm7682_vm14 = vmmov %vm7679_vm2 }
 0x8a7   : > { %v2983_v3 = vpop.permute.xlu1 %2982  ;;  %v4602_v27 = vpop.permute.xlu0 %4601  ;;  %3615 = vmatmul.mubr.msk.f32.vlgmr.msra.gmra.mrb[16].mxu0 %vm7680_vm8, %v7166_v4  ;;  %3908 = vmatprep.subr.bf16.mxu0 %v3907_v31  ;;  %v2968_v32 = vsel %vm7681_vm9, %v4564_v26, %v4598_v44  ;;  %v2948_v60 = vsel %vm254_vm1, %v4594_v35, %v4558_v61  ;;  %v3897_v50 = vpack.c.bf16 %v2969_v57, %v2951_v54  ;;  %vm7683_vm1 = vmmov %vm7650_vm0  ;;  %v7689_v54 = vld [vmem:[#allocation8_spill] sm:$0xff] }
 0x8a8   : > { %v2989_v36 = vsel %vm292_vm5, %v2983_v3, %v7173_v12  ;;  %v4604_v29 = vunpack.i.h.bf16 %v4602_v27  ;;  %v4603_v49 = vunpack.i.l.bf16 %v4602_v27  ;;  %3910 = vmatpush1.bf16.msra.mxu0 %v3909_v56  ;;  %v3895_v48 = vpack.c.bf16 %v2968_v32, %v2950_v11  ;;  %3258 = vmatprep.mubr.f32.mxu0 %v7609_v55 }
 0x8a9   : > { %v2966_v63 = vsel %vm7682_vm14, %v4599_v5, %v4563_v51  ;;  %v3913_v8 = vpack.c.bf16 %v2967_v13, %v2949_v45  ;;  %v3915_v2 = vpack.c.bf16 %v2989_v36, %v7120_v41  ;;  %4616 = vset.pattern.permute.xlu0 %v4638_v33  ;;  %v7690_v13 = vld [vmem:[#allocation15_spill] sm:$0xff] }
 0x8aa   : > { %v2986_v61 = vsel %vm292_vm5, %v4569_v7, %v4603_v49  ;;  %3896 = vmatprep.subr.bf16.mxu1 %v3895_v48  ;;  %v3911_v12 = vpack.c.bf16 %v2966_v63, %v2948_v60  ;;  %v2985_v19 = vsel %vm292_vm5, %v4603_v49, %v4604_v29  ;;  %v2984_v25 = vsel %vm292_vm5, %v4604_v29, %v2983_v3  ;;  %vm7684_vm5 = vmmov %vm7650_vm0  ;;  %v7691_v60 = vld [vmem:[#allocation13_spill] sm:$0xff]  ;;  %v7692_v49 = vld [vmem:[#allocation11_spill] sm:$0xff] }
 0x8ab   : > { %v3901_v18 = vpack.c.bf16 %v2986_v61, %v7123_v15  ;;  %3898 = vmatpush1.bf16.msra.mxu1 %v3897_v50  ;;  %v4612_v51 = vpop.permute.xlu1 %4611  ;;  %v4607_v9 = vpop.permute.xlu0 %4606  ;;  %v3899_v52 = vpack.c.bf16 %v2985_v19, %v7136_v39  ;;  %v3917_v59 = vpack.c.bf16 %v2984_v25, %v7139_v6  ;;  %v7693_v50 = vld [vmem:[#allocation10_spill] sm:$0xff] }
 0x8ac   : > { %3912 = vmatprep.subr.bf16.mxu0 %v3911_v12  ;;  %v4614_v20 = vunpack.i.h.bf16 %v4612_v51  ;;  %v4613_v7 = vunpack.i.l.bf16 %v4612_v51  ;;  %v4609_v1 = vunpack.i.h.bf16 %v4607_v9  ;;  %v4608_v23 = vunpack.i.l.bf16 %v4607_v9 }
 0x8ad   : > { %3914 = vmatpush1.bf16.msra.mxu0 %v3913_v8  ;;  %3900 = vmatprep.subr.bf16.mxu1 %v3899_v52 }
 0x8ae   : > { %v3022_v41 = vsel %vm330_vm11, %v4579_v62, %v4613_v7  ;;  %v3004_v15 = vsel %vm311_vm10, %v4574_v22, %v4608_v23  ;;  %3916 = vmatprep.subr.bf16.mxu0 %v3915_v2  ;;  %v3003_v39 = vsel %vm311_vm10, %v4608_v23, %v4609_v1  ;;  %v3021_v37 = vsel %vm330_vm11, %v4613_v7, %v4614_v20 }
 0x8af   : > { %v3905_v26 = vpack.c.bf16 %v3022_v41, %v3004_v15  ;;  %3902 = vmatpush1.bf16.msra.mxu1 %v3901_v18  ;;  %v3019_v21 = vpop.permute.xlu1 %3018  ;;  %v3001_v58 = vpop.permute.xlu0 %3000  ;;  %v3903_v40 = vpack.c.bf16 %v3021_v37, %v3003_v39 }
 0x8b0   : > { %v3020_v62 = vsel %vm330_vm11, %v4614_v20, %v3019_v21  ;;  %v3025_v10 = vsel %vm330_vm11, %v3019_v21, %v7177_v34  ;;  %v3002_v22 = vsel %vm311_vm10, %v4609_v1, %v3001_v58  ;;  %v3007_v47 = vsel %vm311_vm10, %v3001_v58, %v7171_v16  ;;  %vm7685_vm10 = vmmov %vm7650_vm0 }
 0x8b1   : > { %v3919_v6 = vpack.c.bf16 %v3025_v10, %v3007_v47  ;;  %v3921_v0 = vpack.c.bf16 %v3020_v62, %v3002_v22  ;;  %3918 = vmatpush1.bf16.msra.mxu0 %v3917_v59  ;;  %3904 = vmatprep.subr.bf16.mxu1 %v3903_v40  ;;  %vm7686_vm11 = vmmov %vm7680_vm8 }
 0x8b3   : > { %3906 = vmatpush1.bf16.msra.mxu1 %v3905_v26  ;;  %v3035_v46 = vpop.permute.xlu1 %3034  ;;  %v3033_v53 = vpop.permute.xlu0 %3032  ;;  %3920 = vmatprep.subr.bf16.mxu0 %v3919_v6 }
 0x8b4   : > { %v3040_v30 = vsel %vm7683_vm1, %v7249_v24, %v3033_v53  ;;  %v3039_v34 = vsel %vm7684_vm5, %v3033_v53, %v3035_v46  ;;  %v3271_v24 = vld [vmem:[%s7406_s2 + $0x26] sm:$0x7] }
 0x8b5   : > { %3922 = vmatpush1.bf16.msra.mxu0 %v3921_v0  ;;  %3139 = vmatprep.subr.mxu1 %v3039_v34 }
 0x8b6   : > { %3274 = vperm.xlu0 %4616, %v3271_v24  }
 0x8b7   : > { %3140 = vmatpush1.msra.mxu1 %v3040_v30  ;;  %v3037_v42 = vpop.permute.xlu0 %3036 }
 0x8b8   : > { %v3038_v16 = vsel %vm7685_vm10, %v3035_v46, %v3037_v42  ;;  %3616 = vmatmul.mubr.msk.f32.vlgmr.msra.gmra.mrb[14].mxu1 %vm7686_vm11, %v7166_v4  ;;  %v3043_v14 = vsel %vm7650_vm0, %v3037_v42, %v7175_v38  ;;  %v7688_v38 = vld [vmem:[#allocation9_spill] sm:$0xff] }
 0x8b9   : > { %3210 = vmatprep.subr.mxu0 %v3043_v14  ;;  %3362 = vmatprep.mubr.f32.mxu1 %v7609_v55 }
 0x8ba   : > { %3211 = vmatpush1.msra.mxu0 %v3038_v16 }
 0x8bb   : > { %3617 = vmatmul.mubr.msk.f32.vlgmr.msra.gmra.mrb[18].mxu0 %vm7687_vm12, %v7166_v4 }
 0x8c4   : > { %v3048_v35 = vpop.permute.xlu1 %3047 }
 0x935   : > { %v3275_v8 = vpop.permute.xlu0 %3274 }
 0x97a   : > { %v3118_v28 = vpop.f32.mrb[16].mxu0 }
 0x97b   : > { %v3119_v5 = vadd.f32 %v3118_v28, %v3048_v35  ;;  %v3120_v44 = vpop.f32.mrb[17].mxu0 }
 0x97c   : > { %v3121_v17 = vadd.f32 %v3120_v44, %v3048_v35 }
 0x97d   : > { %v3265_v57 = vadd.f32 %v3119_v5, %v7689_v54 }
 0x97e   : > { %v3266_v43 = vadd.f32 %v3121_v17, %v7688_v38 }
 0x980   : > { %3618 = vmatprep.subr.msk.mxu1 %vm482_vm6, %v3266_v43 }
 0x981   : > { %3619 = vmatpush1.msk.msra.mxu1 %vm482_vm6, %v3265_v57 }
 0x982   : > { %3620 = vmatmul.mubr.msk.f32.vlgmr.msra.gmra.mrb[16].mxu1 %vm3277_vm15, %v3271_v24 }
 0x983   : > { %3433 = vmatprep.mubr.f32.mxu1 %v7609_v55 }
 0x98b   : > { %v3189_v4 = vpop.f32.mrb[14].mxu1 }
 0x98c   : > { %v3190_v31 = vadd.f32 %v3189_v4, %v3048_v35  ;;  %v3191_v56 = vpop.f32.mrb[15].mxu1 }
 0x98d   : > { %v3192_v45 = vadd.f32 %v3191_v56, %v3048_v35 }
 0x98e   : > { %v3260_v11 = vpop.f32.mrb[18].mxu0  ;;  %v3267_v36 = vadd.f32 %v3190_v31, %v7691_v60 }
 0x98f   : > { %v3268_v3 = vadd.f32 %v3192_v45, %v7690_v13  ;;  %v3261_v27 = vadd.f32 %v3260_v11, %v3048_v35  ;;  %v3262_v32 = vpop.f32.mrb[19].mxu0 }
 0x990   : > { %v3263_v29 = vadd.f32 %v3262_v32, %v3048_v35 }
 0x991   : > { %3621 = vmatprep.subr.msk.mxu1 %vm482_vm6, %v3268_v3  ;;  %v3269_v63 = vadd.f32 %v3261_v27, %v7693_v50 }
 0x992   : > { %v3270_v48 = vadd.f32 %v3263_v29, %v7692_v49  ;;  %3622 = vmatpush1.msk.msra.mxu1 %vm482_vm6, %v3267_v36 }
 0x993   : > { %3623 = vmatmul.mubr.msk.f32.vlgmr.msra.gmra.mrb[18].mxu1 %vm3277_vm15, %v3271_v24 }
 0x994   : > { %3624 = vmatprep.subr.msk.mxu1 %vm482_vm6, %v3270_v48  ;;  %3504 = vmatprep.mubr.f32.mxu1 %v7609_v55 }
 0x995   : > { %3625 = vmatpush1.msk.msra.mxu1 %vm482_vm6, %v3269_v63 }
 0x997   : > { %3626 = vmatmul.mubr.msk.f32.vlgmr.msra.gmra.mrb[20].mxu1 %vm3277_vm15, %v3271_v24 }
 0xa55   : > { %v3364_v61 = vpop.f32.mrb[16].mxu1 }
 0xa56   : > { %v3365_v12 = vadd.f32 %v3364_v61, %v3275_v8  ;;  %v3366_v19 = vpop.f32.mrb[17].mxu1 }
 0xa57   : > { %v3367_v2 = vadd.f32 %v3366_v19, %v3275_v8 }
 0xa59   : > { %v3517_v25 = vcombine.low %v3365_v12, %v3367_v2 }
 0xa5b   : > { %3523 = vst [vmem:[%s170_s20] sm:$0x77] %v3517_v25 }
 0xa66   : > { %v3435_v18 = vpop.f32.mrb[18].mxu1 }
 0xa67   : > { %v3436_v51 = vadd.f32 %v3435_v18, %v3275_v8  ;;  %v3437_v9 = vpop.f32.mrb[19].mxu1 }
 0xa68   : > { %v3438_v55 = vadd.f32 %v3437_v9, %v3275_v8 }
 0xa6a   : > { %v3518_v52 = vcombine.low %v3436_v51, %v3438_v55  ;;  %v3506_v20 = vpop.f32.mrb[20].mxu1 }
 0xa6b   : > { %v3507_v7 = vadd.f32 %v3506_v20, %v3275_v8  ;;  %v3508_v1 = vpop.f32.mrb[21].mxu1 }
 0xa6c   : > { %3524 = vst [vmem:[%s170_s20 + $0x8] sm:$0x77] %v3518_v52  ;;  %v3509_v23 = vadd.f32 %v3508_v1, %v3275_v8 }
 0xa6e   : > { %v3519_v41 = vcombine.low %v3507_v7, %v3509_v23 }
 0xa70   : > { %3525 = vst [vmem:[%s170_s20 + $0x10] sm:$0x77] %v3519_v41 }
 0xa71 PF: > { %s13_s12 = sadd.s32 1, %s4623_s12  }
 0xa72   : > { %p10_p4 = scmp.ge.s32.totalorder %s13_s12, 4  }
 0xa74   :  { %12 = sbr.rel (!%p10_p4) target bundleno = 1 (0x1), region = 62 }

</bundles_post_ra>
